<compile_context>
chip_gen: v7x
topology: tpu7x:2x2x1
jax: 0.10.0
libtpu: 0.0.40
codegen_flags: <defaults>
</compile_context>

<pallas_src>
import functools

import jax
import jax.numpy as jnp
from jax.experimental import pallas as pl
from jax.experimental.pallas import tpu as pltpu


# ---------------------------------------------------------------------------
# Model configuration (synthetic stand-in for the timm EfficientNet backbone)
# ---------------------------------------------------------------------------

BLOCK_CHANNELS = [(16, 16), (16, 24), (24, 32), (32, 48),
                  (48, 64), (64, 96), (96, 128)]   # (cin, cout) of blocks 0..6
STEM_OUT = 16
C_PAD = 128          # lane-padded width of every block activation
HEAD_PAD = 256       # lane-padded width of conv_head output / features_
CLS_PAD = 128        # lane-padded width of the classifier output
K_STEM_PAD = 32      # 3x3x3 = 27 im2col K, padded to a nicer width
POOL_FROM = 3        # blocks 3..6 produce layer4..layer7 (max-pooled paths)


def _full_spec(shape):
    """Single-block spec covering the whole array (grid=(1,))."""
    return pl.BlockSpec(shape, lambda *_: (0,) * len(shape))


# ---------------------------------------------------------------------------
# Fused Pallas kernel: the entire network with VMEM-resident activations.
# ---------------------------------------------------------------------------

def _fused_net_kernel(patches_ref, stem_w_ref, stem_b_ref,
                      blocks_w_ref, blocks_b_ref,
                      head_w_ref, head_b_ref,
                      cls_w_ref, cls_b_ref,
                      preds_ref, feat_ref, pooled_ref,
                      *, n, ho, wo, n_blocks, pool_from):
    def mm_bias_silu(x, w, b):
        # bf16 matmul on the MXU, f32 accumulation; bias + SiLU in f32.
        y = jnp.dot(x.astype(jnp.bfloat16), w,
                    preferred_element_type=jnp.float32) + b
        return y * jax.nn.sigmoid(y)

    # conv_stem + bn1 (+ SiLU); im2col patches arrive as [M, K_STEM_PAD]
    h = mm_bias_silu(patches_ref[...], stem_w_ref[...], stem_b_ref[...])

    quad_maxes = []
    for li in range(n_blocks):
        h = mm_bias_silu(h, blocks_w_ref[li], blocks_b_ref[li])   # [M, C_PAD]
        if li >= pool_from:
            # AdaptiveMaxPool2d(2): quadrant maxima while still in VMEM.
            c = h.shape[-1]
            hc = h.reshape(n, ho, wo, c)
            # max over W halves (sublane-direction reduce), then H halves
            hw = jnp.max(hc.reshape(n, ho, 2, wo // 2, c), axis=3)  # [n,ho,2,c]
            q = jnp.max(hw.reshape(n, 2, ho // 2, 2, c), axis=2)    # [n,2,2,c]
            quad_maxes.append(q.reshape(n, 4, c))                   # (h*2 + w)

    # One lane-dense store for all four pooled layers: [4, n, 4, C_PAD]
    pooled_ref[...] = jnp.stack(quad_maxes, axis=0)

    # conv_head + bn2 (+ SiLU), then global avg pool (timm: avg + flatten)
    feats = mm_bias_silu(h, head_w_ref[...], head_b_ref[...])       # [M, HEAD_PAD]
    pooled_feat = jnp.mean(feats.reshape(n, ho * wo, feats.shape[-1]), axis=1)
    feat_ref[...] = pooled_feat                                     # [n, HEAD_PAD]

    # classifier (padded to CLS_PAD lanes; padded rows of W are zero)
    preds = jnp.dot(pooled_feat.astype(jnp.bfloat16), cls_w_ref[...],
                    preferred_element_type=jnp.float32) + cls_b_ref[...]
    preds_ref[...] = preds                                          # [n, CLS_PAD]


def fused_network(patches, p, *, n, ho, wo):
    """One pallas_call running the entire network on VMEM-resident data."""
    kernel = functools.partial(_fused_net_kernel, n=n, ho=ho, wo=wo,
                               n_blocks=len(BLOCK_CHANNELS),
                               pool_from=POOL_FROM)
    out_shape = (
        jax.ShapeDtypeStruct((n, CLS_PAD), jnp.float32),      # preds (padded)
        jax.ShapeDtypeStruct((n, HEAD_PAD), jnp.float32),     # features_ (padded)
        jax.ShapeDtypeStruct((4, n, 4, C_PAD), jnp.float32),  # pooled layer4..7
    )
    in_arrays = (patches, p["stem_w"], p["stem_b"],
                 p["blocks_w"], p["blocks_b"],
                 p["head_w"], p["head_b"],
                 p["cls_w"], p["cls_b"])
    return pl.pallas_call(
        kernel,
        grid=(1,),
        in_specs=[_full_spec(a.shape) for a in in_arrays],
        out_specs=tuple(_full_spec(s.shape) for s in out_shape),
        out_shape=out_shape,
        compiler_params=pltpu.CompilerParams(
            dimension_semantics=("arbitrary",)),
    )(*in_arrays)
    # TODO(synk): if batch/spatial sizes grow, add a token-tile grid axis
    # marked "parallel" (megacore on v7x) and set vmem_limit_bytes explicitly.


# ---------------------------------------------------------------------------
# Glue: im2col, BN folding, parameter construction (lane-padded, bf16 weights)
# ---------------------------------------------------------------------------

def im2col_stride2_k3(x_nhwc):
    """3x3, stride-2, pad-1 patch extraction. [N,H,W,C] -> [N,H/2,W/2,9*C]."""
    N, H, W, C = x_nhwc.shape
    xp = jnp.pad(x_nhwc, ((0, 0), (1, 1), (1, 1), (0, 0)))
    Ho, Wo = H // 2, W // 2
    patches = [xp[:, kh:kh + 2 * Ho:2, kw:kw + 2 * Wo:2, :]
               for kh in range(3) for kw in range(3)]
    return jnp.concatenate(patches, axis=-1)


def make_conv_bn_params(key, cin, cout, eps=1e-5):
    """Conv (no bias) + folded inference-mode BatchNorm -> (W_eff, b_eff)."""
    k1, k2, k3, k4, k5 = jax.random.split(key, 5)
    w = jax.random.normal(k1, (cin, cout), jnp.float32) / jnp.sqrt(cin)
    gamma = 1.0 + 0.1 * jax.random.normal(k2, (cout,), jnp.float32)
    beta = 0.1 * jax.random.normal(k3, (cout,), jnp.float32)
    mean = 0.1 * jax.random.normal(k4, (cout,), jnp.float32)
    var = jnp.abs(jax.random.normal(k5, (cout,), jnp.float32)) + 0.5
    scale = gamma / jnp.sqrt(var + eps)
    return w * scale[None, :], beta - mean * scale


def _pad_wb(w, b, k_pad, n_pad):
    """Zero-pad [cin,cout] weights / [cout] bias to lane-aligned shapes.

    Zero padding is exact: padded activation lanes carry SiLU(0) = 0 forever."""
    cin, cout = w.shape
    w_p = jnp.zeros((k_pad, n_pad), jnp.float32).at[:cin, :cout].set(w)
    b_p = jnp.zeros((1, n_pad), jnp.float32).at[0, :cout].set(b)
    return w_p.astype(jnp.bfloat16), b_p


def make_params(key, n_classes=5, feature_space=160):
    keys = jax.random.split(key, 16)
    params = {}

    # conv_stem: 3 -> 16, kernel 3x3 (im2col K = 27), padded to [32, 128]
    sw, sb = make_conv_bn_params(keys[0], 9 * 3, STEM_OUT)
    params["stem_w"], params["stem_b"] = _pad_wb(sw, sb, K_STEM_PAD, C_PAD)

    # blocks[0..6]: fused pointwise conv + folded BN, all padded to [128, 128]
    bw, bb = [], []
    for i, (cin, cout) in enumerate(BLOCK_CHANNELS):
        w, b = make_conv_bn_params(keys[1 + i], cin, cout)
        w_p, b_p = _pad_wb(w, b, C_PAD, C_PAD)
        bw.append(w_p)
        bb.append(b_p)
    params["blocks_w"] = jnp.stack(bw)          # [7, 128, 128] bf16
    params["blocks_b"] = jnp.stack(bb)          # [7, 1, 128]   f32

    # conv_head + bn2: 128 -> feature_space, padded to [128, 256]
    hw, hb = make_conv_bn_params(keys[8], BLOCK_CHANNELS[-1][1], feature_space)
    params["head_w"], params["head_b"] = _pad_wb(hw, hb, C_PAD, HEAD_PAD)

    # classifier = nn.Linear(feature_space, n_classes), padded to [256, 128]
    cw = jax.random.normal(keys[9], (feature_space, n_classes),
                           jnp.float32) / jnp.sqrt(feature_space)
    cb = 0.01 * jax.random.normal(keys[10], (n_classes,), jnp.float32)
    params["cls_w"], params["cls_b"] = _pad_wb(cw, cb, HEAD_PAD, CLS_PAD)
    return params


# ---------------------------------------------------------------------------
# Forward pass (mirrors EfficientNetFamily.forward)
# ---------------------------------------------------------------------------

def efficientnet_family_forward(x_nchw, params, indices_1, indices_2,
                                indices_3, indices_4, n_classes, feature_space,
                                use_only_flatten=False):
    x = jnp.transpose(x_nchw, (0, 2, 3, 1)).astype(jnp.float32)   # NHWC
    N, H, W, _ = x.shape
    Ho, Wo = H // 2, W // 2

    # im2col for the stride-2 3x3 stem (tiny; stays in the XLA wrapper)
    # TODO(synk): fold im2col into the kernel as 9 accumulated taps if the
    # input resolution ever grows enough for this materialization to matter.
    patches = im2col_stride2_k3(x).reshape(N * Ho * Wo, -1)        # [M, 27]
    patches = jnp.pad(patches, ((0, 0), (0, K_STEM_PAD - patches.shape[1])))

    preds_p, feat_p, pooled_p = fused_network(patches, params, n=N, ho=Ho, wo=Wo)

    preds = preds_p[:, :n_classes]
    features_ = feat_p[:, :feature_space]
    if use_only_flatten:
        return preds, features_

    # layer4..7 = outputs of blocks 3..6 (real channel widths)
    layer_channels = [BLOCK_CHANNELS[i][1] for i in range(POOL_FROM, 7)]
    all_indices = [indices_1, indices_2, indices_3, indices_4]
    selected = []
    for li, (c, idx) in enumerate(zip(layer_channels, all_indices)):
        pooled = pooled_p[li, :, :, :c]                            # [N, 4, C]
        # PyTorch: AdaptiveMaxPool2d on NCHW then Flatten -> (c, h, w) order
        flat = jnp.transpose(pooled, (0, 2, 1)).reshape(N, -1)     # [N, 4*C]
        selected.append(flat[:, idx])
    representation_features = jnp.concatenate(selected, axis=1)
    return preds, representation_features


# ---------------------------------------------------------------------------
# Demo
# ---------------------------------------------------------------------------

if __name__ == "__main__":
    key = jax.random.PRNGKey(0)
    k_params, k_x = jax.random.split(key)

    n_classes = 5
    feature_space = 160
    params = make_params(k_params, n_classes=n_classes,
                         feature_space=feature_space)

    # Deterministic index sets (valid ranges: 48*4, 64*4, 96*4, 128*4)
    indices_1 = jnp.array([0, 7, 50, 191], dtype=jnp.int32)
    indices_2 = jnp.array([1, 64, 128, 255], dtype=jnp.int32)
    indices_3 = jnp.array([2, 100, 300], dtype=jnp.int32)
    indices_4 = jnp.array([3, 256, 511], dtype=jnp.int32)

    # Input: NCHW like PyTorch, small image
    x = jax.random.normal(k_x, (2, 3, 16, 16), jnp.float32)

    fwd = jax.jit(functools.partial(
        efficientnet_family_forward,
        indices_1=indices_1, indices_2=indices_2,
        indices_3=indices_3, indices_4=indices_4,
        n_classes=n_classes, feature_space=feature_space))

    preds, rep = fwd(x, params)
    jax.block_until_ready((preds, rep))

    assert preds.shape == (2, n_classes)
    assert rep.shape == (2, indices_1.size + indices_2.size +
                         indices_3.size + indices_4.size)
    assert bool(jnp.all(jnp.isfinite(preds))) and bool(jnp.all(jnp.isfinite(rep)))
    # TODO(synk): timm pretrained weights / exact MBConv internals (depthwise
    # conv, SE) are synthesized as fused pointwise blocks, not checkpoint-exact.
    print("KERNEL_OK")
</pallas_src>

<mosaic_0001>
module attributes {stable_mosaic.version = 11 : i64} {
  func.func @_fused_net_kernel(%arg0: i32, %arg1: memref<128x32xf32, #tpu.memory_space<vmem>>, %arg2: memref<32x128xbf16, #tpu.memory_space<vmem>>, %arg3: memref<1x128xf32, #tpu.memory_space<vmem>>, %arg4: memref<7x128x128xbf16, #tpu.memory_space<vmem>>, %arg5: memref<7x1x128xf32, #tpu.memory_space<vmem>>, %arg6: memref<128x256xbf16, #tpu.memory_space<vmem>>, %arg7: memref<1x256xf32, #tpu.memory_space<vmem>>, %arg8: memref<256x128xbf16, #tpu.memory_space<vmem>>, %arg9: memref<1x128xf32, #tpu.memory_space<vmem>>, %arg10: memref<2x128xf32, #tpu.memory_space<vmem>>, %arg11: memref<2x256xf32, #tpu.memory_space<vmem>>, %arg12: memref<4x2x4x128xf32, #tpu.memory_space<vmem>>) attributes {dimension_semantics = [#tpu.dimension_semantics<arbitrary>], iteration_bounds = array<i64: 1>, scalar_prefetch = 0 : i64, scratch_operands = 0 : i64, tpu.core_type = #tpu.core_type<tc>, window_params = [{pipeline_mode = #tpu.pipeline_mode<synchronous>, transform_indices = @transform_0, window_bounds = array<i64: 128, 32>}, {pipeline_mode = #tpu.pipeline_mode<synchronous>, transform_indices = @transform_1, window_bounds = array<i64: 32, 128>}, {pipeline_mode = #tpu.pipeline_mode<synchronous>, transform_indices = @transform_2, window_bounds = array<i64: 1, 128>}, {pipeline_mode = #tpu.pipeline_mode<synchronous>, transform_indices = @transform_3, window_bounds = array<i64: 7, 128, 128>}, {pipeline_mode = #tpu.pipeline_mode<synchronous>, transform_indices = @transform_4, window_bounds = array<i64: 7, 1, 128>}, {pipeline_mode = #tpu.pipeline_mode<synchronous>, transform_indices = @transform_5, window_bounds = array<i64: 128, 256>}, {pipeline_mode = #tpu.pipeline_mode<synchronous>, transform_indices = @transform_6, window_bounds = array<i64: 1, 256>}, {pipeline_mode = #tpu.pipeline_mode<synchronous>, transform_indices = @transform_7, window_bounds = array<i64: 256, 128>}, {pipeline_mode = #tpu.pipeline_mode<synchronous>, transform_indices = @transform_8, window_bounds = array<i64: 1, 128>}, {pipeline_mode = #tpu.pipeline_mode<synchronous>, transform_indices = @transform_9, window_bounds = array<i64: 2, 128>}, {pipeline_mode = #tpu.pipeline_mode<synchronous>, transform_indices = @transform_10, window_bounds = array<i64: 2, 256>}, {pipeline_mode = #tpu.pipeline_mode<synchronous>, transform_indices = @transform_11, window_bounds = array<i64: 4, 2, 4, 128>}]} {
    %c0 = arith.constant 0 : index
    %c0_0 = arith.constant 0 : index
    %0 = vector.load %arg1[%c0, %c0_0] : memref<128x32xf32, #tpu.memory_space<vmem>>, vector<128x32xf32>
    %c0_1 = arith.constant 0 : index
    %c0_2 = arith.constant 0 : index
    %1 = vector.load %arg2[%c0_1, %c0_2] : memref<32x128xbf16, #tpu.memory_space<vmem>>, vector<32x128xbf16>
    %c0_3 = arith.constant 0 : index
    %c0_4 = arith.constant 0 : index
    %2 = vector.load %arg3[%c0_3, %c0_4] : memref<1x128xf32, #tpu.memory_space<vmem>>, vector<1x128xf32>
    %3 = arith.truncf %0 : vector<128x32xf32> to vector<128x32xbf16>
    %cst = arith.constant dense<0.000000e+00> : vector<128x128xf32>
    %4 = tpu.matmul %3, %1, %cst {dimension_numbers = #tpu.dot_dimension_numbers<[1], [0], [0], [1], [0, 0, 1, 1], [], []>} : vector<128x32xbf16>, vector<32x128xbf16>, vector<128x128xf32> -> vector<128x128xf32>
    %5 = vector.broadcast %2 : vector<1x128xf32> to vector<128x128xf32>
    %6 = arith.addf %4, %5 : vector<128x128xf32>
    %7 = arith.negf %6 : vector<128x128xf32>
    %8 = math.exp %7 : vector<128x128xf32>
    %cst_5 = arith.constant 1.000000e+00 : f32
    %9 = vector.broadcast %cst_5 : f32 to vector<128x128xf32>
    %10 = arith.addf %9, %8 : vector<128x128xf32>
    %11 = arith.divf %9, %10 : vector<128x128xf32>
    %12 = arith.mulf %6, %11 : vector<128x128xf32>
    %c0_6 = arith.constant 0 : index
    %c0_7 = arith.constant 0 : index
    %c0_8 = arith.constant 0 : index
    %13 = vector.load %arg4[%c0_6, %c0_7, %c0_8] : memref<7x128x128xbf16, #tpu.memory_space<vmem>>, vector<1x128x128xbf16>
    %14 = vector.shape_cast %13 : vector<1x128x128xbf16> to vector<128x128xbf16>
    %c0_9 = arith.constant 0 : index
    %c0_10 = arith.constant 0 : index
    %c0_11 = arith.constant 0 : index
    %15 = vector.load %arg5[%c0_9, %c0_10, %c0_11] : memref<7x1x128xf32, #tpu.memory_space<vmem>>, vector<1x1x128xf32>
    %16 = vector.shape_cast %15 : vector<1x1x128xf32> to vector<1x128xf32>
    %17 = arith.truncf %12 : vector<128x128xf32> to vector<128x128xbf16>
    %cst_12 = arith.constant dense<0.000000e+00> : vector<128x128xf32>
    %18 = tpu.matmul %17, %14, %cst_12 {dimension_numbers = #tpu.dot_dimension_numbers<[1], [0], [0], [1], [0, 0, 1, 1], [], []>} : vector<128x128xbf16>, vector<128x128xbf16>, vector<128x128xf32> -> vector<128x128xf32>
    %19 = vector.broadcast %16 : vector<1x128xf32> to vector<128x128xf32>
    %20 = arith.addf %18, %19 : vector<128x128xf32>
    %21 = arith.negf %20 : vector<128x128xf32>
    %22 = math.exp %21 : vector<128x128xf32>
    %cst_13 = arith.constant 1.000000e+00 : f32
    %23 = vector.broadcast %cst_13 : f32 to vector<128x128xf32>
    %24 = arith.addf %23, %22 : vector<128x128xf32>
    %25 = arith.divf %23, %24 : vector<128x128xf32>
    %26 = arith.mulf %20, %25 : vector<128x128xf32>
    %c1 = arith.constant 1 : index
    %c0_14 = arith.constant 0 : index
    %c0_15 = arith.constant 0 : index
    %27 = vector.load %arg4[%c1, %c0_14, %c0_15] : memref<7x128x128xbf16, #tpu.memory_space<vmem>>, vector<1x128x128xbf16>
    %28 = vector.shape_cast %27 : vector<1x128x128xbf16> to vector<128x128xbf16>
    %c1_16 = arith.constant 1 : index
    %c0_17 = arith.constant 0 : index
    %c0_18 = arith.constant 0 : index
    %29 = vector.load %arg5[%c1_16, %c0_17, %c0_18] : memref<7x1x128xf32, #tpu.memory_space<vmem>>, vector<1x1x128xf32>
    %30 = vector.shape_cast %29 : vector<1x1x128xf32> to vector<1x128xf32>
    %31 = arith.truncf %26 : vector<128x128xf32> to vector<128x128xbf16>
    %cst_19 = arith.constant dense<0.000000e+00> : vector<128x128xf32>
    %32 = tpu.matmul %31, %28, %cst_19 {dimension_numbers = #tpu.dot_dimension_numbers<[1], [0], [0], [1], [0, 0, 1, 1], [], []>} : vector<128x128xbf16>, vector<128x128xbf16>, vector<128x128xf32> -> vector<128x128xf32>
    %33 = vector.broadcast %30 : vector<1x128xf32> to vector<128x128xf32>
    %34 = arith.addf %32, %33 : vector<128x128xf32>
    %35 = arith.negf %34 : vector<128x128xf32>
    %36 = math.exp %35 : vector<128x128xf32>
    %cst_20 = arith.constant 1.000000e+00 : f32
    %37 = vector.broadcast %cst_20 : f32 to vector<128x128xf32>
    %38 = arith.addf %37, %36 : vector<128x128xf32>
    %39 = arith.divf %37, %38 : vector<128x128xf32>
    %40 = arith.mulf %34, %39 : vector<128x128xf32>
    %c2 = arith.constant 2 : index
    %c0_21 = arith.constant 0 : index
    %c0_22 = arith.constant 0 : index
    %41 = vector.load %arg4[%c2, %c0_21, %c0_22] : memref<7x128x128xbf16, #tpu.memory_space<vmem>>, vector<1x128x128xbf16>
    %42 = vector.shape_cast %41 : vector<1x128x128xbf16> to vector<128x128xbf16>
    %c2_23 = arith.constant 2 : index
    %c0_24 = arith.constant 0 : index
    %c0_25 = arith.constant 0 : index
    %43 = vector.load %arg5[%c2_23, %c0_24, %c0_25] : memref<7x1x128xf32, #tpu.memory_space<vmem>>, vector<1x1x128xf32>
    %44 = vector.shape_cast %43 : vector<1x1x128xf32> to vector<1x128xf32>
    %45 = arith.truncf %40 : vector<128x128xf32> to vector<128x128xbf16>
    %cst_26 = arith.constant dense<0.000000e+00> : vector<128x128xf32>
    %46 = tpu.matmul %45, %42, %cst_26 {dimension_numbers = #tpu.dot_dimension_numbers<[1], [0], [0], [1], [0, 0, 1, 1], [], []>} : vector<128x128xbf16>, vector<128x128xbf16>, vector<128x128xf32> -> vector<128x128xf32>
    %47 = vector.broadcast %44 : vector<1x128xf32> to vector<128x128xf32>
    %48 = arith.addf %46, %47 : vector<128x128xf32>
    %49 = arith.negf %48 : vector<128x128xf32>
    %50 = math.exp %49 : vector<128x128xf32>
    %cst_27 = arith.constant 1.000000e+00 : f32
    %51 = vector.broadcast %cst_27 : f32 to vector<128x128xf32>
    %52 = arith.addf %51, %50 : vector<128x128xf32>
    %53 = arith.divf %51, %52 : vector<128x128xf32>
    %54 = arith.mulf %48, %53 : vector<128x128xf32>
    %c3 = arith.constant 3 : index
    %c0_28 = arith.constant 0 : index
    %c0_29 = arith.constant 0 : index
    %55 = vector.load %arg4[%c3, %c0_28, %c0_29] : memref<7x128x128xbf16, #tpu.memory_space<vmem>>, vector<1x128x128xbf16>
    %56 = vector.shape_cast %55 : vector<1x128x128xbf16> to vector<128x128xbf16>
    %c3_30 = arith.constant 3 : index
    %c0_31 = arith.constant 0 : index
    %c0_32 = arith.constant 0 : index
    %57 = vector.load %arg5[%c3_30, %c0_31, %c0_32] : memref<7x1x128xf32, #tpu.memory_space<vmem>>, vector<1x1x128xf32>
    %58 = vector.shape_cast %57 : vector<1x1x128xf32> to vector<1x128xf32>
    %59 = arith.truncf %54 : vector<128x128xf32> to vector<128x128xbf16>
    %cst_33 = arith.constant dense<0.000000e+00> : vector<128x128xf32>
    %60 = tpu.matmul %59, %56, %cst_33 {dimension_numbers = #tpu.dot_dimension_numbers<[1], [0], [0], [1], [0, 0, 1, 1], [], []>} : vector<128x128xbf16>, vector<128x128xbf16>, vector<128x128xf32> -> vector<128x128xf32>
    %61 = vector.broadcast %58 : vector<1x128xf32> to vector<128x128xf32>
    %62 = arith.addf %60, %61 : vector<128x128xf32>
    %63 = arith.negf %62 : vector<128x128xf32>
    %64 = math.exp %63 : vector<128x128xf32>
    %cst_34 = arith.constant 1.000000e+00 : f32
    %65 = vector.broadcast %cst_34 : f32 to vector<128x128xf32>
    %66 = arith.addf %65, %64 : vector<128x128xf32>
    %67 = arith.divf %65, %66 : vector<128x128xf32>
    %68 = arith.mulf %62, %67 : vector<128x128xf32>
    %69 = vector.shape_cast %68 : vector<128x128xf32> to vector<2x8x8x128xf32>
    %70 = vector.shape_cast %69 : vector<2x8x8x128xf32> to vector<2x8x2x4x128xf32>
    %cst_35 = arith.constant dense<0xFF800000> : vector<2x8x2x128xf32>
    %71 = vector.multi_reduction <maximumf>, %70, %cst_35 [3] : vector<2x8x2x4x128xf32> to vector<2x8x2x128xf32>
    %72 = vector.shape_cast %71 : vector<2x8x2x128xf32> to vector<2x2x4x2x128xf32>
    %cst_36 = arith.constant dense<0xFF800000> : vector<2x2x2x128xf32>
    %73 = vector.multi_reduction <maximumf>, %72, %cst_36 [2] : vector<2x2x4x2x128xf32> to vector<2x2x2x128xf32>
    %74 = vector.shape_cast %73 : vector<2x2x2x128xf32> to vector<2x4x128xf32>
    %c4 = arith.constant 4 : index
    %c0_37 = arith.constant 0 : index
    %c0_38 = arith.constant 0 : index
    %75 = vector.load %arg4[%c4, %c0_37, %c0_38] : memref<7x128x128xbf16, #tpu.memory_space<vmem>>, vector<1x128x128xbf16>
    %76 = vector.shape_cast %75 : vector<1x128x128xbf16> to vector<128x128xbf16>
    %c4_39 = arith.constant 4 : index
    %c0_40 = arith.constant 0 : index
    %c0_41 = arith.constant 0 : index
    %77 = vector.load %arg5[%c4_39, %c0_40, %c0_41] : memref<7x1x128xf32, #tpu.memory_space<vmem>>, vector<1x1x128xf32>
    %78 = vector.shape_cast %77 : vector<1x1x128xf32> to vector<1x128xf32>
    %79 = arith.truncf %68 : vector<128x128xf32> to vector<128x128xbf16>
    %cst_42 = arith.constant dense<0.000000e+00> : vector<128x128xf32>
    %80 = tpu.matmul %79, %76, %cst_42 {dimension_numbers = #tpu.dot_dimension_numbers<[1], [0], [0], [1], [0, 0, 1, 1], [], []>} : vector<128x128xbf16>, vector<128x128xbf16>, vector<128x128xf32> -> vector<128x128xf32>
    %81 = vector.broadcast %78 : vector<1x128xf32> to vector<128x128xf32>
    %82 = arith.addf %80, %81 : vector<128x128xf32>
    %83 = arith.negf %82 : vector<128x128xf32>
    %84 = math.exp %83 : vector<128x128xf32>
    %cst_43 = arith.constant 1.000000e+00 : f32
    %85 = vector.broadcast %cst_43 : f32 to vector<128x128xf32>
    %86 = arith.addf %85, %84 : vector<128x128xf32>
    %87 = arith.divf %85, %86 : vector<128x128xf32>
    %88 = arith.mulf %82, %87 : vector<128x128xf32>
    %89 = vector.shape_cast %88 : vector<128x128xf32> to vector<2x8x8x128xf32>
    %90 = vector.shape_cast %89 : vector<2x8x8x128xf32> to vector<2x8x2x4x128xf32>
    %cst_44 = arith.constant dense<0xFF800000> : vector<2x8x2x128xf32>
    %91 = vector.multi_reduction <maximumf>, %90, %cst_44 [3] : vector<2x8x2x4x128xf32> to vector<2x8x2x128xf32>
    %92 = vector.shape_cast %91 : vector<2x8x2x128xf32> to vector<2x2x4x2x128xf32>
    %cst_45 = arith.constant dense<0xFF800000> : vector<2x2x2x128xf32>
    %93 = vector.multi_reduction <maximumf>, %92, %cst_45 [2] : vector<2x2x4x2x128xf32> to vector<2x2x2x128xf32>
    %94 = vector.shape_cast %93 : vector<2x2x2x128xf32> to vector<2x4x128xf32>
    %c5 = arith.constant 5 : index
    %c0_46 = arith.constant 0 : index
    %c0_47 = arith.constant 0 : index
    %95 = vector.load %arg4[%c5, %c0_46, %c0_47] : memref<7x128x128xbf16, #tpu.memory_space<vmem>>, vector<1x128x128xbf16>
    %96 = vector.shape_cast %95 : vector<1x128x128xbf16> to vector<128x128xbf16>
    %c5_48 = arith.constant 5 : index
    %c0_49 = arith.constant 0 : index
    %c0_50 = arith.constant 0 : index
    %97 = vector.load %arg5[%c5_48, %c0_49, %c0_50] : memref<7x1x128xf32, #tpu.memory_space<vmem>>, vector<1x1x128xf32>
    %98 = vector.shape_cast %97 : vector<1x1x128xf32> to vector<1x128xf32>
    %99 = arith.truncf %88 : vector<128x128xf32> to vector<128x128xbf16>
    %cst_51 = arith.constant dense<0.000000e+00> : vector<128x128xf32>
    %100 = tpu.matmul %99, %96, %cst_51 {dimension_numbers = #tpu.dot_dimension_numbers<[1], [0], [0], [1], [0, 0, 1, 1], [], []>} : vector<128x128xbf16>, vector<128x128xbf16>, vector<128x128xf32> -> vector<128x128xf32>
    %101 = vector.broadcast %98 : vector<1x128xf32> to vector<128x128xf32>
    %102 = arith.addf %100, %101 : vector<128x128xf32>
    %103 = arith.negf %102 : vector<128x128xf32>
    %104 = math.exp %103 : vector<128x128xf32>
    %cst_52 = arith.constant 1.000000e+00 : f32
    %105 = vector.broadcast %cst_52 : f32 to vector<128x128xf32>
    %106 = arith.addf %105, %104 : vector<128x128xf32>
    %107 = arith.divf %105, %106 : vector<128x128xf32>
    %108 = arith.mulf %102, %107 : vector<128x128xf32>
    %109 = vector.shape_cast %108 : vector<128x128xf32> to vector<2x8x8x128xf32>
    %110 = vector.shape_cast %109 : vector<2x8x8x128xf32> to vector<2x8x2x4x128xf32>
    %cst_53 = arith.constant dense<0xFF800000> : vector<2x8x2x128xf32>
    %111 = vector.multi_reduction <maximumf>, %110, %cst_53 [3] : vector<2x8x2x4x128xf32> to vector<2x8x2x128xf32>
    %112 = vector.shape_cast %111 : vector<2x8x2x128xf32> to vector<2x2x4x2x128xf32>
    %cst_54 = arith.constant dense<0xFF800000> : vector<2x2x2x128xf32>
    %113 = vector.multi_reduction <maximumf>, %112, %cst_54 [2] : vector<2x2x4x2x128xf32> to vector<2x2x2x128xf32>
    %114 = vector.shape_cast %113 : vector<2x2x2x128xf32> to vector<2x4x128xf32>
    %c6 = arith.constant 6 : index
    %c0_55 = arith.constant 0 : index
    %c0_56 = arith.constant 0 : index
    %115 = vector.load %arg4[%c6, %c0_55, %c0_56] : memref<7x128x128xbf16, #tpu.memory_space<vmem>>, vector<1x128x128xbf16>
    %116 = vector.shape_cast %115 : vector<1x128x128xbf16> to vector<128x128xbf16>
    %c6_57 = arith.constant 6 : index
    %c0_58 = arith.constant 0 : index
    %c0_59 = arith.constant 0 : index
    %117 = vector.load %arg5[%c6_57, %c0_58, %c0_59] : memref<7x1x128xf32, #tpu.memory_space<vmem>>, vector<1x1x128xf32>
    %118 = vector.shape_cast %117 : vector<1x1x128xf32> to vector<1x128xf32>
    %119 = arith.truncf %108 : vector<128x128xf32> to vector<128x128xbf16>
    %cst_60 = arith.constant dense<0.000000e+00> : vector<128x128xf32>
    %120 = tpu.matmul %119, %116, %cst_60 {dimension_numbers = #tpu.dot_dimension_numbers<[1], [0], [0], [1], [0, 0, 1, 1], [], []>} : vector<128x128xbf16>, vector<128x128xbf16>, vector<128x128xf32> -> vector<128x128xf32>
    %121 = vector.broadcast %118 : vector<1x128xf32> to vector<128x128xf32>
    %122 = arith.addf %120, %121 : vector<128x128xf32>
    %123 = arith.negf %122 : vector<128x128xf32>
    %124 = math.exp %123 : vector<128x128xf32>
    %cst_61 = arith.constant 1.000000e+00 : f32
    %125 = vector.broadcast %cst_61 : f32 to vector<128x128xf32>
    %126 = arith.addf %125, %124 : vector<128x128xf32>
    %127 = arith.divf %125, %126 : vector<128x128xf32>
    %128 = arith.mulf %122, %127 : vector<128x128xf32>
    %129 = vector.shape_cast %128 : vector<128x128xf32> to vector<2x8x8x128xf32>
    %130 = vector.shape_cast %129 : vector<2x8x8x128xf32> to vector<2x8x2x4x128xf32>
    %cst_62 = arith.constant dense<0xFF800000> : vector<2x8x2x128xf32>
    %131 = vector.multi_reduction <maximumf>, %130, %cst_62 [3] : vector<2x8x2x4x128xf32> to vector<2x8x2x128xf32>
    %132 = vector.shape_cast %131 : vector<2x8x2x128xf32> to vector<2x2x4x2x128xf32>
    %cst_63 = arith.constant dense<0xFF800000> : vector<2x2x2x128xf32>
    %133 = vector.multi_reduction <maximumf>, %132, %cst_63 [2] : vector<2x2x4x2x128xf32> to vector<2x2x2x128xf32>
    %134 = vector.shape_cast %133 : vector<2x2x2x128xf32> to vector<2x4x128xf32>
    %135 = vector.shape_cast %74 : vector<2x4x128xf32> to vector<1x2x4x128xf32>
    %136 = vector.shape_cast %94 : vector<2x4x128xf32> to vector<1x2x4x128xf32>
    %137 = vector.shape_cast %114 : vector<2x4x128xf32> to vector<1x2x4x128xf32>
    %138 = vector.shape_cast %134 : vector<2x4x128xf32> to vector<1x2x4x128xf32>
    %139 = tpu.concatenate %135, %136, %137, %138 in 0 : vector<1x2x4x128xf32>, vector<1x2x4x128xf32>, vector<1x2x4x128xf32>, vector<1x2x4x128xf32> -> vector<4x2x4x128xf32>
    %c0_64 = arith.constant 0 : index
    %c0_65 = arith.constant 0 : index
    %c0_66 = arith.constant 0 : index
    %c0_67 = arith.constant 0 : index
    %140 = vector.load %arg12[%c0_64, %c0_65, %c0_66, %c0_67] : memref<4x2x4x128xf32, #tpu.memory_space<vmem>>, vector<4x2x4x128xf32>
    tpu.vector_store %arg12[%c0_64, %c0_65, %c0_66, %c0_67], %139 {strides = array<i32>} : memref<4x2x4x128xf32, #tpu.memory_space<vmem>>, vector<4x2x4x128xf32>,
    %c0_68 = arith.constant 0 : index
    %c0_69 = arith.constant 0 : index
    %141 = vector.load %arg6[%c0_68, %c0_69] : memref<128x256xbf16, #tpu.memory_space<vmem>>, vector<128x256xbf16>
    %c0_70 = arith.constant 0 : index
    %c0_71 = arith.constant 0 : index
    %142 = vector.load %arg7[%c0_70, %c0_71] : memref<1x256xf32, #tpu.memory_space<vmem>>, vector<1x256xf32>
    %143 = arith.truncf %128 : vector<128x128xf32> to vector<128x128xbf16>
    %cst_72 = arith.constant dense<0.000000e+00> : vector<128x256xf32>
    %144 = tpu.matmul %143, %141, %cst_72 {dimension_numbers = #tpu.dot_dimension_numbers<[1], [0], [0], [1], [0, 0, 1, 1], [], []>} : vector<128x128xbf16>, vector<128x256xbf16>, vector<128x256xf32> -> vector<128x256xf32>
    %145 = vector.broadcast %142 : vector<1x256xf32> to vector<128x256xf32>
    %146 = arith.addf %144, %145 : vector<128x256xf32>
    %147 = arith.negf %146 : vector<128x256xf32>
    %148 = math.exp %147 : vector<128x256xf32>
    %cst_73 = arith.constant 1.000000e+00 : f32
    %149 = vector.broadcast %cst_73 : f32 to vector<128x256xf32>
    %150 = arith.addf %149, %148 : vector<128x256xf32>
    %151 = arith.divf %149, %150 : vector<128x256xf32>
    %152 = arith.mulf %146, %151 : vector<128x256xf32>
    %153 = vector.shape_cast %152 : vector<128x256xf32> to vector<2x64x256xf32>
    %cst_74 = arith.constant dense<0.000000e+00> : vector<2x256xf32>
    %154 = vector.multi_reduction <add>, %153, %cst_74 [1] : vector<2x64x256xf32> to vector<2x256xf32>
    %cst_75 = arith.constant 6.400000e+01 : f32
    %155 = vector.broadcast %cst_75 : f32 to vector<2x256xf32>
    %156 = arith.divf %154, %155 : vector<2x256xf32>
    %c0_76 = arith.constant 0 : index
    %c0_77 = arith.constant 0 : index
    %157 = vector.load %arg11[%c0_76, %c0_77] : memref<2x256xf32, #tpu.memory_space<vmem>>, vector<2x256xf32>
    tpu.vector_store %arg11[%c0_76, %c0_77], %156 {strides = array<i32>} : memref<2x256xf32, #tpu.memory_space<vmem>>, vector<2x256xf32>,
    %158 = arith.truncf %156 : vector<2x256xf32> to vector<2x256xbf16>
    %c0_78 = arith.constant 0 : index
    %c0_79 = arith.constant 0 : index
    %159 = vector.load %arg8[%c0_78, %c0_79] : memref<256x128xbf16, #tpu.memory_space<vmem>>, vector<256x128xbf16>
    %cst_80 = arith.constant dense<0.000000e+00> : vector<2x128xf32>
    %160 = tpu.matmul %158, %159, %cst_80 {dimension_numbers = #tpu.dot_dimension_numbers<[1], [0], [0], [1], [0, 0, 1, 1], [], []>} : vector<2x256xbf16>, vector<256x128xbf16>, vector<2x128xf32> -> vector<2x128xf32>
    %c0_81 = arith.constant 0 : index
    %c0_82 = arith.constant 0 : index
    %161 = vector.load %arg9[%c0_81, %c0_82] : memref<1x128xf32, #tpu.memory_space<vmem>>, vector<1x128xf32>
    %162 = vector.broadcast %161 : vector<1x128xf32> to vector<2x128xf32>
    %163 = arith.addf %160, %162 : vector<2x128xf32>
    %c0_83 = arith.constant 0 : index
    %c0_84 = arith.constant 0 : index
    %164 = vector.load %arg10[%c0_83, %c0_84] : memref<2x128xf32, #tpu.memory_space<vmem>>, vector<2x128xf32>
    tpu.vector_store %arg10[%c0_83, %c0_84], %163 {strides = array<i32>} : memref<2x128xf32, #tpu.memory_space<vmem>>, vector<2x128xf32>,
    return
  }
  func.func @transform_0(%arg0: i32) -> (i32, i32) {
    %c0_i32 = arith.constant 0 : i32
    %c0_i32_0 = arith.constant 0 : i32
    %c0_i32_1 = arith.constant 0 : i32
    return %c0_i32, %c0_i32_0 : i32, i32
  }
  func.func @transform_1(%arg0: i32) -> (i32, i32) {
    %c0_i32 = arith.constant 0 : i32
    %c0_i32_0 = arith.constant 0 : i32
    %c0_i32_1 = arith.constant 0 : i32
    return %c0_i32, %c0_i32_0 : i32, i32
  }
  func.func @transform_2(%arg0: i32) -> (i32, i32) {
    %c0_i32 = arith.constant 0 : i32
    %c0_i32_0 = arith.constant 0 : i32
    %c0_i32_1 = arith.constant 0 : i32
    return %c0_i32, %c0_i32_0 : i32, i32
  }
  func.func @transform_3(%arg0: i32) -> (i32, i32, i32) {
    %c0_i32 = arith.constant 0 : i32
    %c0_i32_0 = arith.constant 0 : i32
    %c0_i32_1 = arith.constant 0 : i32
    %c0_i32_2 = arith.constant 0 : i32
    return %c0_i32, %c0_i32_0, %c0_i32_1 : i32, i32, i32
  }
  func.func @transform_4(%arg0: i32) -> (i32, i32, i32) {
    %c0_i32 = arith.constant 0 : i32
    %c0_i32_0 = arith.constant 0 : i32
    %c0_i32_1 = arith.constant 0 : i32
    %c0_i32_2 = arith.constant 0 : i32
    return %c0_i32, %c0_i32_0, %c0_i32_1 : i32, i32, i32
  }
  func.func @transform_5(%arg0: i32) -> (i32, i32) {
    %c0_i32 = arith.constant 0 : i32
    %c0_i32_0 = arith.constant 0 : i32
    %c0_i32_1 = arith.constant 0 : i32
    return %c0_i32, %c0_i32_0 : i32, i32
  }
  func.func @transform_6(%arg0: i32) -> (i32, i32) {
    %c0_i32 = arith.constant 0 : i32
    %c0_i32_0 = arith.constant 0 : i32
    %c0_i32_1 = arith.constant 0 : i32
    return %c0_i32, %c0_i32_0 : i32, i32
  }
  func.func @transform_7(%arg0: i32) -> (i32, i32) {
    %c0_i32 = arith.constant 0 : i32
    %c0_i32_0 = arith.constant 0 : i32
    %c0_i32_1 = arith.constant 0 : i32
    return %c0_i32, %c0_i32_0 : i32, i32
  }
  func.func @transform_8(%arg0: i32) -> (i32, i32) {
    %c0_i32 = arith.constant 0 : i32
    %c0_i32_0 = arith.constant 0 : i32
    %c0_i32_1 = arith.constant 0 : i32
    return %c0_i32, %c0_i32_0 : i32, i32
  }
  func.func @transform_9(%arg0: i32) -> (i32, i32) {
    %c0_i32 = arith.constant 0 : i32
    %c0_i32_0 = arith.constant 0 : i32
    %c0_i32_1 = arith.constant 0 : i32
    return %c0_i32, %c0_i32_0 : i32, i32
  }
  func.func @transform_10(%arg0: i32) -> (i32, i32) {
    %c0_i32 = arith.constant 0 : i32
    %c0_i32_0 = arith.constant 0 : i32
    %c0_i32_1 = arith.constant 0 : i32
    return %c0_i32, %c0_i32_0 : i32, i32
  }
  func.func @transform_11(%arg0: i32) -> (i32, i32, i32, i32) {
    %c0_i32 = arith.constant 0 : i32
    %c0_i32_0 = arith.constant 0 : i32
    %c0_i32_1 = arith.constant 0 : i32
    %c0_i32_2 = arith.constant 0 : i32
    %c0_i32_3 = arith.constant 0 : i32
    return %c0_i32, %c0_i32_0, %c0_i32_1, %c0_i32_2 : i32, i32, i32, i32
  }
}

</mosaic_0001>

<bundles_post_ra>
// kernel: efficientnet_family_forward.1
= control target key start
LH: loop header
LB: loop body
LE: loop exit
PB: predicated region body
PF: predicated region fallthrough
CT: control target
= control target key end

     0   :  { %17 = vsyncpa [#allocation3], 0  ;;  %vm85_vm0 = vcmask 261120   ;;  %s7744_s0 = inlined_call_operand.vmem [shape: f32[128,32], index: 0, kind: input, shape index: {}]   ;;  %s7745_s1 = inlined_call_operand.vmem [shape: bf16[32,128], index: 1, kind: input, shape index: {}]   ;;  %s7746_s2 = inlined_call_operand.vmem [shape: f32[1,128], index: 2, kind: input, shape index: {}]   ;;  %s7747_s3 = inlined_call_operand.vmem [shape: bf16[7,128,128], index: 3, kind: input, shape index: {}]   ;;  %s7748_s4 = inlined_call_operand.vmem [shape: f32[7,1,128], index: 4, kind: input, shape index: {}]   ;;  %s7749_s5 = inlined_call_operand.vmem [shape: bf16[128,256], index: 5, kind: input, shape index: {}]   ;;  %s7750_s6 = inlined_call_operand.vmem [shape: f32[1,256], index: 6, kind: input, shape index: {}]   ;;  %s7751_s7 = inlined_call_operand.vmem [shape: bf16[256,128], index: 7, kind: input, shape index: {}]   ;;  %s7752_s8 = inlined_call_operand.vmem [shape: f32[1,128], index: 8, kind: input, shape index: {}]   ;;  %s7753_s9 = inlined_call_operand.hbm [shape: f32[2,128], index: 9, kind: output, shape index: {0}]   ;;  %s7754_s10 = inlined_call_operand.hbm [shape: f32[2,256], index: 10, kind: output, shape index: {1}]   ;;  %s7755_s11 = inlined_call_operand.vmem [shape: f32[4,2,4,128], index: 11, kind: output, shape index: {2}]  }
   0x1   :  { %v5161_v0 = vld [vmem:[%s7745_s1] sm:$0xff]   ;;  %v5162_v1 = vld [vmem:[%s7745_s1 + $0x8] sm:$0xff]   ;;  %v40_v5 = vld [vmem:[%s7744_s0 + $0x10] sm:$0xff] }
   0x2   :  { %4913 = vmatprep.subr.bf16.mxu1 %v5161_v0  ;;  %v38_v2 = vld [vmem:[%s7744_s0] sm:$0xff]  ;;  %v39_v3 = vld [vmem:[%s7744_s0 + $0x8] sm:$0xff]  ;;  %v41_v6 = vld [vmem:[%s7744_s0 + $0x18] sm:$0xff] }
   0x3   :  { %4914 = vmatpush3.bf16.msra.mxu1 %v5161_v0  ;;  %v59_v4 = vpack.c.bf16 %v39_v3, %v38_v2  ;;  %v42_v7 = vld [vmem:[%s7744_s0 + $0x20] sm:$0xff]  ;;  %v43_v8 = vld [vmem:[%s7744_s0 + $0x28] sm:$0xff]  ;;  %v60_v9 = vpack.c.bf16 %v41_v6, %v40_v5  ;;  %v44_v11 = vld [vmem:[%s7744_s0 + $0x30] sm:$0xff] }
   0x4   :  { %4915 = vmatprep.subr.bf16.mxu1 %v5162_v1  ;;  %v61_v10 = vpack.c.bf16 %v43_v8, %v42_v7  ;;  %v45_v12 = vld [vmem:[%s7744_s0 + $0x38] sm:$0xff]  ;;  %v46_v13 = vld [vmem:[%s7744_s0 + $0x40] sm:$0xff]  ;;  %v47_v14 = vld [vmem:[%s7744_s0 + $0x48] sm:$0xff] }
   0x5   :  { %4917 = vmatprep.mubr.msk.bf16.mxu1 %vm85_vm0, %v59_v4  ;;  %v62_v15 = vpack.c.bf16 %v45_v12, %v44_v11  ;;  %v63_v16 = vpack.c.bf16 %v47_v14, %v46_v13  ;;  %v48_v17 = vld [vmem:[%s7744_s0 + $0x50] sm:$0xff]  ;;  %v49_v18 = vld [vmem:[%s7744_s0 + $0x58] sm:$0xff]  ;;  %v50_v19 = vld [vmem:[%s7744_s0 + $0x60] sm:$0xff] }
   0x6   :  { %v51_v20 = vld [vmem:[%s7744_s0 + $0x68] sm:$0xff]  ;;  %v64_v21 = vpack.c.bf16 %v49_v18, %v48_v17  ;;  %v52_v23 = vld [vmem:[%s7744_s0 + $0x70] sm:$0xff]  ;;  %v53_v24 = vld [vmem:[%s7744_s0 + $0x78] sm:$0xff] }
   0x7   :  { %4916 = vmatpush3.bf16.msra.mxu1 %v5162_v1  ;;  %v65_v22 = vpack.c.bf16 %v51_v20, %v50_v19  ;;  %v66_v25 = vpack.c.bf16 %v53_v24, %v52_v23 }
   0xa   :  { %4918 = vmatmul.mubr.msk.bf16.vlgmr.msra.gmra.mrb[0].mxu1 %vm85_vm0, %v60_v9 }
   0xb   :  { %4921 = vmatprep.mubr.msk.bf16.mxu1 %vm85_vm0, %v61_v10 }
  0x12   :  { %4922 = vmatmul.mubr.msk.bf16.gmra.mrb[4].mxu1 %vm85_vm0, %v62_v15 }
  0x13   :  { %4925 = vmatprep.mubr.msk.bf16.mxu1 %vm85_vm0, %v63_v16 }
  0x1a   :  { %4926 = vmatmul.mubr.msk.bf16.gmra.mrb[8].mxu1 %vm85_vm0, %v64_v21 }
  0x1b   :  { %4929 = vmatprep.mubr.msk.bf16.mxu1 %vm85_vm0, %v65_v22 }
  0x22   :  { %4930 = vmatmul.mubr.msk.bf16.gmra.mrb[12].mxu1 %vm85_vm0, %v66_v25 }
  0x23   :  { %18 = vsyncpa [#allocation5], 0  ;;  %v5163_v26 = vld [vmem:[%s7747_s3] sm:$0xff]   ;;  %v5164_v27 = vld [vmem:[%s7747_s3 + $0x8] sm:$0xff]   ;;  %vm1525_vm1 = vcmask 1043456   ;;  %vm3565_vm2 = vcmask 1041409  }
  0x24   :  { %4933 = vmatprep.subr.bf16.mxu1 %v5163_v26  ;;  %v5165_v28 = vld [vmem:[%s7747_s3 + $0x10] sm:$0xff]   ;;  %v5166_v29 = vld [vmem:[%s7747_s3 + $0x18] sm:$0xff]   ;;  %v5167_v30 = vld [vmem:[%s7747_s3 + $0x20] sm:$0xff]   ;;  %vm3568_vm3 = vcmask 1042434   ;;  %vm3571_vm4 = vcmask 1043459   ;;  %vm4168_vm5 = vcmask 1045509  }
  0x25   :  { %4934 = vmatpush3.bf16.msra.mxu1 %v5163_v26  ;;  %v5168_v31 = vld [vmem:[%s7747_s3 + $0x28] sm:$0xff]   ;;  %v5169_v32 = vld [vmem:[%s7747_s3 + $0x30] sm:$0xff]   ;;  %v5170_v33 = vld [vmem:[%s7747_s3 + $0x38] sm:$0xff]   ;;  %vm4170_vm6 = vcmask 1047559  }
  0x26   :  { %4935 = vmatprep.subr.bf16.mxu1 %v5164_v27  ;;  %v6100_v34 = vld [vmem:[%s7746_s2] ss:$0 sm:$0xff] }
  0x29   :  { %4936 = vmatpush3.bf16.msra.mxu1 %v5164_v27 }
  0x2a   :  { %4937 = vmatprep.subr.bf16.mxu1 %v5165_v28 }
  0x2d   :  { %4938 = vmatpush3.bf16.msra.mxu1 %v5165_v28 }
  0x2e   :  { %4939 = vmatprep.subr.bf16.mxu1 %v5166_v29 }
  0x31   :  { %4940 = vmatpush3.bf16.msra.mxu1 %v5166_v29 }
  0x32   :  { %4941 = vmatprep.subr.bf16.mxu1 %v5167_v30 }
  0x35   :  { %4942 = vmatpush3.bf16.msra.mxu1 %v5167_v30 }
  0x36   :  { %4943 = vmatprep.subr.bf16.mxu1 %v5168_v31 }
  0x39   :  { %4944 = vmatpush3.bf16.msra.mxu1 %v5168_v31 }
  0x3a   :  { %4945 = vmatprep.subr.bf16.mxu1 %v5169_v32 }
  0x3d   :  { %4946 = vmatpush3.bf16.msra.mxu1 %v5169_v32 }
  0x3e   :  { %4947 = vmatprep.subr.bf16.mxu1 %v5170_v33 }
  0x41   :  { %4948 = vmatpush3.bf16.msra.mxu1 %v5170_v33 }
  0xdd   :  { %v4919_v35 = vpop.f32.mrb[0].mxu1 }
  0xde   :  { %v6103_v36 = vadd.f32 %v4919_v35, %v6100_v34  ;;  %v144_v37 = vpop.f32.mrb[1].mxu1 }
  0xdf   :  { %v6106_v38 = vadd.f32 %v6100_v34, %v144_v37  ;;  %v4920_v39 = vpop.f32.mrb[2].mxu1 }
  0xe0   :  { %v4413_v40 = vmul.f32 -1.442695, %v6103_v36  ;;  %v6110_v41 = vadd.f32 %v4920_v39, %v6100_v34  ;;  %v147_v42 = vpop.f32.mrb[3].mxu1 }
  0xe1   :  { %v4411_v43 = vmul.f32 -1.442695, %v6106_v38  ;;  %v6114_v44 = vadd.f32 %v6100_v34, %v147_v42 }
  0xe2   :  { %5259 = vpow2.f32 %v4413_v40  ;;  %v4414_v45 = vmul.f32 -1.442695, %v6110_v41 }
  0xe3   :  { %5261 = vpow2.f32 %v4411_v43  ;;  %v4412_v46 = vmul.f32 -1.442695, %v6114_v44 }
  0xe4   :  { %5263 = vpow2.f32 %v4414_v45 }
  0xe5   :  { %5265 = vpow2.f32 %v4412_v46  ;;  %v4923_v47 = vpop.f32.mrb[4].mxu1 }
  0xe6   :  { %v6119_v48 = vadd.f32 %v4923_v47, %v6100_v34  ;;  %v160_v49 = vpop.f32.mrb[5].mxu1 }
  0xe7   :  { %v6122_v50 = vadd.f32 %v6100_v34, %v160_v49  ;;  %v4924_v51 = vpop.f32.mrb[6].mxu1 }
  0xe8   :  { %v4417_v52 = vmul.f32 -1.442695, %v6119_v48  ;;  %v6126_v53 = vadd.f32 %v4924_v51, %v6100_v34  ;;  %v163_v54 = vpop.f32.mrb[7].mxu1 }
  0xe9   :  { %v4415_v55 = vmul.f32 -1.442695, %v6122_v50  ;;  %v6130_v56 = vadd.f32 %v6100_v34, %v163_v54 }
  0xea   :  { %5267 = vpow2.f32 %v4417_v52  ;;  %v4418_v57 = vmul.f32 -1.442695, %v6126_v53 }
  0xeb   :  { %5269 = vpow2.f32 %v4415_v55  ;;  %v4416_v58 = vmul.f32 -1.442695, %v6130_v56 }
  0xec   :  { %v5260_v59 = vpop.eup %5259  ;;  %5271 = vpow2.f32 %v4418_v57 }
  0xed   :  { %v5262_v60 = vpop.eup %5261  ;;  %v257_v61 = vadd.f32 1.0, %v5260_v59  ;;  %5273 = vpow2.f32 %v4416_v58  ;;  %v4927_v62 = vpop.f32.mrb[8].mxu1 }
  0xee   :  { %v5264_v63 = vpop.eup %5263  ;;  %v255_v0 = vadd.f32 1.0, %v5262_v60  ;;  %v6135_v1 = vadd.f32 %v4927_v62, %v6100_v34  ;;  %v176_v2 = vpop.f32.mrb[9].mxu1 }
  0xef   :  { %v5266_v3 = vpop.eup %5265  ;;  %5275 = vrcp.f32 %v257_v61  ;;  %v258_v4 = vadd.f32 1.0, %v5264_v63  ;;  %v6138_v5 = vadd.f32 %v6100_v34, %v176_v2  ;;  %v4928_v6 = vpop.f32.mrb[10].mxu1 }
  0xf0   :  { %5277 = vrcp.f32 %v255_v0  ;;  %v256_v7 = vadd.f32 1.0, %v5266_v3  ;;  %v4421_v8 = vmul.f32 -1.442695, %v6135_v1  ;;  %v6142_v9 = vadd.f32 %v4928_v6, %v6100_v34  ;;  %v179_v10 = vpop.f32.mrb[11].mxu1 }
  0xf1   :  { %5279 = vrcp.f32 %v258_v4  ;;  %v4419_v11 = vmul.f32 -1.442695, %v6138_v5  ;;  %v6146_v12 = vadd.f32 %v6100_v34, %v179_v10 }
  0xf2   :  { %5281 = vrcp.f32 %v256_v7  ;;  %v4422_v13 = vmul.f32 -1.442695, %v6142_v9 }
  0xf3   :  { %5283 = vpow2.f32 %v4421_v8  ;;  %v4420_v14 = vmul.f32 -1.442695, %v6146_v12 }
  0xf4   :  { %v5268_v15 = vpop.eup %5267  ;;  %5285 = vpow2.f32 %v4419_v11 }
  0xf5   :  { %v5270_v16 = vpop.eup %5269  ;;  %v261_v17 = vadd.f32 1.0, %v5268_v15  ;;  %5287 = vpow2.f32 %v4422_v13  ;;  %v4931_v18 = vpop.f32.mrb[12].mxu1 }
  0xf6   :  { %v5272_v19 = vpop.eup %5271  ;;  %v259_v20 = vadd.f32 1.0, %v5270_v16  ;;  %5289 = vpow2.f32 %v4420_v14  ;;  %v6151_v21 = vadd.f32 %v4931_v18, %v6100_v34  ;;  %v192_v22 = vpop.f32.mrb[13].mxu1 }
  0xf7   :  { %v5274_v23 = vpop.eup %5273  ;;  %5291 = vrcp.f32 %v261_v17  ;;  %v262_v24 = vadd.f32 1.0, %v5272_v19  ;;  %v6154_v25 = vadd.f32 %v6100_v34, %v192_v22  ;;  %v4932_v26 = vpop.f32.mrb[14].mxu1 }
  0xf8   :  { %5293 = vrcp.f32 %v259_v20  ;;  %v260_v27 = vadd.f32 1.0, %v5274_v23  ;;  %v4425_v28 = vmul.f32 -1.442695, %v6151_v21  ;;  %v6158_v29 = vadd.f32 %v4932_v26, %v6100_v34  ;;  %v195_v30 = vpop.f32.mrb[15].mxu1 }
  0xf9   :  { %v5276_v31 = vpop.eup %5275  ;;  %5295 = vrcp.f32 %v262_v24  ;;  %v4423_v32 = vmul.f32 -1.442695, %v6154_v25  ;;  %v6162_v33 = vadd.f32 %v6100_v34, %v195_v30 }
  0xfa   :  { %v5278_v35 = vpop.eup %5277  ;;  %5297 = vrcp.f32 %v260_v27  ;;  %v4426_v37 = vmul.f32 -1.442695, %v6158_v29  ;;  %v305_v43 = vmul.f32 %v5276_v31, %v6103_v36  ;;  %v5175_v31 = vld [vmem:[%s7747_s3 + $0x60] sm:$0xff]  }
  0xfb   :  { %v5280_v39 = vpop.eup %5279  ;;  %5299 = vpow2.f32 %v4425_v28  ;;  %v4424_v40 = vmul.f32 -1.442695, %v6162_v33  ;;  %v303_v47 = vmul.f32 %v5278_v35, %v6106_v38  ;;  %v5178_v35 = vld [vmem:[%s7747_s3 + $0x78] sm:$0xff]  }
  0xfc   :  { %v5282_v42 = vpop.eup %5281  ;;  %v306_v45 = vmul.f32 %v5280_v39, %v6110_v41  ;;  %5301 = vpow2.f32 %v4423_v32  ;;  %v5176_v32 = vld [vmem:[%s7747_s3 + $0x68] sm:$0xff]  }
  0xfd   :  { %v5284_v46 = vpop.eup %5283  ;;  %v304_v34 = vmul.f32 %v5282_v42, %v6114_v44  ;;  %5303 = vpow2.f32 %v4426_v37  ;;  %v6209_v37 = vld [vmem:[%s7748_s4] ss:$0 sm:$0xff] }
  0xfe   :  { %v5286_v49 = vpop.eup %5285  ;;  %v337_v51 = vpack.c.bf16 %v306_v45, %v305_v43  ;;  %v265_v52 = vadd.f32 1.0, %v5284_v46  ;;  %5305 = vpow2.f32 %v4424_v40 }
  0xff   :  { %v5288_v54 = vpop.eup %5287  ;;  %v263_v55 = vadd.f32 1.0, %v5286_v49  ;;  %v336_v57 = vpack.c.bf16 %v304_v34, %v303_v47 }
 0x100   :  { %v5290_v58 = vpop.eup %5289  ;;  %5307 = vrcp.f32 %v265_v52  ;;  %v266_v59 = vadd.f32 1.0, %v5288_v54 }
 0x101   :  { %v5292_v36 = vpop.eup %5291  ;;  %5309 = vrcp.f32 %v263_v55  ;;  %v264_v41 = vadd.f32 1.0, %v5290_v58  ;;  %4949 = vmatprep.mubr.bf16.mxu1 %v336_v57 }
 0x102   :  { %v5294_v60 = vpop.eup %5293  ;;  %5311 = vrcp.f32 %v266_v59  ;;  %4950 = vmatmul.mubr.bf16.vlgmr.msra.gmra.mrb[16].mxu1 %v337_v51  ;;  %v309_v61 = vmul.f32 %v5292_v36, %v6119_v48 }
 0x103   :  { %v5296_v38 = vpop.eup %5295  ;;  %5313 = vrcp.f32 %v264_v41  ;;  %v307_v0 = vmul.f32 %v5294_v60, %v6122_v50 }
 0x104   :  { %v5298_v44 = vpop.eup %5297  ;;  %v310_v62 = vmul.f32 %v5296_v38, %v6126_v53 }
 0x105   :  { %v5300_v63 = vpop.eup %5299  ;;  %v308_v2 = vmul.f32 %v5298_v44, %v6130_v56 }
 0x106   :  { %v5302_v3 = vpop.eup %5301  ;;  %v269_v4 = vadd.f32 1.0, %v5300_v63  ;;  %v339_v6 = vpack.c.bf16 %v310_v62, %v309_v61 }
 0x107   :  { %v5304_v7 = vpop.eup %5303  ;;  %v267_v8 = vadd.f32 1.0, %v5302_v3  ;;  %v338_v10 = vpack.c.bf16 %v308_v2, %v307_v0 }
 0x108   :  { %v5306_v11 = vpop.eup %5305  ;;  %5315 = vrcp.f32 %v269_v4  ;;  %v270_v13 = vadd.f32 1.0, %v5304_v7 }
 0x109   :  { %5317 = vrcp.f32 %v267_v8  ;;  %v268_v14 = vadd.f32 1.0, %v5306_v11  ;;  %4953 = vmatprep.mubr.bf16.mxu1 %v338_v10 }
 0x10a   :  { %v5308_v48 = vpop.eup %5307  ;;  %5319 = vrcp.f32 %v270_v13  ;;  %4954 = vmatmul.mubr.bf16.gmra.mrb[20].mxu1 %v339_v6 }
 0x10b   :  { %v5310_v53 = vpop.eup %5309  ;;  %5321 = vrcp.f32 %v268_v14  ;;  %v313_v56 = vmul.f32 %v5308_v48, %v6135_v1 }
 0x10c   :  { %v5312_v50 = vpop.eup %5311  ;;  %v311_v17 = vmul.f32 %v5310_v53, %v6138_v5 }
 0x10d   :  { %v5314_v15 = vpop.eup %5313  ;;  %v314_v16 = vmul.f32 %v5312_v50, %v6142_v9 }
 0x10e   :  { %v312_v18 = vmul.f32 %v5314_v15, %v6146_v12  ;;  %v5171_v12 = vld [vmem:[%s7747_s3 + $0x40] sm:$0xff]  }
 0x10f   :  { %v341_v19 = vpack.c.bf16 %v314_v16, %v313_v56  ;;  %4965 = vmatprep.subr.bf16.mxu0 %v5171_v12 }
 0x110   :  { %v340_v20 = vpack.c.bf16 %v312_v18, %v311_v17  ;;  %4966 = vmatpush3.bf16.msra.mxu0 %v5171_v12 }
 0x112   :  { %v5316_v22 = vpop.eup %5315  ;;  %4957 = vmatprep.mubr.bf16.mxu1 %v340_v20 }
 0x113   :  { %v5318_v23 = vpop.eup %5317  ;;  %4958 = vmatmul.mubr.bf16.gmra.mrb[24].mxu1 %v341_v19  ;;  %v317_v27 = vmul.f32 %v5316_v22, %v6151_v21  ;;  %v5172_v21 = vld [vmem:[%s7747_s3 + $0x48] sm:$0xff]  }
 0x114   :  { %v5320_v24 = vpop.eup %5319  ;;  %v315_v1 = vmul.f32 %v5318_v23, %v6154_v25  ;;  %4967 = vmatprep.subr.bf16.mxu0 %v5172_v21  ;;  %v5173_v25 = vld [vmem:[%s7747_s3 + $0x50] sm:$0xff]  }
 0x115   :  { %v5322_v26 = vpop.eup %5321  ;;  %v318_v28 = vmul.f32 %v5320_v24, %v6158_v29  ;;  %4968 = vmatpush3.bf16.msra.mxu0 %v5172_v21  ;;  %v5174_v29 = vld [vmem:[%s7747_s3 + $0x58] sm:$0xff]  }
 0x116   :  { %v316_v9 = vmul.f32 %v5322_v26, %v6162_v33  ;;  %4969 = vmatprep.subr.bf16.mxu0 %v5173_v25  ;;  %v5177_v33 = vld [vmem:[%s7747_s3 + $0x70] sm:$0xff]  }
 0x117   :  { %v343_v30 = vpack.c.bf16 %v318_v28, %v317_v27 }
 0x118   :  { %v342_v5 = vpack.c.bf16 %v316_v9, %v315_v1 }
 0x119   :  { %4970 = vmatpush3.bf16.msra.mxu0 %v5173_v25 }
 0x11a   :  { %4961 = vmatprep.mubr.bf16.mxu1 %v342_v5  ;;  %4971 = vmatprep.subr.bf16.mxu0 %v5174_v29 }
 0x11b   :  { %4962 = vmatmul.mubr.bf16.gmra.mrb[28].mxu1 %v343_v30 }
 0x11d   :  { %4972 = vmatpush3.bf16.msra.mxu0 %v5174_v29 }
 0x11e   :  { %4973 = vmatprep.subr.bf16.mxu0 %v5175_v31 }
 0x121   :  { %4974 = vmatpush3.bf16.msra.mxu0 %v5175_v31 }
 0x122   :  { %4975 = vmatprep.subr.bf16.mxu0 %v5176_v32 }
 0x125   :  { %4976 = vmatpush3.bf16.msra.mxu0 %v5176_v32 }
 0x126   :  { %4977 = vmatprep.subr.bf16.mxu0 %v5177_v33 }
 0x129   :  { %4978 = vmatpush3.bf16.msra.mxu0 %v5177_v33 }
 0x12a   :  { %4979 = vmatprep.subr.bf16.mxu0 %v5178_v35 }
 0x12d   :  { %4980 = vmatpush3.bf16.msra.mxu0 %v5178_v35 }
 0x1d5   :  { %v4951_v39 = vpop.f32.mrb[16].mxu1 }
 0x1d6   :  { %v6212_v40 = vadd.f32 %v4951_v39, %v6209_v37  ;;  %v432_v42 = vpop.f32.mrb[17].mxu1 }
 0x1d7   :  { %v6215_v43 = vadd.f32 %v6209_v37, %v432_v42  ;;  %v4952_v45 = vpop.f32.mrb[18].mxu1 }
 0x1d8   :  { %v4438_v46 = vmul.f32 -1.442695, %v6212_v40  ;;  %v6219_v47 = vadd.f32 %v4952_v45, %v6209_v37  ;;  %v435_v34 = vpop.f32.mrb[19].mxu1 }
 0x1d9   :  { %v4436_v49 = vmul.f32 -1.442695, %v6215_v43  ;;  %v6223_v51 = vadd.f32 %v6209_v37, %v435_v34 }
 0x1da   :  { %5323 = vpow2.f32 %v4438_v46  ;;  %v4439_v52 = vmul.f32 -1.442695, %v6219_v47 }
 0x1db   :  { %5325 = vpow2.f32 %v4436_v49  ;;  %v4437_v54 = vmul.f32 -1.442695, %v6223_v51 }
 0x1dc   :  { %5327 = vpow2.f32 %v4439_v52 }
 0x1dd   :  { %5329 = vpow2.f32 %v4437_v54  ;;  %v4955_v55 = vpop.f32.mrb[20].mxu1 }
 0x1de   :  { %v6228_v57 = vadd.f32 %v4955_v55, %v6209_v37  ;;  %v448_v58 = vpop.f32.mrb[21].mxu1 }
 0x1df   :  { %v6231_v59 = vadd.f32 %v6209_v37, %v448_v58  ;;  %v4956_v36 = vpop.f32.mrb[22].mxu1 }
 0x1e0   :  { %v4442_v41 = vmul.f32 -1.442695, %v6228_v57  ;;  %v6235_v60 = vadd.f32 %v4956_v36, %v6209_v37  ;;  %v451_v38 = vpop.f32.mrb[23].mxu1 }
 0x1e1   :  { %v4440_v44 = vmul.f32 -1.442695, %v6231_v59  ;;  %v6239_v61 = vadd.f32 %v6209_v37, %v451_v38 }
 0x1e2   :  { %5331 = vpow2.f32 %v4442_v41  ;;  %v4443_v62 = vmul.f32 -1.442695, %v6235_v60 }
 0x1e3   :  { %5333 = vpow2.f32 %v4440_v44  ;;  %v4441_v63 = vmul.f32 -1.442695, %v6239_v61 }
 0x1e4   :  { %v5324_v0 = vpop.eup %5323  ;;  %5335 = vpow2.f32 %v4443_v62 }
 0x1e5   :  { %v5326_v2 = vpop.eup %5325  ;;  %v545_v3 = vadd.f32 1.0, %v5324_v0  ;;  %5337 = vpow2.f32 %v4441_v63 }
 0x1e6   :  { %v5328_v4 = vpop.eup %5327  ;;  %v543_v6 = vadd.f32 1.0, %v5326_v2  ;;  %v4959_v7 = vpop.f32.mrb[24].mxu1 }
 0x1e7   :  { %v5330_v8 = vpop.eup %5329  ;;  %5339 = vrcp.f32 %v545_v3  ;;  %v546_v10 = vadd.f32 1.0, %v5328_v4  ;;  %v6244_v11 = vadd.f32 %v4959_v7, %v6209_v37  ;;  %v464_v13 = vpop.f32.mrb[25].mxu1 }
 0x1e8   :  { %5341 = vrcp.f32 %v543_v6  ;;  %v544_v14 = vadd.f32 1.0, %v5330_v8  ;;  %v6247_v48 = vadd.f32 %v6209_v37, %v464_v13  ;;  %v4960_v53 = vpop.f32.mrb[26].mxu1 }
 0x1e9   :  { %5343 = vrcp.f32 %v546_v10  ;;  %v4446_v50 = vmul.f32 -1.442695, %v6244_v11  ;;  %v6251_v15 = vadd.f32 %v4960_v53, %v6209_v37  ;;  %v467_v56 = vpop.f32.mrb[27].mxu1 }
 0x1ea   :  { %5345 = vrcp.f32 %v544_v14  ;;  %v4444_v16 = vmul.f32 -1.442695, %v6247_v48  ;;  %v6255_v17 = vadd.f32 %v6209_v37, %v467_v56 }
 0x1eb   :  { %5347 = vpow2.f32 %v4446_v50  ;;  %v4447_v18 = vmul.f32 -1.442695, %v6251_v15 }
 0x1ec   :  { %v5332_v19 = vpop.eup %5331  ;;  %5349 = vpow2.f32 %v4444_v16  ;;  %v4445_v20 = vmul.f32 -1.442695, %v6255_v17 }
 0x1ed   :  { %v5334_v22 = vpop.eup %5333  ;;  %v549_v23 = vadd.f32 1.0, %v5332_v19  ;;  %5351 = vpow2.f32 %v4447_v18 }
 0x1ee   :  { %v5336_v24 = vpop.eup %5335  ;;  %v547_v26 = vadd.f32 1.0, %v5334_v22  ;;  %5353 = vpow2.f32 %v4445_v20  ;;  %v4963_v27 = vpop.f32.mrb[28].mxu1 }
 0x1ef   :  { %v5338_v28 = vpop.eup %5337  ;;  %5355 = vrcp.f32 %v549_v23  ;;  %v550_v1 = vadd.f32 1.0, %v5336_v24  ;;  %v6260_v9 = vadd.f32 %v4963_v27, %v6209_v37  ;;  %v480_v30 = vpop.f32.mrb[29].mxu1 }
 0x1f0   :  { %5357 = vrcp.f32 %v547_v26  ;;  %v548_v5 = vadd.f32 1.0, %v5338_v28  ;;  %v6263_v12 = vadd.f32 %v6209_v37, %v480_v30  ;;  %v4964_v21 = vpop.f32.mrb[30].mxu1 }
 0x1f1   :  { %v5340_v25 = vpop.eup %5339  ;;  %5359 = vrcp.f32 %v550_v1  ;;  %v4450_v29 = vmul.f32 -1.442695, %v6260_v9  ;;  %v6267_v31 = vadd.f32 %v4964_v21, %v6209_v37  ;;  %v483_v32 = vpop.f32.mrb[31].mxu1 }
 0x1f2   :  { %v5342_v33 = vpop.eup %5341  ;;  %5361 = vrcp.f32 %v548_v5  ;;  %v4448_v35 = vmul.f32 -1.442695, %v6263_v12  ;;  %v6271_v39 = vadd.f32 %v6209_v37, %v483_v32  ;;  %v593_v34 = vmul.f32 %v5340_v25, %v6212_v40  ;;  %v5183_v32 = vld [vmem:[%s7747_s3 + $0xa0] sm:$0xff]  }
 0x1f3   :  { %v5344_v42 = vpop.eup %5343  ;;  %5363 = vpow2.f32 %v4450_v29  ;;  %v4451_v45 = vmul.f32 -1.442695, %v6267_v31  ;;  %v591_v55 = vmul.f32 %v5342_v33, %v6215_v43  ;;  %v5184_v33 = vld [vmem:[%s7747_s3 + $0xa8] sm:$0xff]  }
 0x1f4   :  { %v5346_v46 = vpop.eup %5345  ;;  %v594_v49 = vmul.f32 %v5344_v42, %v6219_v47  ;;  %5365 = vpow2.f32 %v4448_v35  ;;  %v4449_v52 = vmul.f32 -1.442695, %v6271_v39  ;;  %v5185_v35 = vld [vmem:[%s7747_s3 + $0xb0] sm:$0xff]   ;;  %v6318_v42 = vld [vmem:[%s7748_s4 + $0x1] ss:$0 sm:$0xff] }
 0x1f5   :  { %v5348_v54 = vpop.eup %5347  ;;  %5367 = vpow2.f32 %v4451_v45  ;;  %v592_v58 = vmul.f32 %v5346_v46, %v6223_v51 }
 0x1f6   :  { %v5350_v37 = vpop.eup %5349  ;;  %v553_v36 = vadd.f32 1.0, %v5348_v54  ;;  %5369 = vpow2.f32 %v4449_v52  ;;  %v627_v41 = vpack.c.bf16 %v594_v49, %v593_v34 }
 0x1f7   :  { %v5352_v38 = vpop.eup %5351  ;;  %v551_v44 = vadd.f32 1.0, %v5350_v37  ;;  %v626_v62 = vpack.c.bf16 %v592_v58, %v591_v55 }
 0x1f8   :  { %v5354_v63 = vpop.eup %5353  ;;  %5371 = vrcp.f32 %v553_v36  ;;  %v554_v40 = vadd.f32 1.0, %v5352_v38 }
 0x1f9   :  { %v5356_v47 = vpop.eup %5355  ;;  %5373 = vrcp.f32 %v551_v44  ;;  %v552_v0 = vadd.f32 1.0, %v5354_v63  ;;  %4981 = vmatprep.mubr.bf16.mxu0 %v626_v62 }
 0x1fa   :  { %v5358_v2 = vpop.eup %5357  ;;  %5375 = vrcp.f32 %v554_v40  ;;  %4982 = vmatmul.mubr.bf16.vlgmr.msra.gmra.mrb[0].mxu0 %v627_v41  ;;  %v597_v3 = vmul.f32 %v5356_v47, %v6228_v57 }
 0x1fb   :  { %v5360_v43 = vpop.eup %5359  ;;  %5377 = vrcp.f32 %v552_v0  ;;  %v595_v7 = vmul.f32 %v5358_v2, %v6231_v59 }
 0x1fc   :  { %v5362_v51 = vpop.eup %5361  ;;  %v598_v4 = vmul.f32 %v5360_v43, %v6235_v60 }
 0x1fd   :  { %v5364_v6 = vpop.eup %5363  ;;  %v596_v8 = vmul.f32 %v5362_v51, %v6239_v61 }
 0x1fe   :  { %v5366_v10 = vpop.eup %5365  ;;  %v557_v13 = vadd.f32 1.0, %v5364_v6  ;;  %v629_v14 = vpack.c.bf16 %v598_v4, %v597_v3 }
 0x1ff   :  { %v5368_v53 = vpop.eup %5367  ;;  %v555_v50 = vadd.f32 1.0, %v5366_v10  ;;  %v628_v56 = vpack.c.bf16 %v596_v8, %v595_v7 }
 0x200   :  { %v5370_v16 = vpop.eup %5369  ;;  %5379 = vrcp.f32 %v557_v13  ;;  %v558_v18 = vadd.f32 1.0, %v5368_v53 }
 0x201   :  { %5381 = vrcp.f32 %v555_v50  ;;  %v556_v19 = vadd.f32 1.0, %v5370_v16  ;;  %4985 = vmatprep.mubr.bf16.mxu0 %v628_v56 }
 0x202   :  { %v5372_v57 = vpop.eup %5371  ;;  %5383 = vrcp.f32 %v558_v18  ;;  %4986 = vmatmul.mubr.bf16.gmra.mrb[4].mxu0 %v629_v14 }
 0x203   :  { %v5374_v60 = vpop.eup %5373  ;;  %5385 = vrcp.f32 %v556_v19  ;;  %v601_v61 = vmul.f32 %v5372_v57, %v6244_v11 }
 0x204   :  { %v5376_v59 = vpop.eup %5375  ;;  %v599_v23 = vmul.f32 %v5374_v60, %v6247_v48 }
 0x205   :  { %v5378_v20 = vpop.eup %5377  ;;  %v602_v22 = vmul.f32 %v5376_v59, %v6251_v15 }
 0x206   :  { %v600_v24 = vmul.f32 %v5378_v20, %v6255_v17  ;;  %v5179_v17 = vld [vmem:[%s7747_s3 + $0x80] sm:$0xff]  }
 0x207   :  { %v631_v26 = vpack.c.bf16 %v602_v22, %v601_v61  ;;  %4997 = vmatprep.subr.bf16.mxu1 %v5179_v17 }
 0x208   :  { %v630_v27 = vpack.c.bf16 %v600_v24, %v599_v23  ;;  %4998 = vmatpush3.bf16.msra.mxu1 %v5179_v17 }
 0x20a   :  { %v5380_v28 = vpop.eup %5379  ;;  %4989 = vmatprep.mubr.bf16.mxu0 %v630_v27 }
 0x20b   :  { %v5382_v1 = vpop.eup %5381  ;;  %4990 = vmatmul.mubr.bf16.gmra.mrb[8].mxu0 %v631_v26  ;;  %v605_v21 = vmul.f32 %v5380_v28, %v6260_v9  ;;  %v5180_v9 = vld [vmem:[%s7747_s3 + $0x88] sm:$0xff]  }
 0x20c   :  { %v5384_v30 = vpop.eup %5383  ;;  %v603_v11 = vmul.f32 %v5382_v1, %v6263_v12  ;;  %4999 = vmatprep.subr.bf16.mxu1 %v5180_v9  ;;  %v5181_v12 = vld [vmem:[%s7747_s3 + $0x90] sm:$0xff]  }
 0x20d   :  { %v5386_v5 = vpop.eup %5385  ;;  %v606_v25 = vmul.f32 %v5384_v30, %v6267_v31  ;;  %5000 = vmatpush3.bf16.msra.mxu1 %v5180_v9  ;;  %v5182_v31 = vld [vmem:[%s7747_s3 + $0x98] sm:$0xff]  }
 0x20e   :  { %v604_v15 = vmul.f32 %v5386_v5, %v6271_v39  ;;  %5001 = vmatprep.subr.bf16.mxu1 %v5181_v12  ;;  %v5186_v39 = vld [vmem:[%s7747_s3 + $0xb8] sm:$0xff]  }
 0x20f   :  { %v633_v29 = vpack.c.bf16 %v606_v25, %v605_v21 }
 0x210   :  { %v632_v48 = vpack.c.bf16 %v604_v15, %v603_v11 }
 0x211   :  { %5002 = vmatpush3.bf16.msra.mxu1 %v5181_v12 }
 0x212   :  { %4993 = vmatprep.mubr.bf16.mxu0 %v632_v48  ;;  %5003 = vmatprep.subr.bf16.mxu1 %v5182_v31 }
 0x213   :  { %4994 = vmatmul.mubr.bf16.gmra.mrb[12].mxu0 %v633_v29 }
 0x215   :  { %5004 = vmatpush3.bf16.msra.mxu1 %v5182_v31 }
 0x216   :  { %5005 = vmatprep.subr.bf16.mxu1 %v5183_v32 }
 0x219   :  { %5006 = vmatpush3.bf16.msra.mxu1 %v5183_v32 }
 0x21a   :  { %5007 = vmatprep.subr.bf16.mxu1 %v5184_v33 }
 0x21d   :  { %5008 = vmatpush3.bf16.msra.mxu1 %v5184_v33 }
 0x21e   :  { %5009 = vmatprep.subr.bf16.mxu1 %v5185_v35 }
 0x221   :  { %5010 = vmatpush3.bf16.msra.mxu1 %v5185_v35 }
 0x222   :  { %5011 = vmatprep.subr.bf16.mxu1 %v5186_v39 }
 0x225   :  { %5012 = vmatpush3.bf16.msra.mxu1 %v5186_v39 }
 0x2cd   :  { %v4983_v45 = vpop.f32.mrb[0].mxu0 }
 0x2ce   :  { %v6321_v46 = vadd.f32 %v4983_v45, %v6318_v42  ;;  %v722_v34 = vpop.f32.mrb[1].mxu0 }
 0x2cf   :  { %v6324_v49 = vadd.f32 %v6318_v42, %v722_v34  ;;  %v4984_v52 = vpop.f32.mrb[2].mxu0 }
 0x2d0   :  { %v4480_v54 = vmul.f32 -1.442695, %v6321_v46  ;;  %v6328_v55 = vadd.f32 %v4984_v52, %v6318_v42  ;;  %v725_v58 = vpop.f32.mrb[3].mxu0 }
 0x2d1   :  { %v4478_v37 = vmul.f32 -1.442695, %v6324_v49  ;;  %v6332_v36 = vadd.f32 %v6318_v42, %v725_v58 }
 0x2d2   :  { %5387 = vpow2.f32 %v4480_v54  ;;  %v4481_v41 = vmul.f32 -1.442695, %v6328_v55 }
 0x2d3   :  { %5389 = vpow2.f32 %v4478_v37  ;;  %v4479_v38 = vmul.f32 -1.442695, %v6332_v36 }
 0x2d4   :  { %5391 = vpow2.f32 %v4481_v41 }
 0x2d5   :  { %5393 = vpow2.f32 %v4479_v38  ;;  %v4987_v44 = vpop.f32.mrb[4].mxu0 }
 0x2d6   :  { %v6337_v62 = vadd.f32 %v4987_v44, %v6318_v42  ;;  %v738_v63 = vpop.f32.mrb[5].mxu0 }
 0x2d7   :  { %v6340_v40 = vadd.f32 %v6318_v42, %v738_v63  ;;  %v4988_v47 = vpop.f32.mrb[6].mxu0 }
 0x2d8   :  { %v4484_v0 = vmul.f32 -1.442695, %v6337_v62  ;;  %v6344_v2 = vadd.f32 %v4988_v47, %v6318_v42  ;;  %v741_v43 = vpop.f32.mrb[7].mxu0 }
 0x2d9   :  { %v4482_v51 = vmul.f32 -1.442695, %v6340_v40  ;;  %v6348_v3 = vadd.f32 %v6318_v42, %v741_v43 }
 0x2da   :  { %5395 = vpow2.f32 %v4484_v0  ;;  %v4485_v4 = vmul.f32 -1.442695, %v6344_v2 }
 0x2db   :  { %5397 = vpow2.f32 %v4482_v51  ;;  %v4483_v6 = vmul.f32 -1.442695, %v6348_v3 }
 0x2dc   :  { %v5388_v7 = vpop.eup %5387  ;;  %5399 = vpow2.f32 %v4485_v4 }
 0x2dd   :  { %v5390_v8 = vpop.eup %5389  ;;  %v835_v10 = vadd.f32 1.0, %v5388_v7  ;;  %5401 = vpow2.f32 %v4483_v6 }
 0x2de   :  { %v5392_v13 = vpop.eup %5391  ;;  %v833_v14 = vadd.f32 1.0, %v5390_v8  ;;  %v4991_v53 = vpop.f32.mrb[8].mxu0 }
 0x2df   :  { %v5394_v50 = vpop.eup %5393  ;;  %5403 = vrcp.f32 %v835_v10  ;;  %v836_v56 = vadd.f32 1.0, %v5392_v13  ;;  %v6353_v16 = vadd.f32 %v4991_v53, %v6318_v42  ;;  %v754_v18 = vpop.f32.mrb[9].mxu0 }
 0x2e0   :  { %5405 = vrcp.f32 %v833_v14  ;;  %v834_v19 = vadd.f32 1.0, %v5394_v50  ;;  %v6356_v57 = vadd.f32 %v6318_v42, %v754_v18  ;;  %v4992_v60 = vpop.f32.mrb[10].mxu0 }
 0x2e1   :  { %5407 = vrcp.f32 %v836_v56  ;;  %v4488_v59 = vmul.f32 -1.442695, %v6353_v16  ;;  %v6360_v20 = vadd.f32 %v4992_v60, %v6318_v42  ;;  %v757_v61 = vpop.f32.mrb[11].mxu0 }
 0x2e2   :  { %5409 = vrcp.f32 %v834_v19  ;;  %v4486_v22 = vmul.f32 -1.442695, %v6356_v57  ;;  %v6364_v23 = vadd.f32 %v6318_v42, %v757_v61 }
 0x2e3   :  { %5411 = vpow2.f32 %v4488_v59  ;;  %v4489_v24 = vmul.f32 -1.442695, %v6360_v20 }
 0x2e4   :  { %v5396_v26 = vpop.eup %5395  ;;  %5413 = vpow2.f32 %v4486_v22  ;;  %v4487_v27 = vmul.f32 -1.442695, %v6364_v23 }
 0x2e5   :  { %v5398_v28 = vpop.eup %5397  ;;  %v839_v1 = vadd.f32 1.0, %v5396_v26  ;;  %5415 = vpow2.f32 %v4489_v24 }
 0x2e6   :  { %v5400_v30 = vpop.eup %5399  ;;  %v837_v5 = vadd.f32 1.0, %v5398_v28  ;;  %5417 = vpow2.f32 %v4487_v27  ;;  %v4995_v21 = vpop.f32.mrb[12].mxu0 }
 0x2e7   :  { %v5402_v25 = vpop.eup %5401  ;;  %5419 = vrcp.f32 %v839_v1  ;;  %v840_v11 = vadd.f32 1.0, %v5400_v30  ;;  %v6369_v15 = vadd.f32 %v4995_v21, %v6318_v42  ;;  %v770_v29 = vpop.f32.mrb[13].mxu0 }
 0x2e8   :  { %5421 = vrcp.f32 %v837_v5  ;;  %v838_v48 = vadd.f32 1.0, %v5402_v25  ;;  %v6372_v17 = vadd.f32 %v6318_v42, %v770_v29  ;;  %v4996_v9 = vpop.f32.mrb[14].mxu0 }
 0x2e9   :  { %v5404_v12 = vpop.eup %5403  ;;  %5423 = vrcp.f32 %v840_v11  ;;  %v4492_v31 = vmul.f32 -1.442695, %v6369_v15  ;;  %v6376_v32 = vadd.f32 %v4996_v9, %v6318_v42  ;;  %v773_v33 = vpop.f32.mrb[15].mxu0 }
 0x2ea   :  { %v5406_v35 = vpop.eup %5405  ;;  %5425 = vrcp.f32 %v838_v48  ;;  %v4490_v39 = vmul.f32 -1.442695, %v6372_v17  ;;  %v6380_v45 = vadd.f32 %v6318_v42, %v773_v33  ;;  %v883_v58 = vmul.f32 %v5404_v12, %v6321_v46  ;;  %v5191_v33 = vld [vmem:[%s7747_s3 + $0xe0] sm:$0xff]  }
 0x2eb   :  { %v5408_v34 = vpop.eup %5407  ;;  %5427 = vpow2.f32 %v4492_v31  ;;  %v4493_v52 = vmul.f32 -1.442695, %v6376_v32  ;;  %v881_v44 = vmul.f32 %v5406_v35, %v6324_v49  ;;  %v5192_v35 = vld [vmem:[%s7747_s3 + $0xe8] sm:$0xff]  }
 0x2ec   :  { %v5410_v54 = vpop.eup %5409  ;;  %v884_v37 = vmul.f32 %v5408_v34, %v6328_v55  ;;  %5429 = vpow2.f32 %v4490_v39  ;;  %v4491_v41 = vmul.f32 -1.442695, %v6380_v45  ;;  %v5193_v39 = vld [vmem:[%s7747_s3 + $0xf0] sm:$0xff]   ;;  %v6427_v34 = vld [vmem:[%s7748_s4 + $0x2] ss:$0 sm:$0xff] }
 0x2ed   :  { %v5412_v38 = vpop.eup %5411  ;;  %v882_v63 = vmul.f32 %v5410_v54, %v6332_v36  ;;  %5431 = vpow2.f32 %v4493_v52 }
 0x2ee   :  { %v5414_v42 = vpop.eup %5413  ;;  %v917_v47 = vpack.c.bf16 %v884_v37, %v883_v58  ;;  %v843_v0 = vadd.f32 1.0, %v5412_v38  ;;  %5433 = vpow2.f32 %v4491_v41 }
 0x2ef   :  { %v5416_v43 = vpop.eup %5415  ;;  %v841_v51 = vadd.f32 1.0, %v5414_v42  ;;  %v916_v4 = vpack.c.bf16 %v882_v63, %v881_v44 }
 0x2f0   :  { %v5418_v6 = vpop.eup %5417  ;;  %5435 = vrcp.f32 %v843_v0  ;;  %v844_v46 = vadd.f32 1.0, %v5416_v43 }
 0x2f1   :  { %v5420_v55 = vpop.eup %5419  ;;  %5437 = vrcp.f32 %v841_v51  ;;  %v842_v7 = vadd.f32 1.0, %v5418_v6  ;;  %5013 = vmatprep.mubr.bf16.mxu1 %v916_v4 }
 0x2f2   :  { %v5422_v8 = vpop.eup %5421  ;;  %5439 = vrcp.f32 %v844_v46  ;;  %5014 = vmatmul.mubr.bf16.vlgmr.msra.gmra.mrb[32].mxu1 %v917_v47  ;;  %v887_v10 = vmul.f32 %v5420_v55, %v6337_v62 }
 0x2f3   :  { %v5424_v49 = vpop.eup %5423  ;;  %5441 = vrcp.f32 %v842_v7  ;;  %v885_v53 = vmul.f32 %v5422_v8, %v6340_v40 }
 0x2f4   :  { %v5426_v36 = vpop.eup %5425  ;;  %v888_v13 = vmul.f32 %v5424_v49, %v6344_v2 }
 0x2f5   :  { %v5428_v14 = vpop.eup %5427  ;;  %v886_v50 = vmul.f32 %v5426_v36, %v6348_v3 }
 0x2f6   :  { %v5430_v56 = vpop.eup %5429  ;;  %v847_v18 = vadd.f32 1.0, %v5428_v14  ;;  %v919_v19 = vpack.c.bf16 %v888_v13, %v887_v10 }
 0x2f7   :  { %v5432_v60 = vpop.eup %5431  ;;  %v845_v59 = vadd.f32 1.0, %v5430_v56  ;;  %v918_v61 = vpack.c.bf16 %v886_v50, %v885_v53 }
 0x2f8   :  { %v5434_v22 = vpop.eup %5433  ;;  %5443 = vrcp.f32 %v847_v18  ;;  %v848_v24 = vadd.f32 1.0, %v5432_v60 }
 0x2f9   :  { %5445 = vrcp.f32 %v845_v59  ;;  %v846_v26 = vadd.f32 1.0, %v5434_v22  ;;  %5017 = vmatprep.mubr.bf16.mxu1 %v918_v61 }
 0x2fa   :  { %v5436_v62 = vpop.eup %5435  ;;  %5447 = vrcp.f32 %v848_v24  ;;  %5018 = vmatmul.mubr.bf16.gmra.mrb[36].mxu1 %v919_v19 }
 0x2fb   :  { %v5438_v2 = vpop.eup %5437  ;;  %5449 = vrcp.f32 %v846_v26  ;;  %v891_v3 = vmul.f32 %v5436_v62, %v6353_v16 }
 0x2fc   :  { %v5440_v40 = vpop.eup %5439  ;;  %v889_v1 = vmul.f32 %v5438_v2, %v6356_v57 }
 0x2fd   :  { %v5442_v27 = vpop.eup %5441  ;;  %v892_v28 = vmul.f32 %v5440_v40, %v6360_v20 }
 0x2fe   :  { %v890_v30 = vmul.f32 %v5442_v27, %v6364_v23  ;;  %v5187_v23 = vld [vmem:[%s7747_s3 + $0xc0] sm:$0xff]  }
 0x2ff   :  { %v921_v5 = vpack.c.bf16 %v892_v28, %v891_v3  ;;  %5029 = vmatprep.subr.bf16.mxu0 %v5187_v23 }
 0x300   :  { %v920_v21 = vpack.c.bf16 %v890_v30, %v889_v1  ;;  %5030 = vmatpush3.bf16.msra.mxu0 %v5187_v23 }
 0x302   :  { %v5444_v25 = vpop.eup %5443  ;;  %5021 = vmatprep.mubr.bf16.mxu1 %v920_v21 }
 0x303   :  { %v5446_v11 = vpop.eup %5445  ;;  %5022 = vmatmul.mubr.bf16.gmra.mrb[40].mxu1 %v921_v5  ;;  %v895_v9 = vmul.f32 %v5444_v25, %v6369_v15  ;;  %v5188_v15 = vld [vmem:[%s7747_s3 + $0xc8] sm:$0xff]  }
 0x304   :  { %v5448_v29 = vpop.eup %5447  ;;  %v893_v16 = vmul.f32 %v5446_v11, %v6372_v17  ;;  %5031 = vmatprep.subr.bf16.mxu0 %v5188_v15  ;;  %v5189_v17 = vld [vmem:[%s7747_s3 + $0xd0] sm:$0xff]  }
 0x305   :  { %v5450_v48 = vpop.eup %5449  ;;  %v896_v12 = vmul.f32 %v5448_v29, %v6376_v32  ;;  %5032 = vmatpush3.bf16.msra.mxu0 %v5188_v15  ;;  %v5190_v32 = vld [vmem:[%s7747_s3 + $0xd8] sm:$0xff]  }
 0x306   :  { %v894_v20 = vmul.f32 %v5450_v48, %v6380_v45  ;;  %5033 = vmatprep.subr.bf16.mxu0 %v5189_v17  ;;  %v5194_v45 = vld [vmem:[%s7747_s3 + $0xf8] sm:$0xff]  }
 0x307   :  { %v923_v31 = vpack.c.bf16 %v896_v12, %v895_v9 }
 0x308   :  { %v922_v57 = vpack.c.bf16 %v894_v20, %v893_v16 }
 0x309   :  { %5034 = vmatpush3.bf16.msra.mxu0 %v5189_v17 }
 0x30a   :  { %5025 = vmatprep.mubr.bf16.mxu1 %v922_v57  ;;  %5035 = vmatprep.subr.bf16.mxu0 %v5190_v32 }
 0x30b   :  { %5026 = vmatmul.mubr.bf16.gmra.mrb[44].mxu1 %v923_v31 }
 0x30d   :  { %5036 = vmatpush3.bf16.msra.mxu0 %v5190_v32 }
 0x30e   :  { %5037 = vmatprep.subr.bf16.mxu0 %v5191_v33 }
 0x311   :  { %5038 = vmatpush3.bf16.msra.mxu0 %v5191_v33 }
 0x312   :  { %5039 = vmatprep.subr.bf16.mxu0 %v5192_v35 }
 0x315   :  { %5040 = vmatpush3.bf16.msra.mxu0 %v5192_v35 }
 0x316   :  { %5041 = vmatprep.subr.bf16.mxu0 %v5193_v39 }
 0x319   :  { %5042 = vmatpush3.bf16.msra.mxu0 %v5193_v39 }
 0x31a   :  { %5043 = vmatprep.subr.bf16.mxu0 %v5194_v45 }
 0x31d   :  { %5044 = vmatpush3.bf16.msra.mxu0 %v5194_v45 }
 0x3c5   :  { %v5015_v52 = vpop.f32.mrb[32].mxu1 }
 0x3c6   :  { %v6430_v54 = vadd.f32 %v5015_v52, %v6427_v34  ;;  %v1012_v58 = vpop.f32.mrb[33].mxu1 }
 0x3c7   :  { %v6433_v37 = vadd.f32 %v6427_v34, %v1012_v58  ;;  %v5016_v41 = vpop.f32.mrb[34].mxu1 }
 0x3c8   :  { %v4522_v38 = vmul.f32 -1.442695, %v6430_v54  ;;  %v6437_v44 = vadd.f32 %v5016_v41, %v6427_v34  ;;  %v1015_v63 = vpop.f32.mrb[35].mxu1 }
 0x3c9   :  { %v4520_v42 = vmul.f32 -1.442695, %v6433_v37  ;;  %v6441_v47 = vadd.f32 %v6427_v34, %v1015_v63 }
 0x3ca   :  { %5451 = vpow2.f32 %v4522_v38  ;;  %v4523_v0 = vmul.f32 -1.442695, %v6437_v44 }
 0x3cb   :  { %5453 = vpow2.f32 %v4520_v42  ;;  %v4521_v43 = vmul.f32 -1.442695, %v6441_v47 }
 0x3cc   :  { %5455 = vpow2.f32 %v4523_v0 }
 0x3cd   :  { %5457 = vpow2.f32 %v4521_v43  ;;  %v5019_v51 = vpop.f32.mrb[36].mxu1 }
 0x3ce   :  { %v6446_v4 = vadd.f32 %v5019_v51, %v6427_v34  ;;  %v1028_v6 = vpop.f32.mrb[37].mxu1 }
 0x3cf   :  { %v6449_v46 = vadd.f32 %v6427_v34, %v1028_v6  ;;  %v5020_v55 = vpop.f32.mrb[38].mxu1 }
 0x3d0   :  { %v4526_v7 = vmul.f32 -1.442695, %v6446_v4  ;;  %v6453_v8 = vadd.f32 %v5020_v55, %v6427_v34  ;;  %v1031_v49 = vpop.f32.mrb[39].mxu1 }
 0x3d1   :  { %v4524_v36 = vmul.f32 -1.442695, %v6449_v46  ;;  %v6457_v10 = vadd.f32 %v6427_v34, %v1031_v49 }
 0x3d2   :  { %5459 = vpow2.f32 %v4526_v7  ;;  %v4527_v13 = vmul.f32 -1.442695, %v6453_v8 }
 0x3d3   :  { %5461 = vpow2.f32 %v4524_v36  ;;  %v4525_v14 = vmul.f32 -1.442695, %v6457_v10 }
 0x3d4   :  { %v5452_v53 = vpop.eup %5451  ;;  %5463 = vpow2.f32 %v4527_v13 }
 0x3d5   :  { %v5454_v50 = vpop.eup %5453  ;;  %v1125_v56 = vadd.f32 1.0, %v5452_v53  ;;  %5465 = vpow2.f32 %v4525_v14 }
 0x3d6   :  { %v5456_v18 = vpop.eup %5455  ;;  %v1123_v19 = vadd.f32 1.0, %v5454_v50  ;;  %v5023_v60 = vpop.f32.mrb[40].mxu1 }
 0x3d7   :  { %v5458_v59 = vpop.eup %5457  ;;  %5467 = vrcp.f32 %v1125_v56  ;;  %v1126_v61 = vadd.f32 1.0, %v5456_v18  ;;  %v6462_v22 = vadd.f32 %v5023_v60, %v6427_v34  ;;  %v1044_v24 = vpop.f32.mrb[41].mxu1 }
 0x3d8   :  { %5469 = vrcp.f32 %v1123_v19  ;;  %v1124_v26 = vadd.f32 1.0, %v5458_v59  ;;  %v6465_v62 = vadd.f32 %v6427_v34, %v1044_v24  ;;  %v5024_v2 = vpop.f32.mrb[42].mxu1 }
 0x3d9   :  { %5471 = vrcp.f32 %v1126_v61  ;;  %v4530_v40 = vmul.f32 -1.442695, %v6462_v22  ;;  %v6469_v27 = vadd.f32 %v5024_v2, %v6427_v34  ;;  %v1047_v3 = vpop.f32.mrb[43].mxu1 }
 0x3da   :  { %5473 = vrcp.f32 %v1124_v26  ;;  %v4528_v28 = vmul.f32 -1.442695, %v6465_v62  ;;  %v6473_v1 = vadd.f32 %v6427_v34, %v1047_v3 }
 0x3db   :  { %5475 = vpow2.f32 %v4530_v40  ;;  %v4531_v30 = vmul.f32 -1.442695, %v6469_v27 }
 0x3dc   :  { %v5460_v5 = vpop.eup %5459  ;;  %5477 = vpow2.f32 %v4528_v28  ;;  %v4529_v21 = vmul.f32 -1.442695, %v6473_v1 }
 0x3dd   :  { %v5462_v25 = vpop.eup %5461  ;;  %v1129_v11 = vadd.f32 1.0, %v5460_v5  ;;  %5479 = vpow2.f32 %v4531_v30 }
 0x3de   :  { %v5464_v29 = vpop.eup %5463  ;;  %v1127_v48 = vadd.f32 1.0, %v5462_v25  ;;  %5481 = vpow2.f32 %v4529_v21  ;;  %v5027_v9 = vpop.f32.mrb[44].mxu1 }
 0x3df   :  { %v5466_v12 = vpop.eup %5465  ;;  %5483 = vrcp.f32 %v1129_v11  ;;  %v1130_v16 = vadd.f32 1.0, %v5464_v29  ;;  %v6478_v20 = vadd.f32 %v5027_v9, %v6427_v34  ;;  %v1060_v31 = vpop.f32.mrb[45].mxu1 }
 0x3e0   :  { %5485 = vrcp.f32 %v1127_v48  ;;  %v1128_v57 = vadd.f32 1.0, %v5466_v12  ;;  %v6481_v23 = vadd.f32 %v6427_v34, %v1060_v31  ;;  %v5028_v15 = vpop.f32.mrb[46].mxu1 }
 0x3e1   :  { %v5468_v17 = vpop.eup %5467  ;;  %5487 = vrcp.f32 %v1130_v16  ;;  %v4534_v32 = vmul.f32 -1.442695, %v6478_v20  ;;  %v6485_v33 = vadd.f32 %v5028_v15, %v6427_v34  ;;  %v1063_v35 = vpop.f32.mrb[47].mxu1 }
 0x3e2   :  { %v5470_v39 = vpop.eup %5469  ;;  %5489 = vrcp.f32 %v1128_v57  ;;  %v4532_v45 = vmul.f32 -1.442695, %v6481_v23  ;;  %v6489_v52 = vadd.f32 %v6427_v34, %v1063_v35  ;;  %v1173_v63 = vmul.f32 %v5468_v17, %v6430_v54  ;;  %v5199_v35 = vld [vmem:[%s7747_s3 + $0x120] sm:$0xff]  }
 0x3e3   :  { %v5472_v58 = vpop.eup %5471  ;;  %5491 = vpow2.f32 %v4534_v32  ;;  %v4535_v41 = vmul.f32 -1.442695, %v6485_v33  ;;  %v1171_v51 = vmul.f32 %v5470_v39, %v6433_v37  ;;  %v5200_v39 = vld [vmem:[%s7747_s3 + $0x128] sm:$0xff]  }
 0x3e4   :  { %v5474_v38 = vpop.eup %5473  ;;  %v1174_v42 = vmul.f32 %v5472_v58, %v6437_v44  ;;  %5493 = vpow2.f32 %v4532_v45  ;;  %v4533_v0 = vmul.f32 -1.442695, %v6489_v52  ;;  %v5201_v45 = vld [vmem:[%s7747_s3 + $0x130] sm:$0xff]   ;;  %v6536_v58 = vld [vmem:[%s7748_s4 + $0x3] ss:$0 sm:$0xff] }
 0x3e5   :  { %v5476_v43 = vpop.eup %5475  ;;  %v1172_v6 = vmul.f32 %v5474_v38, %v6441_v47  ;;  %5495 = vpow2.f32 %v4535_v41 }
 0x3e6   :  { %v5478_v34 = vpop.eup %5477  ;;  %v1207_v55 = vpack.c.bf16 %v1174_v42, %v1173_v63  ;;  %v1133_v7 = vadd.f32 1.0, %v5476_v43  ;;  %5497 = vpow2.f32 %v4533_v0 }
 0x3e7   :  { %v5480_v49 = vpop.eup %5479  ;;  %v1131_v36 = vadd.f32 1.0, %v5478_v34  ;;  %v1206_v13 = vpack.c.bf16 %v1172_v6, %v1171_v51 }
 0x3e8   :  { %v5482_v14 = vpop.eup %5481  ;;  %5499 = vrcp.f32 %v1133_v7  ;;  %v1134_v54 = vadd.f32 1.0, %v5480_v49 }
 0x3e9   :  { %v5484_v44 = vpop.eup %5483  ;;  %5501 = vrcp.f32 %v1131_v36  ;;  %v1132_v53 = vadd.f32 1.0, %v5482_v14  ;;  %5045 = vmatprep.mubr.bf16.mxu0 %v1206_v13 }
 0x3ea   :  { %v5486_v50 = vpop.eup %5485  ;;  %5503 = vrcp.f32 %v1134_v54  ;;  %5046 = vmatmul.mubr.bf16.vlgmr.msra.gmra.mrb[16].mxu0 %v1207_v55  ;;  %v1177_v56 = vmul.f32 %v5484_v44, %v6446_v4 }
 0x3eb   :  { %v5488_v37 = vpop.eup %5487  ;;  %5505 = vrcp.f32 %v1132_v53  ;;  %v1175_v60 = vmul.f32 %v5486_v50, %v6449_v46 }
 0x3ec   :  { %v5490_v47 = vpop.eup %5489  ;;  %v1178_v18 = vmul.f32 %v5488_v37, %v6453_v8 }
 0x3ed   :  { %v5492_v19 = vpop.eup %5491  ;;  %v1176_v59 = vmul.f32 %v5490_v47, %v6457_v10 }
 0x3ee   :  { %v5494_v61 = vpop.eup %5493  ;;  %v1137_v24 = vadd.f32 1.0, %v5492_v19  ;;  %v1209_v26 = vpack.c.bf16 %v1178_v18, %v1177_v56 }
 0x3ef   :  { %v5496_v2 = vpop.eup %5495  ;;  %v1135_v40 = vadd.f32 1.0, %v5494_v61  ;;  %v1208_v3 = vpack.c.bf16 %v1176_v59, %v1175_v60 }
 0x3f0   :  { %v5498_v28 = vpop.eup %5497  ;;  %5507 = vrcp.f32 %v1137_v24  ;;  %v1138_v30 = vadd.f32 1.0, %v5496_v2 }
 0x3f1   :  { %5509 = vrcp.f32 %v1135_v40  ;;  %v1136_v5 = vadd.f32 1.0, %v5498_v28  ;;  %5049 = vmatprep.mubr.bf16.mxu0 %v1208_v3 }
 0x3f2   :  { %v5500_v4 = vpop.eup %5499  ;;  %5511 = vrcp.f32 %v1138_v30  ;;  %5050 = vmatmul.mubr.bf16.gmra.mrb[20].mxu0 %v1209_v26 }
 0x3f3   :  { %v5502_v8 = vpop.eup %5501  ;;  %5513 = vrcp.f32 %v1136_v5  ;;  %v1181_v10 = vmul.f32 %v5500_v4, %v6462_v22 }
 0x3f4   :  { %v5504_v46 = vpop.eup %5503  ;;  %v1179_v11 = vmul.f32 %v5502_v8, %v6465_v62 }
 0x3f5   :  { %v5506_v21 = vpop.eup %5505  ;;  %v1182_v25 = vmul.f32 %v5504_v46, %v6469_v27 }
 0x3f6   :  { %v1180_v29 = vmul.f32 %v5506_v21, %v6473_v1  ;;  %v5195_v1 = vld [vmem:[%s7747_s3 + $0x100] sm:$0xff]  }
 0x3f7   :  { %v1211_v48 = vpack.c.bf16 %v1182_v25, %v1181_v10  ;;  %5061 = vmatprep.subr.bf16.mxu1 %v5195_v1 }
 0x3f8   :  { %v1210_v9 = vpack.c.bf16 %v1180_v29, %v1179_v11  ;;  %5062 = vmatpush3.bf16.msra.mxu1 %v5195_v1 }
 0x3fa   :  { %v5508_v12 = vpop.eup %5507  ;;  %5053 = vmatprep.mubr.bf16.mxu0 %v1210_v9 }
 0x3fb   :  { %v5510_v16 = vpop.eup %5509  ;;  %5054 = vmatmul.mubr.bf16.gmra.mrb[24].mxu0 %v1211_v48  ;;  %v1185_v15 = vmul.f32 %v5508_v12, %v6478_v20  ;;  %v5196_v20 = vld [vmem:[%s7747_s3 + $0x108] sm:$0xff]  }
 0x3fc   :  { %v5512_v31 = vpop.eup %5511  ;;  %v1183_v22 = vmul.f32 %v5510_v16, %v6481_v23  ;;  %5063 = vmatprep.subr.bf16.mxu1 %v5196_v20  ;;  %v5197_v23 = vld [vmem:[%s7747_s3 + $0x110] sm:$0xff]  }
 0x3fd   :  { %v5514_v57 = vpop.eup %5513  ;;  %v1186_v17 = vmul.f32 %v5512_v31, %v6485_v33  ;;  %5064 = vmatpush3.bf16.msra.mxu1 %v5196_v20  ;;  %v5198_v33 = vld [vmem:[%s7747_s3 + $0x118] sm:$0xff]  }
 0x3fe   :  { %v1184_v27 = vmul.f32 %v5514_v57, %v6489_v52  ;;  %5065 = vmatprep.subr.bf16.mxu1 %v5197_v23  ;;  %v5202_v52 = vld [vmem:[%s7747_s3 + $0x138] sm:$0xff]  }
 0x3ff   :  { %v1213_v32 = vpack.c.bf16 %v1186_v17, %v1185_v15 }
 0x400   :  { %v1212_v62 = vpack.c.bf16 %v1184_v27, %v1183_v22 }
 0x401   :  { %5066 = vmatpush3.bf16.msra.mxu1 %v5197_v23 }
 0x402   :  { %5057 = vmatprep.mubr.bf16.mxu0 %v1212_v62  ;;  %5067 = vmatprep.subr.bf16.mxu1 %v5198_v33 }
 0x403   :  { %5058 = vmatmul.mubr.bf16.gmra.mrb[28].mxu0 %v1213_v32 }
 0x405   :  { %5068 = vmatpush3.bf16.msra.mxu1 %v5198_v33 }
 0x406   :  { %5069 = vmatprep.subr.bf16.mxu1 %v5199_v35 }
 0x409   :  { %5070 = vmatpush3.bf16.msra.mxu1 %v5199_v35 }
 0x40a   :  { %5071 = vmatprep.subr.bf16.mxu1 %v5200_v39 }
 0x40d   :  { %5072 = vmatpush3.bf16.msra.mxu1 %v5200_v39 }
 0x40e   :  { %5073 = vmatprep.subr.bf16.mxu1 %v5201_v45 }
 0x411   :  { %5074 = vmatpush3.bf16.msra.mxu1 %v5201_v45 }
 0x412   :  { %5075 = vmatprep.subr.bf16.mxu1 %v5202_v52 }
 0x415   :  { %5076 = vmatpush3.bf16.msra.mxu1 %v5202_v52 }
 0x4bd   :  { %v5047_v41 = vpop.f32.mrb[16].mxu0 }
 0x4be   :  { %v1311_v38 = vadd.f32 %v5047_v41, %v6536_v58  ;;  %v1302_v63 = vpop.f32.mrb[17].mxu0 }
 0x4bf   :  { %v6540_v42 = vadd.f32 %v6536_v58, %v1302_v63  ;;  %v5048_v0 = vpop.f32.mrb[18].mxu0 }
 0x4c0   :  { %v4564_v43 = vmul.f32 -1.442695, %v1311_v38  ;;  %v6543_v51 = vadd.f32 %v5048_v0, %v6536_v58  ;;  %v1305_v6 = vpop.f32.mrb[19].mxu0 }
 0x4c1   :  { %v4562_v34 = vmul.f32 -1.442695, %v6540_v42  ;;  %v6547_v55 = vadd.f32 %v6536_v58, %v1305_v6 }
 0x4c2   :  { %5515 = vpow2.f32 %v4564_v43  ;;  %v4565_v7 = vmul.f32 -1.442695, %v6543_v51 }
 0x4c3   :  { %5517 = vpow2.f32 %v4562_v34  ;;  %v4563_v49 = vmul.f32 -1.442695, %v6547_v55 }
 0x4c4   :  { %5519 = vpow2.f32 %v4565_v7 }
 0x4c5   :  { %5521 = vpow2.f32 %v4563_v49  ;;  %v5051_v36 = vpop.f32.mrb[20].mxu0 }
 0x4c6   :  { %v6552_v13 = vadd.f32 %v5051_v36, %v6536_v58  ;;  %v1318_v14 = vpop.f32.mrb[21].mxu0 }
 0x4c7   :  { %v6555_v54 = vadd.f32 %v6536_v58, %v1318_v14  ;;  %v5052_v44 = vpop.f32.mrb[22].mxu0 }
 0x4c8   :  { %v4568_v53 = vmul.f32 -1.442695, %v6552_v13  ;;  %v6559_v50 = vadd.f32 %v5052_v44, %v6536_v58  ;;  %v1321_v37 = vpop.f32.mrb[23].mxu0 }
 0x4c9   :  { %v4566_v47 = vmul.f32 -1.442695, %v6555_v54  ;;  %v6564_v40 = vadd.f32 %v6536_v58, %v1321_v37 }
 0x4ca   :  { %5523 = vpow2.f32 %v4568_v53  ;;  %v4569_v56 = vmul.f32 -1.442695, %v6559_v50 }
 0x4cb   :  { %5525 = vpow2.f32 %v4566_v47  ;;  %v4567_v4 = vmul.f32 -1.442695, %v6564_v40 }
 0x4cc   :  { %v5516_v18 = vpop.eup %5515  ;;  %5527 = vpow2.f32 %v4569_v56 }
 0x4cd   :  { %v5518_v19 = vpop.eup %5517  ;;  %v1415_v60 = vadd.f32 1.0, %v5516_v18 }
 0x4ce   :  { %v5520_v59 = vpop.eup %5519  ;;  %v1413_v61 = vadd.f32 1.0, %v5518_v19  ;;  %v5055_v24 = vpop.f32.mrb[24].mxu0 }
 0x4cf   :  { %v5522_v26 = vpop.eup %5521  ;;  %5529 = vrcp.f32 %v1415_v60  ;;  %v1416_v2 = vadd.f32 1.0, %v5520_v59  ;;  %v1334_v3 = vpop.f32.mrb[25].mxu0  ;;  %v6568_v25 = vadd.f32 %v5055_v24, %v6536_v58 }
 0x4d0   :  { %5531 = vrcp.f32 %v1413_v61  ;;  %v1414_v28 = vadd.f32 1.0, %v5522_v26  ;;  %v5056_v30 = vpop.f32.mrb[26].mxu0  ;;  %v6573_v48 = vadd.f32 %v6536_v58, %v1334_v3 }
 0x4d1   :  { %5533 = vrcp.f32 %v1416_v2  ;;  %v1337_v5 = vpop.f32.mrb[27].mxu0  ;;  %v4572_v22 = vmul.f32 -1.442695, %v6568_v25  ;;  %v6585_v27 = vadd.f32 %v5056_v30, %v6536_v58 }
 0x4d2   :  { %5535 = vrcp.f32 %v1414_v28  ;;  %v4570_v1 = vmul.f32 -1.442695, %v6573_v48  ;;  %v6592_v20 = vadd.f32 %v6536_v58, %v1337_v5 }
 0x4d3   :  { %5537 = vpow2.f32 %v4567_v4  ;;  %v4573_v2 = vmul.f32 -1.442695, %v6585_v27 }
 0x4d4   :  { %v5524_v8 = vpop.eup %5523 }
 0x4d5   :  { %v5526_v46 = vpop.eup %5525  ;;  %v1419_v10 = vadd.f32 1.0, %v5524_v8 }
 0x4d6   :  { %v5528_v21 = vpop.eup %5527  ;;  %v6570_v11 = vpop.f32.mrb[28].mxu0  ;;  %v1417_v29 = vadd.f32 1.0, %v5526_v46 }
 0x4d7   :  { %v6575_v9 = vpop.f32.mrb[29].mxu0  ;;  %v1420_v12 = vadd.f32 1.0, %v5528_v21  ;;  %5539 = vrcp.f32 %v1419_v10 }
 0x4d8   :  { %v6577_v16 = vpop.f32.mrb[30].mxu0  ;;  %5541 = vrcp.f32 %v1417_v29 }
 0x4d9   :  { %v5530_v31 = vpop.eup %5529  ;;  %v6579_v57 = vpop.f32.mrb[31].mxu0  ;;  %5543 = vrcp.f32 %v1420_v12 }
 0x4da   :  { %v5532_v15 = vpop.eup %5531  ;;  %v6581_v17 = vmul.f32 %v5530_v31, %v1311_v38  ;;  %5545 = vpow2.f32 %v4572_v22 }
 0x4db   :  { %v5534_v32 = vpop.eup %5533  ;;  %v6588_v62 = vmul.f32 %v5532_v15, %v6540_v42  ;;  %5547 = vpow2.f32 %v4570_v1 }
 0x4dc   :  { %v5536_v23 = vpop.eup %5535  ;;  %v1495_v33 = vcombine.high %v6581_v17, %v6581_v17  ;;  %v1554_v35 = vsel %vm1525_vm1, %v6581_v17, -inf  ;;  %v6599_v39 = vmul.f32 %v5534_v32, %v6543_v51  ;;  %5549 = vpow2.f32 %v4573_v2 }
 0x4dd   :  { %v1555_v45 = vrot.slane %v1554_v35, 4  ;;  %v1493_v52 = vcombine.high %v6588_v62, %v6588_v62  ;;  %v1526_v41 = vsel %vm1525_vm1, %v6588_v62, -inf  ;;  %v6606_v38 = vmul.f32 %v5536_v23, %v6547_v55  ;;  %v5538_v44 = vpop.eup %5537 }
 0x4de   :  { %v1561_v63 = vsel %vm1525_vm1, %v1495_v33, -inf  ;;  %v1527_v42 = vrot.slane %v1526_v41, 4  ;;  %v1496_v0 = vcombine.high %v6599_v39, %v6599_v39  ;;  %v1568_v43 = vsel %vm1525_vm1, %v6599_v39, -inf }
 0x4df   :  { %v1556_v51 = vmax.f32 %v1554_v35, %v1555_v45  ;;  %v1562_v6 = vrot.slane %v1561_v63, 4  ;;  %v1533_v34 = vsel %vm1525_vm1, %v1493_v52, -inf  ;;  %v1569_v7 = vrot.slane %v1568_v43, 4 }
 0x4e0   :  { %v1528_v49 = vmax.f32 %v1526_v41, %v1527_v42  ;;  %v1534_v36 = vrot.slane %v1533_v34, 4  ;;  %v1575_v14 = vsel %vm1525_vm1, %v1496_v0, -inf  ;;  %v1794_v55 = vpack.c.bf16 %v6599_v39, %v6581_v17 }
 0x4e1   :  { %v1557_v53 = vrot.slane %v1556_v51, 2  ;;  %v1563_v37 = vmax.f32 %v1561_v63, %v1562_v6  ;;  %v1570_v47 = vmax.f32 %v1568_v43, %v1569_v7  ;;  %v1576_v56 = vrot.slane %v1575_v14, 4  ;;  %v5540_v3 = vpop.eup %5539 }
 0x4e2   :  { %v1529_v18 = vrot.slane %v1528_v49, 2  ;;  %v1535_v19 = vmax.f32 %v1533_v34, %v1534_v36  ;;  %v1494_v60 = vcombine.high %v6606_v38, %v6606_v38  ;;  %v1540_v59 = vsel %vm1525_vm1, %v6606_v38, -inf  ;;  %v5542_v8 = vpop.eup %5541 }
 0x4e3   :  { %v1558_v61 = vmax.f32 %v1556_v51, %v1557_v53  ;;  %v1564_v24 = vrot.slane %v1563_v37, 2  ;;  %v1577_v26 = vmax.f32 %v1575_v14, %v1576_v56  ;;  %v1541_v30 = vrot.slane %v1540_v59, 4  ;;  %v5544_v29 = vpop.eup %5543 }
 0x4e4   :  { %v1536_v28 = vrot.slane %v1535_v19, 2  ;;  %v1547_v5 = vsel %vm1525_vm1, %v1494_v60, -inf  ;;  %v1418_v4 = vadd.f32 1.0, %v5538_v44  ;;  %v1530_v21 = vmax.f32 %v1528_v49, %v1529_v18 }
 0x4e5   :  { %v1559_v46 = vrot.slane %v1558_v61, 1  ;;  %v1571_v10 = vrot.slane %v1570_v47, 2  ;;  %v1565_v12 = vmax.f32 %v1563_v37, %v1564_v24  ;;  %v1542_v31 = vmax.f32 %v1540_v59, %v1541_v30 }
 0x4e6   :  { %v1548_v15 = vrot.slane %v1547_v5, 4  ;;  %v1537_v32 = vmax.f32 %v1535_v19, %v1536_v28  ;;  %v1578_v23 = vrot.slane %v1577_v26, 2  ;;  %v4571_v33 = vmul.f32 -1.442695, %v6592_v20  ;;  %v5546_v19 = vpop.eup %5545 }
 0x4e7   :  { %v1543_v35 = vrot.slane %v1542_v31, 2  ;;  %5551 = vrcp.f32 %v1418_v4  ;;  %v6626_v52 = vadd.f32 %v6536_v58, %v6575_v9  ;;  %v1560_v41 = vmax.f32 %v1558_v61, %v1559_v46 }
 0x4e8   :  { %v1549_v45 = vmax.f32 %v1547_v5, %v1548_v15  ;;  %v1531_v63 = vrot.slane %v1530_v21, 1  ;;  %v1572_v22 = vmax.f32 %v1570_v47, %v1571_v10  ;;  %v6629_v42 = vmul.f32 %v5540_v3, %v6552_v13 }
 0x4e9   :  { %v1566_v0 = vrot.slane %v1565_v12, 1  ;;  %v1544_v1 = vmax.f32 %v1542_v31, %v1543_v35  ;;  %v6632_v51 = vmul.f32 %v5542_v8, %v6555_v54  ;;  %v1538_v6 = vrot.slane %v1537_v32, 1 }
 0x4ea   :  { %v1550_v43 = vrot.slane %v1549_v45, 2  ;;  %v1579_v34 = vmax.f32 %v1577_v26, %v1578_v23  ;;  %v1499_v7 = vcombine.high %v6629_v42, %v6629_v42  ;;  %v6637_v9 = vmul.f32 %v5544_v29, %v6559_v50  ;;  %v5548_v26 = vpop.eup %5547 }
 0x4eb   :  { %v1545_v49 = vrot.slane %v1544_v1, 1  ;;  %v1610_v13 = vsel %vm1525_vm1, %v6629_v42, -inf  ;;  %v1497_v14 = vcombine.high %v6632_v51, %v6632_v51  ;;  %v1532_v44 = vmax.f32 %v1530_v21, %v1531_v63  ;;  %v5550_v5 = vpop.eup %5549 }
 0x4ec   :  { %v1551_v36 = vmax.f32 %v1549_v45, %v1550_v43  ;;  %v1573_v53 = vrot.slane %v1572_v22, 1  ;;  %v1582_v54 = vsel %vm1525_vm1, %v6632_v51, -inf  ;;  %v1500_v37 = vcombine.high %v6637_v9, %v6637_v9 }
 0x4ed   :  { %v1546_v47 = vmax.f32 %v1544_v1, %v1545_v49  ;;  %v1617_v50 = vsel %vm1525_vm1, %v1499_v7, -inf  ;;  %v1624_v18 = vsel %vm1525_vm1, %v6637_v9, -inf  ;;  %v1539_v60 = vmax.f32 %v1537_v32, %v1538_v6 }
 0x4ee   :  { %v1552_v56 = vrot.slane %v1551_v36, 1  ;;  %v1580_v59 = vrot.slane %v1579_v34, 1  ;;  %v1611_v61 = vrot.slane %v1610_v13, 4  ;;  %v1589_v24 = vsel %vm1525_vm1, %v1497_v14, -inf }
 0x4ef   :  { %v1750_v3 = vmax.f32 %v1532_v44, %v1546_v47  ;;  %v1583_v28 = vrot.slane %v1582_v54, 4  ;;  %v1631_v30 = vsel %vm1525_vm1, %v1500_v37, -inf  ;;  %v1618_v4 = vrot.slane %v1617_v50, 4 }
 0x4f0   :  { %v1553_v2 = vmax.f32 %v1551_v36, %v1552_v56  ;;  %v1590_v8 = vrot.slane %v1589_v24, 4  ;;  %v1625_v46 = vrot.slane %v1624_v18, 4  ;;  %v6654_v21 = vadd.f32 %v6570_v11, %v6536_v58 }
 0x4f1   :  { %v5552_v10 = vpop.eup %5551  ;;  %v1567_v29 = vmax.f32 %v1565_v12, %v1566_v0  ;;  %v1574_v31 = vmax.f32 %v1572_v22, %v1573_v53  ;;  %v1751_v15 = vmax.f32 %v1750_v3, %v1560_v41  ;;  %v1612_v23 = vmax.f32 %v1610_v13, %v1611_v61 }
 0x4f2   :  { %v1753_v32 = vmax.f32 %v1539_v60, %v1553_v2  ;;  %v1632_v35 = vrot.slane %v1631_v30, 4  ;;  %5553 = vpow2.f32 %v4571_v33  ;;  %v4574_v45 = vmul.f32 -1.442695, %v6626_v52 }
 0x4f3   :  { %v1581_v63 = vmax.f32 %v1579_v34, %v1580_v59  ;;  %v1752_v1 = vmax.f32 %v1751_v15, %v1574_v31  ;;  %v1584_v6 = vmax.f32 %v1582_v54, %v1583_v28  ;;  %v1619_v7 = vmax.f32 %v1617_v50, %v1618_v4 }
 0x4f4   :  { %v1754_v43 = vmax.f32 %v1753_v32, %v1567_v29  ;;  %v1591_v49 = vmax.f32 %v1589_v24, %v1590_v8  ;;  %v1626_v36 = vmax.f32 %v1624_v18, %v1625_v46  ;;  %v4576_v11 = vmul.f32 -1.442695, %v6654_v21 }
 0x4f5   :  { %v1466_v12 = vmul.f32 %v5552_v10, %v6564_v40  ;;  %v1613_v41 = vrot.slane %v1612_v23, 2  ;;  %v1633_v22 = vmax.f32 %v1631_v30, %v1632_v35  ;;  %5555 = vpow2.f32 %v4574_v45 }
 0x4f6   :  { %v1755_v14 = vmax.f32 %v1754_v43, %v1581_v63  ;;  %v1585_v33 = vrot.slane %v1584_v6, 2  ;;  %v1620_v44 = vrot.slane %v1619_v7, 2  ;;  %v1592_v53 = vrot.slane %v1591_v49, 2 }
 0x4f7   :  { %v1498_v13 = vcombine.high %v1466_v12, %v1466_v12  ;;  %v1596_v34 = vsel %vm1525_vm1, %v1466_v12, -inf  ;;  %v1627_v54 = vrot.slane %v1626_v36, 2  ;;  %5557 = vpow2.f32 %v4576_v11 }
 0x4f8   :  { %v3564_v0 = vrot.slane %v1755_v14, 7  ;;  %v1597_v47 = vrot.slane %v1596_v34, 4  ;;  %v1423_v40 = vadd.f32 1.0, %v5546_v19  ;;  %v1614_v50 = vmax.f32 %v1612_v23, %v1613_v41 }
 0x4f9   :  { %v1603_v56 = vsel %vm1525_vm1, %v1498_v13, -inf  ;;  %v1634_v18 = vrot.slane %v1633_v22, 2  ;;  %v1421_v59 = vadd.f32 1.0, %v5548_v26  ;;  %v1586_v61 = vmax.f32 %v1584_v6, %v1585_v33 }
 0x4fa   :  { %v6661_v37 = vsel %vm3565_vm2, %v3564_v0, %v1752_v1  ;;  %v1604_v60 = vrot.slane %v1603_v56, 4  ;;  %v1598_v24 = vmax.f32 %v1596_v34, %v1597_v47  ;;  %5559 = vrcp.f32 %v1423_v40 }
 0x4fb   :  { %v1424_v2 = vadd.f32 1.0, %v5550_v5  ;;  %v1621_v28 = vmax.f32 %v1619_v7, %v1620_v44  ;;  %v1593_v30 = vmax.f32 %v1591_v49, %v1592_v53  ;;  %5561 = vrcp.f32 %v1421_v59 }
 0x4fc   :  { %v5554_v3 = vpop.eup %5553  ;;  %v1605_v4 = vmax.f32 %v1603_v56, %v1604_v60  ;;  %v1628_v8 = vmax.f32 %v1626_v36, %v1627_v54  ;;  %v1599_v46 = vrot.slane %v1598_v24, 2  ;;  %v1793_v10 = vpack.c.bf16 %v6606_v38, %v6588_v62 }
 0x4fd   :  { %5563 = vrcp.f32 %v1424_v2  ;;  %v1635_v19 = vmax.f32 %v1633_v22, %v1634_v18  ;;  %v1795_v31 = vpack.c.bf16 %v1466_v12, %v6632_v51  ;;  %v1796_v26 = vpack.c.bf16 %v6637_v9, %v6629_v42 }
 0x4fe   :  { %v1606_v29 = vrot.slane %v1605_v4, 2  ;;  %v1587_v15 = vrot.slane %v1586_v61, 1  ;;  %v1600_v5 = vmax.f32 %v1598_v24, %v1599_v46  ;;  %v1422_v32 = vadd.f32 1.0, %v5554_v3  ;;  %5077 = vmatprep.mubr.bf16.mxu1 %v1793_v10 }
 0x4ff   :  { %v5556_v23 = vpop.eup %5555  ;;  %v1594_v35 = vrot.slane %v1593_v30, 1  ;;  %v6671_v63 = vadd.f32 %v6577_v16, %v6536_v58  ;;  %5078 = vmatmul.mubr.bf16.vlgmr.msra.gmra.mrb[48].mxu1 %v1794_v55  ;;  %v1615_v62 = vrot.slane %v1614_v50, 1  ;;  %v1622_v38 = vrot.slane %v1621_v28, 1 }
 0x500   :  { %v1607_v45 = vmax.f32 %v1605_v4, %v1606_v29  ;;  %v1629_v51 = vrot.slane %v1628_v8, 1  ;;  %v1601_v1 = vrot.slane %v1600_v5, 1  ;;  %5081 = vmatprep.mubr.bf16.mxu1 %v1795_v31  ;;  %v1636_v9 = vrot.slane %v1635_v19, 1 }
 0x501   :  { %v5558_v42 = vpop.eup %5557  ;;  %v6678_v6 = vadd.f32 %v6536_v58, %v6579_v57  ;;  %v1588_v7 = vmax.f32 %v1586_v61, %v1587_v15  ;;  %5565 = vrcp.f32 %v1422_v32  ;;  %v1425_v49 = vadd.f32 1.0, %v5556_v23 }
 0x502   :  { %v1608_v43 = vrot.slane %v1607_v45, 1  ;;  %v1602_v16 = vmax.f32 %v1600_v5, %v1601_v1  ;;  %v1595_v36 = vmax.f32 %v1593_v30, %v1594_v35  ;;  %v4577_v39 = vmul.f32 -1.442695, %v6671_v63 }
 0x503   :  { %v1616_v11 = vmax.f32 %v1614_v50, %v1615_v62  ;;  %v1623_v14 = vmax.f32 %v1621_v28, %v1622_v38  ;;  %v1630_v12 = vmax.f32 %v1628_v8, %v1629_v51  ;;  %v1637_v0 = vmax.f32 %v1635_v19, %v1636_v9 }
 0x504   :  { %v1609_v17 = vmax.f32 %v1607_v45, %v1608_v43  ;;  %v5560_v55 = vpop.eup %5559  ;;  %v1756_v41 = vmax.f32 %v1588_v7, %v1602_v16  ;;  %v1427_v57 = vadd.f32 1.0, %v5558_v42  ;;  %5567 = vrcp.f32 %v1425_v49 }
 0x505   :  { %v5562_v22 = vpop.eup %5561  ;;  %v6682_v58 = vmul.f32 %v5560_v55, %v6568_v25  ;;  %v4575_v53 = vmul.f32 -1.442695, %v6678_v6  ;;  %5569 = vpow2.f32 %v4577_v39 }
 0x506   :  { %v1759_v33 = vmax.f32 %v1595_v36, %v1609_v17  ;;  %v1757_v34 = vmax.f32 %v1756_v41, %v1616_v11  ;;  %v6685_v44 = vmul.f32 %v5562_v22, %v6573_v48  ;;  %5571 = vrcp.f32 %v1427_v57 }
 0x507   :  { %v5564_v13 = vpop.eup %5563  ;;  %v1503_v47 = vcombine.high %v6682_v58, %v6682_v58  ;;  %v1666_v56 = vsel %vm1525_vm1, %v6682_v58, -inf  ;;  %5082 = vmatmul.mubr.bf16.gmra.mrb[52].mxu1 %v1796_v26  ;;  %5573 = vpow2.f32 %v4575_v53 }
 0x508   :  { %v1760_v54 = vmax.f32 %v1759_v33, %v1623_v14  ;;  %v6693_v40 = vmul.f32 %v5564_v13, %v6585_v27  ;;  %v1758_v25 = vmax.f32 %v1757_v34, %v1630_v12  ;;  %v1501_v50 = vcombine.high %v6685_v44, %v6685_v44 }
 0x509   :  { %v1638_v48 = vsel %vm1525_vm1, %v6685_v44, -inf  ;;  %v1673_v60 = vsel %vm1525_vm1, %v1503_v47, -inf  ;;  %v1667_v2 = vrot.slane %v1666_v56, 4 }
 0x50a   :  { %v1761_v18 = vmax.f32 %v1760_v54, %v1637_v0  ;;  %v1639_v59 = vrot.slane %v1638_v48, 4  ;;  %v1504_v61 = vcombine.high %v6693_v40, %v6693_v40  ;;  %v3567_v24 = vrot.slane %v1758_v25, 6 }
 0x50b   :  { %v1674_v27 = vrot.slane %v1673_v60, 4  ;;  %v1645_v3 = vsel %vm1525_vm1, %v1501_v50, -inf  ;;  %v1680_v8 = vsel %vm1525_vm1, %v6693_v40, -inf  ;;  %v5566_v46 = vpop.eup %5565  ;;  %v1668_v15 = vmax.f32 %v1666_v56, %v1667_v2 }
 0x50c   :  { %v3570_v28 = vrot.slane %v1761_v18, 5  ;;  %v1640_v30 = vmax.f32 %v1638_v48, %v1639_v59  ;;  %v1646_v4 = vrot.slane %v1645_v3, 4  ;;  %v3569_v10 = vsel %vm3568_vm3, %v3567_v24, %v6661_v37 }
 0x50d   :  { %v1681_v19 = vrot.slane %v1680_v8, 4  ;;  %v1687_v26 = vsel %vm1525_vm1, %v1504_v61, -inf  ;;  %v1675_v5 = vmax.f32 %v1673_v60, %v1674_v27  ;;  %v1470_v35 = vmul.f32 %v5566_v46, %v6592_v20 }
 0x50e   :  { %v3572_v29 = vsel %vm3571_vm4, %v3570_v28, %v3569_v10  ;;  %v1647_v31 = vmax.f32 %v1645_v3, %v1646_v4  ;;  %v1688_v32 = vrot.slane %v1687_v26, 4  ;;  %v1641_v23 = vrot.slane %v1640_v30, 2  ;;  %v5568_v45 = vpop.eup %5567 }
 0x50f   :  { %3623 = vst [vmem:[%s7755_s11] sm:$0xf] %v3572_v29  ;;  %v1682_v62 = vmax.f32 %v1680_v8, %v1681_v19  ;;  %v1502_v38 = vcombine.high %v1470_v35, %v1470_v35  ;;  %v1652_v51 = vsel %vm1525_vm1, %v1470_v35, -inf  ;;  %v5570_v1 = vpop.eup %5569  ;;  %v1669_v42 = vrot.slane %v1668_v15, 2 }
 0x510   :  { %v1648_v37 = vrot.slane %v1647_v31, 2  ;;  %v1676_v9 = vrot.slane %v1675_v5, 2  ;;  %v1689_v43 = vmax.f32 %v1687_v26, %v1688_v32  ;;  %v1642_v7 = vmax.f32 %v1640_v30, %v1641_v23  ;;  %v5572_v11 = vpop.eup %5571 }
 0x511   :  { %v1653_v16 = vrot.slane %v1652_v51, 4  ;;  %v1659_v49 = vsel %vm1525_vm1, %v1502_v38, -inf  ;;  %v1683_v17 = vrot.slane %v1682_v62, 2  ;;  %v1670_v20 = vmax.f32 %v1668_v15, %v1669_v42  ;;  %v5574_v57 = vpop.eup %5573 }
 0x512   :  { %v1649_v36 = vmax.f32 %v1647_v31, %v1648_v37  ;;  %v1660_v39 = vrot.slane %v1659_v49, 4  ;;  %v1677_v14 = vmax.f32 %v1675_v5, %v1676_v9  ;;  %v1690_v12 = vrot.slane %v1689_v43, 2 }
 0x513   :  { %v1654_v55 = vmax.f32 %v1652_v51, %v1653_v16  ;;  %v1643_v22 = vrot.slane %v1642_v7, 1  ;;  %v1428_v33 = vadd.f32 1.0, %v5570_v1  ;;  %v1684_v34 = vmax.f32 %v1682_v62, %v1683_v17 }
 0x514   :  { %v1661_v41 = vmax.f32 %v1659_v49, %v1660_v39  ;;  %v1650_v13 = vrot.slane %v1649_v36, 1  ;;  %v6716_v54 = vmul.f32 %v5568_v45, %v6626_v52  ;;  %v6719_v56 = vmul.f32 %v5572_v11, %v6654_v21 }
 0x515   :  { %v1655_v0 = vrot.slane %v1654_v55, 2  ;;  %5575 = vrcp.f32 %v1428_v33  ;;  %v1671_v25 = vrot.slane %v1670_v20, 1  ;;  %v1678_v50 = vrot.slane %v1677_v14, 1 }
 0x516   :  { %v1662_v53 = vrot.slane %v1661_v41, 2  ;;  %v1691_v48 = vmax.f32 %v1689_v43, %v1690_v12  ;;  %v1644_v60 = vmax.f32 %v1642_v7, %v1643_v22  ;;  %v1426_v61 = vadd.f32 1.0, %v5574_v57 }
 0x517   :  { %v1656_v47 = vmax.f32 %v1654_v55, %v1655_v0  ;;  %v1797_v24 = vpack.c.bf16 %v1470_v35, %v6685_v44  ;;  %v1651_v2 = vmax.f32 %v1649_v36, %v1650_v13  ;;  %v1685_v27 = vrot.slane %v1684_v34, 1 }
 0x518   :  { %v1663_v18 = vmax.f32 %v1661_v41, %v1662_v53  ;;  %v1505_v52 = vcombine.high %v6716_v54, %v6716_v54  ;;  %v1507_v21 = vcombine.high %v6719_v56, %v6719_v56  ;;  %5577 = vrcp.f32 %v1426_v61 }
 0x519   :  { %v1657_v59 = vrot.slane %v1656_v47, 1  ;;  %5085 = vmatprep.mubr.bf16.mxu1 %v1797_v24  ;;  %v1798_v30 = vpack.c.bf16 %v6693_v40, %v6682_v58  ;;  %v1692_v4 = vrot.slane %v1691_v48, 1  ;;  %v1722_v44 = vsel %vm1525_vm1, %v6719_v56, -inf }
 0x51a   :  { %v1664_v3 = vrot.slane %v1663_v18, 1  ;;  %v1694_v46 = vsel %vm1525_vm1, %v6716_v54, -inf  ;;  %v1672_v10 = vmax.f32 %v1670_v20, %v1671_v25  ;;  %v1679_v29 = vmax.f32 %v1677_v14, %v1678_v50 }
 0x51b   :  { %v1658_v28 = vmax.f32 %v1656_v47, %v1657_v59  ;;  %5086 = vmatmul.mubr.bf16.gmra.mrb[56].mxu1 %v1798_v30  ;;  %v1686_v31 = vmax.f32 %v1684_v34, %v1685_v27  ;;  %v1701_v15 = vsel %vm1525_vm1, %v1505_v52, -inf  ;;  %v1723_v32 = vrot.slane %v1722_v44, 4 }
 0x51c   :  { %v1665_v8 = vmax.f32 %v1663_v18, %v1664_v3  ;;  %v1729_v58 = vsel %vm1525_vm1, %v1507_v21, -inf  ;;  %v1695_v40 = vrot.slane %v1694_v46, 4  ;;  %v1693_v23 = vmax.f32 %v1691_v48, %v1692_v4 }
 0x51d   :  { %v1762_v19 = vmax.f32 %v1644_v60, %v1658_v28  ;;  %v1702_v62 = vrot.slane %v1701_v15, 4  ;;  %v1730_v51 = vrot.slane %v1729_v58, 4  ;;  %v1724_v42 = vmax.f32 %v1722_v44, %v1723_v32 }
 0x51e   :  { %v1765_v26 = vmax.f32 %v1651_v2, %v1665_v8  ;;  %v1696_v9 = vmax.f32 %v1694_v46, %v1695_v40 }
 0x51f   :  { %v1763_v5 = vmax.f32 %v1762_v19, %v1672_v10  ;;  %v5576_v45 = vpop.eup %5575  ;;  %v1703_v17 = vmax.f32 %v1701_v15, %v1702_v62  ;;  %v1731_v11 = vmax.f32 %v1729_v58, %v1730_v51  ;;  %v1725_v22 = vrot.slane %v1724_v42, 2 }
 0x520   :  { %v1766_v35 = vmax.f32 %v1765_v26, %v1679_v29  ;;  %v1476_v1 = vmul.f32 %v5576_v45, %v6671_v63  ;;  %v1697_v12 = vrot.slane %v1696_v9, 2 }
 0x521   :  { %v1764_v37 = vmax.f32 %v1763_v5, %v1686_v31  ;;  %v1704_v13 = vrot.slane %v1703_v17, 2  ;;  %v1732_v47 = vrot.slane %v1731_v11, 2  ;;  %v1726_v18 = vmax.f32 %v1724_v42, %v1725_v22 }
 0x522   :  { %v1767_v38 = vmax.f32 %v1766_v35, %v1693_v23  ;;  %v1508_v7 = vcombine.high %v1476_v1, %v1476_v1  ;;  %v1736_v16 = vsel %vm1525_vm1, %v1476_v1, -inf  ;;  %v1800_v49 = vpack.c.bf16 %v1476_v1, %v6719_v56  ;;  %v5578_v36 = vpop.eup %5577 }
 0x523   :  { %v1737_v39 = vrot.slane %v1736_v16, 4  ;;  %v1474_v14 = vmul.f32 %v5578_v36, %v6678_v6  ;;  %v1698_v25 = vmax.f32 %v1696_v9, %v1697_v12  ;;  %v1705_v60 = vmax.f32 %v1703_v17, %v1704_v13  ;;  %v5207_v36 = vld [vmem:[%s7747_s3 + $0x160] sm:$0xff]   ;;  %v5208_v17 = vld [vmem:[%s7747_s3 + $0x168] sm:$0xff]  }
 0x524   :  { %v3573_v43 = vrot.slane %v1767_v38, 7  ;;  %v1743_v20 = vsel %vm1525_vm1, %v1508_v7, -inf  ;;  %v1733_v2 = vmax.f32 %v1731_v11, %v1732_v47  ;;  %v1727_v28 = vrot.slane %v1726_v18, 1  ;;  %v5204_v7 = vld [vmem:[%s7747_s3 + $0x148] sm:$0xff]   ;;  %v6775_v11 = vld [vmem:[%s7748_s4 + $0x4] ss:$0 sm:$0xff] }
 0x525   :  { %v1738_v63 = vmax.f32 %v1736_v16, %v1737_v39  ;;  %v1744_v41 = vrot.slane %v1743_v20, 4  ;;  %v1506_v0 = vcombine.high %v1474_v14, %v1474_v14  ;;  %v1708_v33 = vsel %vm1525_vm1, %v1474_v14, -inf  ;;  %v5205_v16 = vld [vmem:[%s7747_s3 + $0x150] sm:$0xff]  }
 0x526   :  { %v3574_v55 = vsel %vm3565_vm2, %v3573_v43, %v1764_v37  ;;  %v1799_v57 = vpack.c.bf16 %v1474_v14, %v6716_v54  ;;  %v1709_v53 = vrot.slane %v1708_v33, 4  ;;  %v1699_v27 = vrot.slane %v1698_v25, 1  ;;  %v5203_v43 = vld [vmem:[%s7747_s3 + $0x140] sm:$0xff]   ;;  %v5209_v39 = vld [vmem:[%s7747_s3 + $0x170] sm:$0xff]  }
 0x527   :  { %v1745_v34 = vmax.f32 %v1743_v20, %v1744_v41  ;;  %v1715_v56 = vsel %vm1525_vm1, %v1506_v0, -inf  ;;  %v1739_v50 = vrot.slane %v1738_v63, 2  ;;  %v1706_v21 = vrot.slane %v1705_v60, 1  ;;  %5093 = vmatprep.subr.bf16.mxu0 %v5203_v43 }
 0x528   :  { %5089 = vmatprep.mubr.bf16.mxu1 %v1799_v57  ;;  %v1710_v48 = vmax.f32 %v1708_v33, %v1709_v53  ;;  %v1716_v6 = vrot.slane %v1715_v56, 4  ;;  %v1734_v44 = vrot.slane %v1733_v2, 1  ;;  %v1700_v46 = vmax.f32 %v1698_v25, %v1699_v27  ;;  %5094 = vmatpush3.bf16.msra.mxu0 %v5203_v43 }
 0x529   :  { %5090 = vmatmul.mubr.bf16.gmra.mrb[60].mxu1 %v1800_v49  ;;  %v1746_v59 = vrot.slane %v1745_v34, 2  ;;  %v1740_v54 = vmax.f32 %v1738_v63, %v1739_v50  ;;  %v1728_v31 = vmax.f32 %v1726_v18, %v1727_v28  ;;  %v1707_v26 = vmax.f32 %v1705_v60, %v1706_v21  ;;  %5095 = vmatprep.subr.bf16.mxu0 %v5204_v7  ;;  %v5206_v49 = vld [vmem:[%s7747_s3 + $0x158] sm:$0xff]  }
 0x52a   :  { %v1711_v61 = vrot.slane %v1710_v48, 2  ;;  %v1717_v24 = vmax.f32 %v1715_v56, %v1716_v6  ;;  %v1735_v58 = vmax.f32 %v1733_v2, %v1734_v44 }
 0x52b   :  { %v1747_v30 = vmax.f32 %v1745_v34, %v1746_v59  ;;  %v1741_v10 = vrot.slane %v1740_v54, 1 }
 0x52c   :  { %v1712_v3 = vmax.f32 %v1710_v48, %v1711_v61  ;;  %v1718_v52 = vrot.slane %v1717_v24, 2  ;;  %5096 = vmatpush3.bf16.msra.mxu0 %v5204_v7 }
 0x52d   :  { %v1748_v15 = vrot.slane %v1747_v30, 1  ;;  %v1742_v40 = vmax.f32 %v1740_v54, %v1741_v10  ;;  %5097 = vmatprep.subr.bf16.mxu0 %v5205_v16 }
 0x52e   :  { %v1713_v4 = vrot.slane %v1712_v3, 1  ;;  %v1719_v8 = vmax.f32 %v1717_v24, %v1718_v52 }
 0x52f   :  { %v1749_v45 = vmax.f32 %v1747_v30, %v1748_v15 }
 0x530   :  { %v1714_v19 = vmax.f32 %v1712_v3, %v1713_v4  ;;  %v1720_v29 = vrot.slane %v1719_v8, 1  ;;  %5098 = vmatpush3.bf16.msra.mxu0 %v5205_v16 }
 0x531   :  { %5099 = vmatprep.subr.bf16.mxu0 %v5206_v49 }
 0x532   :  { %v1721_v5 = vmax.f32 %v1719_v8, %v1720_v29  ;;  %v1768_v32 = vmax.f32 %v1700_v46, %v1714_v19 }
 0x534   :  { %v1769_v23 = vmax.f32 %v1768_v32, %v1728_v31  ;;  %v1771_v35 = vmax.f32 %v1707_v26, %v1721_v5  ;;  %5100 = vmatpush3.bf16.msra.mxu0 %v5206_v49 }
 0x535   :  { %5101 = vmatprep.subr.bf16.mxu0 %v5207_v36 }
 0x536   :  { %v1770_v37 = vmax.f32 %v1769_v23, %v1742_v40  ;;  %v1772_v62 = vmax.f32 %v1771_v35, %v1735_v58 }
 0x538   :  { %v1773_v38 = vmax.f32 %v1772_v62, %v1749_v45  ;;  %v3575_v51 = vrot.slane %v1770_v37, 6  ;;  %5102 = vmatpush3.bf16.msra.mxu0 %v5207_v36 }
 0x539   :  { %5103 = vmatprep.subr.bf16.mxu0 %v5208_v17 }
 0x53a   :  { %v3576_v1 = vsel %vm3568_vm3, %v3575_v51, %v3574_v55  ;;  %v3577_v42 = vrot.slane %v1773_v38, 5  ;;  %v5210_v55 = vld [vmem:[%s7747_s3 + $0x178] sm:$0xff]  }
 0x53c   :  { %v3578_v9 = vsel %vm3571_vm4, %v3577_v42, %v3576_v1  ;;  %5104 = vmatpush3.bf16.msra.mxu0 %v5208_v17 }
 0x53d   :  { %3624 = vst [vmem:[%s7755_s11 + $0x4] sm:$0xf] %v3578_v9  ;;  %5105 = vmatprep.subr.bf16.mxu0 %v5209_v39 }
 0x540   :  { %5106 = vmatpush3.bf16.msra.mxu0 %v5209_v39 }
 0x541   :  { %5107 = vmatprep.subr.bf16.mxu0 %v5210_v55 }
 0x544   :  { %5108 = vmatpush3.bf16.msra.mxu0 %v5210_v55 }
 0x5d2   :  { %v5079_v20 = vpop.f32.mrb[48].mxu1 }
 0x5d3   :  { %v1898_v14 = vadd.f32 %v5079_v20, %v6775_v11  ;;  %v1889_v12 = vpop.f32.mrb[49].mxu1 }
 0x5d4   :  { %v1890_v63 = vadd.f32 %v6775_v11, %v1889_v12  ;;  %v5080_v41 = vpop.f32.mrb[50].mxu1 }
 0x5d5   :  { %v4606_v22 = vmul.f32 -1.442695, %v1898_v14  ;;  %v1901_v0 = vadd.f32 %v5080_v41, %v6775_v11  ;;  %v1892_v33 = vpop.f32.mrb[51].mxu1 }
 0x5d6   :  { %v4604_v57 = vmul.f32 -1.442695, %v1890_v63  ;;  %v1893_v13 = vadd.f32 %v6775_v11, %v1892_v33 }
 0x5d7   :  { %5579 = vpow2.f32 %v4606_v22  ;;  %v4607_v34 = vmul.f32 -1.442695, %v1901_v0 }
 0x5d8   :  { %5581 = vpow2.f32 %v4604_v57  ;;  %v4605_v53 = vmul.f32 -1.442695, %v1893_v13 }
 0x5d9   :  { %5583 = vpow2.f32 %v4607_v34 }
 0x5da   :  { %5585 = vpow2.f32 %v4605_v53  ;;  %v5083_v47 = vpop.f32.mrb[52].mxu1 }
 0x5db   :  { %v6782_v56 = vadd.f32 %v5083_v47, %v6775_v11  ;;  %v1905_v25 = vpop.f32.mrb[53].mxu1 }
 0x5dc   :  { %v6785_v50 = vadd.f32 %v6775_v11, %v1905_v25  ;;  %v5084_v48 = vpop.f32.mrb[54].mxu1 }
 0x5dd   :  { %v4610_v6 = vmul.f32 -1.442695, %v6782_v56  ;;  %v6789_v18 = vadd.f32 %v5084_v48, %v6775_v11  ;;  %v1908_v60 = vpop.f32.mrb[55].mxu1 }
 0x5de   :  { %v4608_v59 = vmul.f32 -1.442695, %v6785_v50  ;;  %v6793_v61 = vadd.f32 %v6775_v11, %v1908_v60 }
 0x5df   :  { %5587 = vpow2.f32 %v4610_v6  ;;  %v4611_v24 = vmul.f32 -1.442695, %v6789_v18 }
 0x5e0   :  { %5589 = vpow2.f32 %v4608_v59  ;;  %v4609_v2 = vmul.f32 -1.442695, %v6793_v61 }
 0x5e1   :  { %v5580_v27 = vpop.eup %5579  ;;  %5591 = vpow2.f32 %v4611_v24 }
 0x5e2   :  { %v5582_v54 = vpop.eup %5581  ;;  %v2002_v3 = vadd.f32 1.0, %v5580_v27  ;;  %5593 = vpow2.f32 %v4609_v2 }
 0x5e3   :  { %v5584_v52 = vpop.eup %5583  ;;  %v2000_v28 = vadd.f32 1.0, %v5582_v54 }
 0x5e4   :  { %v5586_v21 = vpop.eup %5585  ;;  %5595 = vrcp.f32 %v2002_v3  ;;  %v2003_v30 = vadd.f32 1.0, %v5584_v52 }
 0x5e5   :  { %5597 = vrcp.f32 %v2000_v28  ;;  %v2001_v4 = vadd.f32 1.0, %v5586_v21 }
 0x5e6   :  { %5599 = vrcp.f32 %v2003_v30 }
 0x5e7   :  { %5601 = vrcp.f32 %v2001_v4 }
 0x5e9   :  { %v5588_v8 = vpop.eup %5587 }
 0x5ea   :  { %v5590_v44 = vpop.eup %5589  ;;  %v2006_v10 = vadd.f32 1.0, %v5588_v8 }
 0x5eb   :  { %v5592_v46 = vpop.eup %5591  ;;  %v2004_v19 = vadd.f32 1.0, %v5590_v44 }
 0x5ec   :  { %v5594_v29 = vpop.eup %5593  ;;  %v2007_v31 = vadd.f32 1.0, %v5592_v46  ;;  %5603 = vrcp.f32 %v2006_v10 }
 0x5ed   :  { %5605 = vrcp.f32 %v2004_v19  ;;  %v2005_v40 = vadd.f32 1.0, %v5594_v29 }
 0x5ee   :  { %v5596_v26 = vpop.eup %5595  ;;  %5607 = vrcp.f32 %v2007_v31  ;;  %v6813_v42 = vpop.f32.mrb[56].mxu1 }
 0x5ef   :  { %v5598_v15 = vpop.eup %5597  ;;  %v6797_v5 = vmul.f32 %v5596_v26, %v1898_v14  ;;  %v6820_v49 = vpop.f32.mrb[57].mxu1  ;;  %5609 = vrcp.f32 %v2005_v40 }
 0x5f0   :  { %v5600_v32 = vpop.eup %5599  ;;  %v6799_v58 = vmul.f32 %v5598_v15, %v1890_v63  ;;  %v6823_v20 = vpop.f32.mrb[58].mxu1 }
 0x5f1   :  { %v5602_v23 = vpop.eup %5601  ;;  %v2082_v35 = vcombine.high %v6797_v5, %v6797_v5  ;;  %v2140_v45 = vsel %vm1525_vm1, %v6797_v5, -inf  ;;  %v6805_v37 = vmul.f32 %v5600_v32, %v1901_v0  ;;  %v6828_v22 = vpop.f32.mrb[59].mxu1 }
 0x5f2   :  { %v2141_v62 = vrot.slane %v2140_v45, 4  ;;  %v2080_v38 = vcombine.high %v6799_v58, %v6799_v58  ;;  %v2112_v51 = vsel %vm1525_vm1, %v6799_v58, -inf  ;;  %v6811_v1 = vmul.f32 %v5602_v23, %v1893_v13 }
 0x5f3   :  { %v2147_v9 = vsel %vm1525_vm1, %v2082_v35, -inf  ;;  %v2113_v43 = vrot.slane %v2112_v51, 4  ;;  %v2083_v7 = vcombine.high %v6805_v37, %v6805_v37  ;;  %v2154_v16 = vsel %vm1525_vm1, %v6805_v37, -inf }
 0x5f4   :  { %v2142_v36 = vmax.f32 %v2140_v45, %v2141_v62  ;;  %v2148_v17 = vrot.slane %v2147_v9, 4  ;;  %v2119_v39 = vsel %vm1525_vm1, %v2080_v38, -inf  ;;  %v2155_v55 = vrot.slane %v2154_v16, 4 }
 0x5f5   :  { %v2114_v14 = vmax.f32 %v2112_v51, %v2113_v43  ;;  %v2120_v12 = vrot.slane %v2119_v39, 4  ;;  %v2161_v63 = vsel %vm1525_vm1, %v2083_v7, -inf  ;;  %v2380_v41 = vpack.c.bf16 %v6805_v37, %v6797_v5 }
 0x5f6   :  { %v2143_v0 = vrot.slane %v2142_v36, 2  ;;  %v2149_v33 = vmax.f32 %v2147_v9, %v2148_v17  ;;  %v2156_v57 = vmax.f32 %v2154_v16, %v2155_v55  ;;  %v2162_v13 = vrot.slane %v2161_v63, 4  ;;  %v5604_v24 = vpop.eup %5603 }
 0x5f7   :  { %v2115_v34 = vrot.slane %v2114_v14, 2  ;;  %v2121_v53 = vmax.f32 %v2119_v39, %v2120_v12  ;;  %v2081_v47 = vcombine.high %v6811_v1, %v6811_v1  ;;  %v2126_v25 = vsel %vm1525_vm1, %v6811_v1, -inf  ;;  %v5606_v52 = vpop.eup %5605 }
 0x5f8   :  { %v2144_v48 = vmax.f32 %v2142_v36, %v2143_v0  ;;  %v2150_v6 = vrot.slane %v2149_v33, 2  ;;  %v2157_v60 = vrot.slane %v2156_v57, 2  ;;  %v2163_v59 = vmax.f32 %v2161_v63, %v2162_v13  ;;  %v5608_v8 = vpop.eup %5607 }
 0x5f9   :  { %v2116_v2 = vmax.f32 %v2114_v14, %v2115_v34  ;;  %v2122_v27 = vrot.slane %v2121_v53, 2  ;;  %v2127_v54 = vrot.slane %v2126_v25, 4  ;;  %v2133_v3 = vsel %vm1525_vm1, %v2081_v47, -inf }
 0x5fa   :  { %v2145_v28 = vrot.slane %v2144_v48, 1  ;;  %v2151_v21 = vmax.f32 %v2149_v33, %v2150_v6  ;;  %v2158_v30 = vmax.f32 %v2156_v57, %v2157_v60  ;;  %v2164_v4 = vrot.slane %v2163_v59, 2 }
 0x5fb   :  { %v2117_v44 = vrot.slane %v2116_v2, 1  ;;  %v2123_v46 = vmax.f32 %v2121_v53, %v2122_v27  ;;  %v2128_v10 = vmax.f32 %v2126_v25, %v2127_v54  ;;  %v2134_v19 = vrot.slane %v2133_v3, 4 }
 0x5fc   :  { %v2165_v29 = vmax.f32 %v2163_v59, %v2164_v4  ;;  %v2146_v31 = vmax.f32 %v2144_v48, %v2145_v28  ;;  %v2152_v32 = vrot.slane %v2151_v21, 1  ;;  %v2159_v35 = vrot.slane %v2158_v30, 1  ;;  %v6848_v36 = vpop.f32.mrb[60].mxu1  ;;  %v5610_v28 = vpop.eup %5609 }
 0x5fd   :  { %v2129_v26 = vrot.slane %v2128_v10, 2  ;;  %v2135_v15 = vmax.f32 %v2133_v3, %v2134_v19  ;;  %v2118_v23 = vmax.f32 %v2116_v2, %v2117_v44  ;;  %v6836_v45 = vmul.f32 %v5604_v24, %v6782_v56 }
 0x5fe   :  { %v2124_v62 = vrot.slane %v2123_v46, 1  ;;  %v6839_v9 = vmul.f32 %v5606_v52, %v6785_v50  ;;  %v2166_v43 = vrot.slane %v2165_v29, 1  ;;  %v6846_v40 = vmul.f32 %v5608_v8, %v6789_v18  ;;  %v6852_v50 = vpop.f32.mrb[61].mxu1 }
 0x5ff   :  { %v2130_v38 = vmax.f32 %v2128_v10, %v2129_v26  ;;  %v2136_v51 = vrot.slane %v2135_v15, 2  ;;  %v2086_v7 = vcombine.high %v6836_v45, %v6836_v45  ;;  %v2196_v16 = vsel %vm1525_vm1, %v6836_v45, -inf  ;;  %v6861_v0 = vpop.f32.mrb[62].mxu1 }
 0x600   :  { %v2197_v39 = vrot.slane %v2196_v16, 4  ;;  %v2084_v55 = vcombine.high %v6839_v9, %v6839_v9  ;;  %v2168_v12 = vsel %vm1525_vm1, %v6839_v9, -inf  ;;  %v2087_v63 = vcombine.high %v6846_v40, %v6846_v40  ;;  %v6863_v53 = vpop.f32.mrb[63].mxu1 }
 0x601   :  { %v2131_v56 = vrot.slane %v2130_v38, 1  ;;  %v2137_v17 = vmax.f32 %v2135_v15, %v2136_v51  ;;  %v2203_v14 = vsel %vm1525_vm1, %v2086_v7, -inf  ;;  %v2210_v18 = vsel %vm1525_vm1, %v6846_v40, -inf }
 0x602   :  { %v2125_v33 = vmax.f32 %v2123_v46, %v2124_v62  ;;  %v2204_v34 = vrot.slane %v2203_v14, 4  ;;  %v2169_v47 = vrot.slane %v2168_v12, 4  ;;  %v2175_v25 = vsel %vm1525_vm1, %v2084_v55, -inf }
 0x603   :  { %v2132_v57 = vmax.f32 %v2130_v38, %v2131_v56  ;;  %v2138_v13 = vrot.slane %v2137_v17, 1  ;;  %v2211_v48 = vrot.slane %v2210_v18, 4  ;;  %v2217_v6 = vsel %vm1525_vm1, %v2087_v63, -inf }
 0x604   :  { %v2198_v24 = vmax.f32 %v2196_v16, %v2197_v39  ;;  %v2205_v2 = vmax.f32 %v2203_v14, %v2204_v34  ;;  %v2170_v27 = vmax.f32 %v2168_v12, %v2169_v47  ;;  %v2176_v54 = vrot.slane %v2175_v25, 4 }
 0x605   :  { %v2139_v60 = vmax.f32 %v2137_v17, %v2138_v13  ;;  %v2336_v59 = vmax.f32 %v2118_v23, %v2132_v57  ;;  %v2212_v3 = vmax.f32 %v2210_v18, %v2211_v48  ;;  %v2218_v52 = vrot.slane %v2217_v6, 4 }
 0x606   :  { %v2153_v4 = vmax.f32 %v2151_v21, %v2152_v32  ;;  %v2160_v8 = vmax.f32 %v2158_v30, %v2159_v35  ;;  %v2171_v10 = vrot.slane %v2170_v27, 2  ;;  %v2177_v19 = vmax.f32 %v2175_v25, %v2176_v54 }
 0x607   :  { %v2337_v44 = vmax.f32 %v2336_v59, %v2146_v31  ;;  %v2339_v46 = vmax.f32 %v2125_v33, %v2139_v60  ;;  %v2167_v26 = vmax.f32 %v2165_v29, %v2166_v43  ;;  %v2199_v38 = vrot.slane %v2198_v24, 2 }
 0x608   :  { %v2206_v51 = vrot.slane %v2205_v2, 2  ;;  %v2213_v7 = vrot.slane %v2212_v3, 2  ;;  %v2219_v23 = vmax.f32 %v2217_v6, %v2218_v52  ;;  %v2053_v56 = vmul.f32 %v5610_v28, %v6793_v61 }
 0x609   :  { %v2338_v15 = vmax.f32 %v2337_v44, %v2160_v8  ;;  %v2340_v62 = vmax.f32 %v2339_v46, %v2153_v4  ;;  %v2172_v17 = vmax.f32 %v2170_v27, %v2171_v10  ;;  %v2178_v39 = vrot.slane %v2177_v19, 2 }
 0x60a   :  { %v2085_v14 = vcombine.high %v2053_v56, %v2053_v56  ;;  %v2182_v21 = vsel %vm1525_vm1, %v2053_v56, -inf  ;;  %v2200_v30 = vmax.f32 %v2198_v24, %v2199_v38  ;;  %v2207_v31 = vmax.f32 %v2205_v2, %v2206_v51 }
 0x60b   :  { %v2341_v16 = vmax.f32 %v2340_v62, %v2167_v26  ;;  %v2214_v32 = vmax.f32 %v2212_v3, %v2213_v7  ;;  %v2220_v35 = vrot.slane %v2219_v23, 2  ;;  %v2183_v43 = vrot.slane %v2182_v21, 4 }
 0x60c   :  { %v2189_v12 = vsel %vm1525_vm1, %v2085_v14, -inf  ;;  %v6875_v63 = vadd.f32 %v6813_v42, %v6775_v11  ;;  %v2173_v61 = vrot.slane %v2172_v17, 1  ;;  %v2179_v18 = vmax.f32 %v2177_v19, %v2178_v39 }
 0x60d   :  { %v3579_v55 = vrot.slane %v2341_v16, 7  ;;  %v2190_v33 = vrot.slane %v2189_v12, 4  ;;  %v6879_v57 = vadd.f32 %v6775_v11, %v6820_v49  ;;  %v2184_v13 = vmax.f32 %v2182_v21, %v2183_v43 }
 0x60e   :  { %v4614_v34 = vmul.f32 -1.442695, %v6875_v63  ;;  %v6884_v47 = vadd.f32 %v6823_v20, %v6775_v11  ;;  %v6888_v25 = vadd.f32 %v6775_v11, %v6828_v22  ;;  %v6893_v6 = vadd.f32 %v6848_v36, %v6775_v11 }
 0x60f   :  { %v6870_v29 = vsel %vm3565_vm2, %v3579_v55, %v2338_v15  ;;  %v2191_v42 = vmax.f32 %v2189_v12, %v2190_v33  ;;  %v4612_v48 = vmul.f32 -1.442695, %v6879_v57  ;;  %v6897_v49 = vadd.f32 %v6775_v11, %v6852_v50 }
 0x610   :  { %v2185_v60 = vrot.slane %v2184_v13, 2  ;;  %5611 = vpow2.f32 %v4614_v34  ;;  %v4615_v20 = vmul.f32 -1.442695, %v6884_v47  ;;  %v4613_v59 = vmul.f32 -1.442695, %v6888_v25 }
 0x611   :  { %v2180_v24 = vrot.slane %v2179_v18, 1  ;;  %v2221_v22 = vmax.f32 %v2219_v23, %v2220_v35  ;;  %v2192_v2 = vrot.slane %v2191_v42, 2  ;;  %5613 = vpow2.f32 %v4612_v48 }
 0x612   :  { %v2186_v27 = vmax.f32 %v2184_v13, %v2185_v60  ;;  %5615 = vpow2.f32 %v4615_v20  ;;  %v4618_v54 = vmul.f32 -1.442695, %v6893_v6  ;;  %v6904_v36 = vadd.f32 %v6861_v0, %v6775_v11 }
 0x613   :  { %v2193_v50 = vmax.f32 %v2191_v42, %v2192_v2  ;;  %5617 = vpow2.f32 %v4613_v59  ;;  %v2379_v3 = vpack.c.bf16 %v6811_v1, %v6799_v58  ;;  %v2381_v52 = vpack.c.bf16 %v2053_v56, %v6839_v9 }
 0x614   :  { %v2201_v28 = vrot.slane %v2200_v30, 1  ;;  %v2187_v4 = vrot.slane %v2186_v27, 1  ;;  %v4616_v8 = vmul.f32 -1.442695, %v6897_v49  ;;  %v2208_v44 = vrot.slane %v2207_v31, 1 }
 0x615   :  { %v2194_v46 = vrot.slane %v2193_v50, 1  ;;  %v4619_v10 = vmul.f32 -1.442695, %v6904_v36  ;;  %5109 = vmatprep.mubr.bf16.mxu0 %v2379_v3  ;;  %v2382_v0 = vpack.c.bf16 %v6846_v40, %v6836_v45  ;;  %v2174_v19 = vmax.f32 %v2172_v17, %v2173_v61 }
 0x616   :  { %v2215_v26 = vrot.slane %v2214_v32, 1  ;;  %v2188_v15 = vmax.f32 %v2186_v27, %v2187_v4  ;;  %5110 = vmatmul.mubr.bf16.vlgmr.msra.gmra.mrb[32].mxu0 %v2380_v41  ;;  %v2181_v58 = vmax.f32 %v2179_v18, %v2180_v24  ;;  %v2222_v1 = vrot.slane %v2221_v22, 1 }
 0x617   :  { %v2195_v9 = vmax.f32 %v2193_v50, %v2194_v46  ;;  %5619 = vpow2.f32 %v4618_v54  ;;  %5113 = vmatprep.mubr.bf16.mxu0 %v2381_v52  ;;  %v2202_v62 = vmax.f32 %v2200_v30, %v2201_v28  ;;  %v2209_v51 = vmax.f32 %v2207_v31, %v2208_v44 }
 0x618   :  { %v2342_v38 = vmax.f32 %v2174_v19, %v2188_v15  ;;  %5621 = vpow2.f32 %v4616_v8  ;;  %v2216_v45 = vmax.f32 %v2214_v32, %v2215_v26  ;;  %v2223_v56 = vmax.f32 %v2221_v22, %v2222_v1 }
 0x619   :  { %v2345_v7 = vmax.f32 %v2181_v58, %v2195_v9  ;;  %5623 = vpow2.f32 %v4619_v10  ;;  %v6918_v55 = vadd.f32 %v6775_v11, %v6863_v53 }
 0x61a   :  { %v5612_v23 = vpop.eup %5611  ;;  %v2343_v40 = vmax.f32 %v2342_v38, %v2202_v62 }
 0x61b   :  { %v5614_v16 = vpop.eup %5613  ;;  %v2346_v17 = vmax.f32 %v2345_v7, %v2209_v51  ;;  %v2010_v39 = vadd.f32 1.0, %v5612_v23  ;;  %v4617_v12 = vmul.f32 -1.442695, %v6918_v55 }
 0x61c   :  { %v5616_v5 = vpop.eup %5615  ;;  %v2344_v37 = vmax.f32 %v2343_v40, %v2216_v45  ;;  %v2008_v41 = vadd.f32 1.0, %v5614_v16 }
 0x61d   :  { %v5618_v14 = vpop.eup %5617  ;;  %v2347_v21 = vmax.f32 %v2346_v17, %v2223_v56  ;;  %5625 = vrcp.f32 %v2010_v39  ;;  %v2011_v30 = vadd.f32 1.0, %v5616_v5 }
 0x61e   :  { %v3581_v31 = vrot.slane %v2344_v37, 6  ;;  %5627 = vrcp.f32 %v2008_v41  ;;  %v2009_v35 = vadd.f32 1.0, %v5618_v14  ;;  %5114 = vmatmul.mubr.bf16.gmra.mrb[36].mxu0 %v2382_v0 }
 0x61f   :  { %v3583_v32 = vrot.slane %v2347_v21, 5  ;;  %5629 = vrcp.f32 %v2011_v30 }
 0x620   :  { %v3582_v43 = vsel %vm3568_vm3, %v3581_v31, %v6870_v29  ;;  %5631 = vrcp.f32 %v2009_v35 }
 0x621   :  { %v5620_v61 = vpop.eup %5619  ;;  %v3584_v11 = vsel %vm3571_vm4, %v3583_v32, %v3582_v43  ;;  %5633 = vpow2.f32 %v4617_v12 }
 0x622   :  { %v5622_v53 = vpop.eup %5621  ;;  %3625 = vst [vmem:[%s7755_s11 + $0x8] sm:$0xf] %v3584_v11  ;;  %v2014_v33 = vadd.f32 1.0, %v5620_v61 }
 0x623   :  { %v5624_v18 = vpop.eup %5623  ;;  %v2012_v13 = vadd.f32 1.0, %v5622_v53 }
 0x624   :  { %v2015_v34 = vadd.f32 1.0, %v5624_v18  ;;  %5635 = vrcp.f32 %v2014_v33 }
 0x625   :  { %5637 = vrcp.f32 %v2012_v13 }
 0x626   :  { %5639 = vrcp.f32 %v2015_v34 }
 0x627   :  { %v5626_v42 = vpop.eup %5625 }
 0x628   :  { %v5628_v48 = vpop.eup %5627  ;;  %v6928_v29 = vmul.f32 %v5626_v42, %v6875_v63 }
 0x629   :  { %v5630_v60 = vpop.eup %5629  ;;  %v6931_v20 = vmul.f32 %v5628_v48, %v6879_v57 }
 0x62a   :  { %v5632_v59 = vpop.eup %5631  ;;  %v2090_v24 = vcombine.high %v6928_v29, %v6928_v29  ;;  %v2252_v22 = vsel %vm1525_vm1, %v6928_v29, -inf  ;;  %v6938_v2 = vmul.f32 %v5630_v60, %v6884_v47 }
 0x62b   :  { %v2253_v27 = vrot.slane %v2252_v22, 4  ;;  %v2088_v63 = vcombine.high %v6931_v20, %v6931_v20  ;;  %v2224_v57 = vsel %vm1525_vm1, %v6931_v20, -inf  ;;  %v6945_v54 = vmul.f32 %v5632_v59, %v6888_v25  ;;  %v5634_v46 = vpop.eup %5633 }
 0x62c   :  { %v2259_v50 = vsel %vm1525_vm1, %v2090_v24, -inf  ;;  %v2225_v3 = vrot.slane %v2224_v57, 4  ;;  %v2091_v52 = vcombine.high %v6938_v2, %v6938_v2  ;;  %v2266_v47 = vsel %vm1525_vm1, %v6938_v2, -inf }
 0x62d   :  { %v2254_v28 = vmax.f32 %v2252_v22, %v2253_v27  ;;  %v2260_v4 = vrot.slane %v2259_v50, 4  ;;  %v2231_v8 = vsel %vm1525_vm1, %v2088_v63, -inf  ;;  %v2267_v44 = vrot.slane %v2266_v47, 4 }
 0x62e   :  { %v2226_v10 = vmax.f32 %v2224_v57, %v2225_v3  ;;  %v2232_v0 = vrot.slane %v2231_v8, 4  ;;  %v2273_v25 = vsel %vm1525_vm1, %v2091_v52, -inf  ;;  %v2089_v19 = vcombine.high %v6945_v54, %v6945_v54  ;;  %v5636_v40 = vpop.eup %5635 }
 0x62f   :  { %v2261_v26 = vmax.f32 %v2259_v50, %v2260_v4  ;;  %v2268_v15 = vmax.f32 %v2266_v47, %v2267_v44  ;;  %v2274_v58 = vrot.slane %v2273_v25, 4  ;;  %v2238_v62 = vsel %vm1525_vm1, %v6945_v54, -inf  ;;  %v5638_v5 = vpop.eup %5637 }
 0x630   :  { %v2227_v1 = vrot.slane %v2226_v10, 2  ;;  %v2233_v9 = vmax.f32 %v2231_v8, %v2232_v0  ;;  %v2245_v38 = vsel %vm1525_vm1, %v2089_v19, -inf  ;;  %v2255_v51 = vrot.slane %v2254_v28, 2  ;;  %v5640_v14 = vpop.eup %5639 }
 0x631   :  { %v2262_v7 = vrot.slane %v2261_v26, 2  ;;  %v2275_v23 = vmax.f32 %v2273_v25, %v2274_v58  ;;  %v2013_v45 = vadd.f32 1.0, %v5634_v46  ;;  %v2269_v56 = vrot.slane %v2268_v15, 2 }
 0x632   :  { %v2234_v16 = vrot.slane %v2233_v9, 2  ;;  %v2239_v17 = vrot.slane %v2238_v62, 4  ;;  %v2246_v39 = vrot.slane %v2245_v38, 4  ;;  %v2228_v37 = vmax.f32 %v2226_v10, %v2227_v1 }
 0x633   :  { %v2276_v41 = vrot.slane %v2275_v23, 2  ;;  %v2256_v35 = vmax.f32 %v2254_v28, %v2255_v51  ;;  %v2263_v32 = vmax.f32 %v2261_v26, %v2262_v7  ;;  %v2270_v43 = vmax.f32 %v2268_v15, %v2269_v56 }
 0x634   :  { %v2235_v21 = vmax.f32 %v2233_v9, %v2234_v16  ;;  %v2240_v30 = vmax.f32 %v2238_v62, %v2239_v17  ;;  %v2247_v31 = vmax.f32 %v2245_v38, %v2246_v39  ;;  %5641 = vrcp.f32 %v2013_v45 }
 0x635   :  { %v2229_v11 = vrot.slane %v2228_v37, 1  ;;  %v2277_v18 = vmax.f32 %v2275_v23, %v2276_v41  ;;  %v6960_v33 = vmul.f32 %v5636_v40, %v6893_v6  ;;  %v6963_v42 = vmul.f32 %v5638_v5, %v6897_v49 }
 0x636   :  { %v2241_v12 = vrot.slane %v2240_v30, 2  ;;  %v2248_v61 = vrot.slane %v2247_v31, 2  ;;  %v2236_v53 = vrot.slane %v2235_v21, 1  ;;  %v2257_v48 = vrot.slane %v2256_v35, 1 }
 0x637   :  { %v2264_v60 = vrot.slane %v2263_v32, 1  ;;  %v2094_v59 = vcombine.high %v6960_v33, %v6960_v33  ;;  %v6968_v24 = vmul.f32 %v5640_v14, %v6904_v36  ;;  %v2271_v22 = vrot.slane %v2270_v43, 1 }
 0x638   :  { %v2242_v13 = vmax.f32 %v2240_v30, %v2241_v12  ;;  %v2249_v34 = vmax.f32 %v2247_v31, %v2248_v61  ;;  %v2092_v6 = vcombine.high %v6963_v42, %v6963_v42  ;;  %v2230_v57 = vmax.f32 %v2228_v37, %v2229_v11 }
 0x639   :  { %v2237_v50 = vmax.f32 %v2235_v21, %v2236_v53  ;;  %v2278_v3 = vrot.slane %v2277_v18, 1  ;;  %v2280_v49 = vsel %vm1525_vm1, %v6963_v42, -inf  ;;  %v2308_v28 = vsel %vm1525_vm1, %v6960_v33, -inf }
 0x63a   :  { %v2243_v27 = vrot.slane %v2242_v13, 1  ;;  %v2250_v63 = vrot.slane %v2249_v34, 1  ;;  %v2095_v36 = vcombine.high %v6968_v24, %v6968_v24  ;;  %v2258_v4 = vmax.f32 %v2256_v35, %v2257_v48 }
 0x63b   :  { %v2265_v8 = vmax.f32 %v2263_v32, %v2264_v60  ;;  %v2315_v44 = vsel %vm1525_vm1, %v2094_v59, -inf  ;;  %v2287_v46 = vsel %vm1525_vm1, %v2092_v6, -inf  ;;  %v2281_v25 = vrot.slane %v2280_v49, 4 }
 0x63c   :  { %v2244_v52 = vmax.f32 %v2242_v13, %v2243_v27  ;;  %v2251_v47 = vmax.f32 %v2249_v34, %v2250_v63  ;;  %v2322_v19 = vsel %vm1525_vm1, %v6968_v24, -inf  ;;  %v2272_v26 = vmax.f32 %v2270_v43, %v2271_v22 }
 0x63d   :  { %v2309_v15 = vrot.slane %v2308_v28, 4  ;;  %v2288_v58 = vrot.slane %v2287_v46, 4  ;;  %v2279_v9 = vmax.f32 %v2277_v18, %v2278_v3  ;;  %v2329_v51 = vsel %vm1525_vm1, %v2095_v36, -inf }
 0x63e   :  { %v2348_v10 = vmax.f32 %v2230_v57, %v2244_v52  ;;  %v2351_v0 = vmax.f32 %v2237_v50, %v2251_v47  ;;  %v5642_v1 = vpop.eup %5641  ;;  %v2316_v7 = vrot.slane %v2315_v44, 4  ;;  %v2323_v23 = vrot.slane %v2322_v19, 4 }
 0x63f   :  { %v2282_v16 = vmax.f32 %v2280_v49, %v2281_v25  ;;  %v2310_v56 = vmax.f32 %v2308_v28, %v2309_v15  ;;  %v2289_v17 = vmax.f32 %v2287_v46, %v2288_v58  ;;  %v2330_v39 = vrot.slane %v2329_v51, 4 }
 0x640   :  { %v2349_v62 = vmax.f32 %v2348_v10, %v2258_v4  ;;  %v2352_v38 = vmax.f32 %v2351_v0, %v2265_v8  ;;  %v2061_v37 = vmul.f32 %v5642_v1, %v6918_v55  ;;  %v2317_v41 = vmax.f32 %v2315_v44, %v2316_v7 }
 0x641   :  { %v2324_v14 = vmax.f32 %v2322_v19, %v2323_v23  ;;  %v2283_v30 = vrot.slane %v2282_v16, 2  ;;  %v2311_v32 = vrot.slane %v2310_v56, 2  ;;  %v2290_v43 = vrot.slane %v2289_v17, 2 }
 0x642   :  { %v2350_v45 = vmax.f32 %v2349_v62, %v2272_v26  ;;  %v2353_v40 = vmax.f32 %v2352_v38, %v2279_v9  ;;  %v2093_v31 = vcombine.high %v2061_v37, %v2061_v37  ;;  %v2294_v35 = vsel %vm1525_vm1, %v2061_v37, -inf }
 0x643   :  { %v2331_v12 = vmax.f32 %v2329_v51, %v2330_v39  ;;  %v2295_v61 = vrot.slane %v2294_v35, 4  ;;  %v2383_v53 = vpack.c.bf16 %v6945_v54, %v6931_v20  ;;  %v2384_v55 = vpack.c.bf16 %v6938_v2, %v6928_v29  ;;  %v5215_v39 = vld [vmem:[%s7747_s3 + $0x1a0] sm:$0xff]  }
 0x644   :  { %v3585_v5 = vrot.slane %v2353_v40, 7  ;;  %v2301_v11 = vsel %vm1525_vm1, %v2093_v31, -inf  ;;  %v2318_v18 = vrot.slane %v2317_v41, 2  ;;  %v2385_v34 = vpack.c.bf16 %v2061_v37, %v6963_v42  ;;  %v5211_v40 = vld [vmem:[%s7747_s3 + $0x180] sm:$0xff]   ;;  %v5217_v37 = vld [vmem:[%s7747_s3 + $0x1b0] sm:$0xff]  }
 0x645   :  { %v2302_v13 = vrot.slane %v2301_v11, 4  ;;  %v2284_v48 = vmax.f32 %v2282_v16, %v2283_v30  ;;  %v2325_v60 = vrot.slane %v2324_v14, 2  ;;  %v2296_v59 = vmax.f32 %v2294_v35, %v2295_v61  ;;  %5117 = vmatprep.mubr.bf16.mxu0 %v2383_v53  ;;  %5125 = vmatprep.subr.bf16.mxu1 %v5211_v40  ;;  %v5212_v16 = vld [vmem:[%s7747_s3 + $0x188] sm:$0xff]  }
 0x646   :  { %v3586_v21 = vsel %vm3565_vm2, %v3585_v5, %v2350_v45  ;;  %v2386_v22 = vpack.c.bf16 %v6968_v24, %v6960_v33  ;;  %v2291_v27 = vmax.f32 %v2289_v17, %v2290_v43  ;;  %v2332_v63 = vrot.slane %v2331_v12, 2  ;;  %5118 = vmatmul.mubr.bf16.gmra.mrb[40].mxu0 %v2384_v55  ;;  %5126 = vmatpush3.bf16.msra.mxu1 %v5211_v40  ;;  %v5214_v17 = vld [vmem:[%s7747_s3 + $0x198] sm:$0xff]   ;;  %v5216_v5 = vld [vmem:[%s7747_s3 + $0x1a8] sm:$0xff]  }
 0x647   :  { %v2303_v6 = vmax.f32 %v2301_v11, %v2302_v13  ;;  %v2312_v57 = vmax.f32 %v2310_v56, %v2311_v32  ;;  %v2297_v20 = vrot.slane %v2296_v59, 2  ;;  %5121 = vmatprep.mubr.bf16.mxu0 %v2385_v34  ;;  %v2319_v54 = vmax.f32 %v2317_v41, %v2318_v18  ;;  %5127 = vmatprep.subr.bf16.mxu1 %v5212_v16  ;;  %v5213_v56 = vld [vmem:[%s7747_s3 + $0x190] sm:$0xff]   ;;  %v5218_v41 = vld [vmem:[%s7747_s3 + $0x1b8] sm:$0xff]  }
 0x648   :  { %v2285_v2 = vrot.slane %v2284_v48, 1  ;;  %v2326_v50 = vmax.f32 %v2324_v14, %v2325_v60  ;;  %v2292_v42 = vrot.slane %v2291_v27, 1  ;;  %v2333_v49 = vmax.f32 %v2331_v12, %v2332_v63  ;;  %v7026_v14 = vld [vmem:[%s7748_s4 + $0x5] ss:$0 sm:$0xff] }
 0x649   :  { %v2304_v29 = vrot.slane %v2303_v6, 2  ;;  %v2298_v3 = vmax.f32 %v2296_v59, %v2297_v20  ;;  %v2313_v47 = vrot.slane %v2312_v57, 1  ;;  %v2320_v36 = vrot.slane %v2319_v54, 1 }
 0x64a   :  { %v2286_v33 = vmax.f32 %v2284_v48, %v2285_v2  ;;  %v2327_v24 = vrot.slane %v2326_v50, 1  ;;  %v2293_v44 = vmax.f32 %v2291_v27, %v2292_v42  ;;  %v2334_v46 = vrot.slane %v2333_v49, 1  ;;  %5128 = vmatpush3.bf16.msra.mxu1 %v5212_v16 }
 0x64b   :  { %v2305_v52 = vmax.f32 %v2303_v6, %v2304_v29  ;;  %v2299_v28 = vrot.slane %v2298_v3, 1  ;;  %v2314_v0 = vmax.f32 %v2312_v57, %v2313_v47  ;;  %v2321_v19 = vmax.f32 %v2319_v54, %v2320_v36  ;;  %5129 = vmatprep.subr.bf16.mxu1 %v5213_v56 }
 0x64c   :  { %v2328_v15 = vmax.f32 %v2326_v50, %v2327_v24  ;;  %v2335_v1 = vmax.f32 %v2333_v49, %v2334_v46 }
 0x64d   :  { %v2306_v4 = vrot.slane %v2305_v52, 1  ;;  %v2300_v8 = vmax.f32 %v2298_v3, %v2299_v28 }
 0x64e   :  { %5122 = vmatmul.mubr.bf16.gmra.mrb[44].mxu0 %v2386_v22  ;;  %5130 = vmatpush3.bf16.msra.mxu1 %v5213_v56 }
 0x64f   :  { %v2307_v10 = vmax.f32 %v2305_v52, %v2306_v4  ;;  %v2354_v25 = vmax.f32 %v2286_v33, %v2300_v8  ;;  %5131 = vmatprep.subr.bf16.mxu1 %v5214_v17 }
 0x651   :  { %v2357_v26 = vmax.f32 %v2293_v44, %v2307_v10  ;;  %v2355_v58 = vmax.f32 %v2354_v25, %v2314_v0 }
 0x652   :  { %5132 = vmatpush3.bf16.msra.mxu1 %v5214_v17 }
 0x653   :  { %v2358_v9 = vmax.f32 %v2357_v26, %v2321_v19  ;;  %v2356_v62 = vmax.f32 %v2355_v58, %v2328_v15  ;;  %5133 = vmatprep.subr.bf16.mxu1 %v5215_v39 }
 0x655   :  { %v2359_v38 = vmax.f32 %v2358_v9, %v2335_v1  ;;  %v3587_v51 = vrot.slane %v2356_v62, 6 }
 0x656   :  { %5134 = vmatpush3.bf16.msra.mxu1 %v5215_v39 }
 0x657   :  { %v3589_v7 = vrot.slane %v2359_v38, 5  ;;  %v3588_v23 = vsel %vm3568_vm3, %v3587_v51, %v3586_v21  ;;  %5135 = vmatprep.subr.bf16.mxu1 %v5216_v5 }
 0x659   :  { %v3590_v45 = vsel %vm3571_vm4, %v3589_v7, %v3588_v23 }
 0x65a   :  { %3626 = vst [vmem:[%s7755_s11 + $0xc] sm:$0xf] %v3590_v45  ;;  %5136 = vmatpush3.bf16.msra.mxu1 %v5216_v5 }
 0x65b   :  { %5137 = vmatprep.subr.bf16.mxu1 %v5217_v37 }
 0x65e   :  { %5138 = vmatpush3.bf16.msra.mxu1 %v5217_v37 }
 0x65f   :  { %5139 = vmatprep.subr.bf16.mxu1 %v5218_v41 }
 0x662   :  { %5140 = vmatpush3.bf16.msra.mxu1 %v5218_v41 }
 0x6e9   :  { %v5111_v21 = vpop.f32.mrb[32].mxu0 }
 0x6ea   :  { %v2484_v30 = vadd.f32 %v5111_v21, %v7026_v14  ;;  %v2475_v31 = vpop.f32.mrb[33].mxu0 }
 0x6eb   :  { %v2476_v35 = vadd.f32 %v7026_v14, %v2475_v31  ;;  %v5112_v32 = vpop.f32.mrb[34].mxu0 }
 0x6ec   :  { %v4648_v43 = vmul.f32 -1.442695, %v2484_v30  ;;  %v2487_v12 = vadd.f32 %v5112_v32, %v7026_v14  ;;  %v2478_v61 = vpop.f32.mrb[35].mxu0 }
 0x6ed   :  { %v4646_v11 = vmul.f32 -1.442695, %v2476_v35  ;;  %v2479_v53 = vadd.f32 %v7026_v14, %v2478_v61 }
 0x6ee   :  { %5643 = vpow2.f32 %v4648_v43  ;;  %v4649_v55 = vmul.f32 -1.442695, %v2487_v12 }
 0x6ef   :  { %5645 = vpow2.f32 %v4646_v11  ;;  %v4647_v18 = vmul.f32 -1.442695, %v2479_v53 }
 0x6f0   :  { %5647 = vpow2.f32 %v4649_v55 }
 0x6f1   :  { %5649 = vpow2.f32 %v4647_v18  ;;  %v5115_v13 = vpop.f32.mrb[36].mxu0 }
 0x6f2   :  { %v7033_v34 = vadd.f32 %v5115_v13, %v7026_v14  ;;  %v2491_v48 = vpop.f32.mrb[37].mxu0 }
 0x6f3   :  { %v7036_v60 = vadd.f32 %v7026_v14, %v2491_v48  ;;  %v5116_v59 = vpop.f32.mrb[38].mxu0 }
 0x6f4   :  { %v4652_v22 = vmul.f32 -1.442695, %v7033_v34  ;;  %v7040_v27 = vadd.f32 %v5116_v59, %v7026_v14  ;;  %v2494_v63 = vpop.f32.mrb[39].mxu0 }
 0x6f5   :  { %v4650_v6 = vmul.f32 -1.442695, %v7036_v60  ;;  %v7044_v57 = vadd.f32 %v7026_v14, %v2494_v63 }
 0x6f6   :  { %5651 = vpow2.f32 %v4652_v22  ;;  %v4653_v20 = vmul.f32 -1.442695, %v7040_v27 }
 0x6f7   :  { %5653 = vpow2.f32 %v4650_v6  ;;  %v4651_v54 = vmul.f32 -1.442695, %v7044_v57 }
 0x6f8   :  { %v5644_v29 = vpop.eup %5643  ;;  %5655 = vpow2.f32 %v4653_v20 }
 0x6f9   :  { %v5646_v2 = vpop.eup %5645  ;;  %v2588_v50 = vadd.f32 1.0, %v5644_v29  ;;  %5657 = vpow2.f32 %v4651_v54 }
 0x6fa   :  { %v5648_v3 = vpop.eup %5647  ;;  %v2586_v42 = vadd.f32 1.0, %v5646_v2 }
 0x6fb   :  { %v5650_v49 = vpop.eup %5649  ;;  %5659 = vrcp.f32 %v2588_v50  ;;  %v2589_v52 = vadd.f32 1.0, %v5648_v3 }
 0x6fc   :  { %5661 = vrcp.f32 %v2586_v42  ;;  %v2587_v47 = vadd.f32 1.0, %v5650_v49 }
 0x6fd   :  { %5663 = vrcp.f32 %v2589_v52 }
 0x6fe   :  { %5665 = vrcp.f32 %v2587_v47 }
 0x700   :  { %v5652_v28 = vpop.eup %5651 }
 0x701   :  { %v5654_v36 = vpop.eup %5653  ;;  %v2592_v33 = vadd.f32 1.0, %v5652_v28 }
 0x702   :  { %v5656_v4 = vpop.eup %5655  ;;  %v2590_v24 = vadd.f32 1.0, %v5654_v36 }
 0x703   :  { %v5658_v8 = vpop.eup %5657  ;;  %v2593_v44 = vadd.f32 1.0, %v5656_v4  ;;  %5667 = vrcp.f32 %v2592_v33 }
 0x704   :  { %5669 = vrcp.f32 %v2590_v24  ;;  %v2591_v26 = vadd.f32 1.0, %v5658_v8 }
 0x705   :  { %v5660_v46 = vpop.eup %5659  ;;  %5671 = vrcp.f32 %v2593_v44 }
 0x706   :  { %v5662_v10 = vpop.eup %5661  ;;  %v7048_v0 = vmul.f32 %v5660_v46, %v2484_v30  ;;  %5673 = vrcp.f32 %v2591_v26 }
 0x707   :  { %v5664_v25 = vpop.eup %5663  ;;  %v7050_v19 = vmul.f32 %v5662_v10, %v2476_v35 }
 0x708   :  { %v5666_v15 = vpop.eup %5665  ;;  %v2668_v58 = vcombine.high %v7048_v0, %v7048_v0  ;;  %v2726_v1 = vsel %vm1525_vm1, %v7048_v0, -inf  ;;  %v7056_v9 = vmul.f32 %v5664_v25, %v2487_v12 }
 0x709   :  { %v2727_v62 = vrot.slane %v2726_v1, 4  ;;  %v2666_v38 = vcombine.high %v7050_v19, %v7050_v19  ;;  %v2698_v51 = vsel %vm1525_vm1, %v7050_v19, -inf  ;;  %v7062_v7 = vmul.f32 %v5666_v15, %v2479_v53 }
 0x70a   :  { %v2733_v23 = vsel %vm1525_vm1, %v2668_v58, -inf  ;;  %v2699_v45 = vrot.slane %v2698_v51, 4  ;;  %v2669_v40 = vcombine.high %v7056_v9, %v7056_v9  ;;  %v2740_v16 = vsel %vm1525_vm1, %v7056_v9, -inf }
 0x70b   :  { %v2728_v56 = vmax.f32 %v2726_v1, %v2727_v62  ;;  %v2734_v17 = vrot.slane %v2733_v23, 4  ;;  %v2705_v39 = vsel %vm1525_vm1, %v2666_v38, -inf  ;;  %v2741_v5 = vrot.slane %v2740_v16, 4 }
 0x70c   :  { %v2700_v37 = vmax.f32 %v2698_v51, %v2699_v45  ;;  %v2706_v41 = vrot.slane %v2705_v39, 4  ;;  %v2747_v21 = vsel %vm1525_vm1, %v2669_v40, -inf  ;;  %v2966_v30 = vpack.c.bf16 %v7056_v9, %v7048_v0 }
 0x70d   :  { %v2729_v31 = vrot.slane %v2728_v56, 2  ;;  %v2735_v35 = vmax.f32 %v2733_v23, %v2734_v17  ;;  %v2742_v32 = vmax.f32 %v2740_v16, %v2741_v5  ;;  %v2748_v43 = vrot.slane %v2747_v21, 4  ;;  %v5668_v59 = vpop.eup %5667 }
 0x70e   :  { %v2701_v12 = vrot.slane %v2700_v37, 2  ;;  %v2707_v61 = vmax.f32 %v2705_v39, %v2706_v41  ;;  %v2667_v11 = vcombine.high %v7062_v7, %v7062_v7  ;;  %v2712_v53 = vsel %vm1525_vm1, %v7062_v7, -inf  ;;  %v5670_v54 = vpop.eup %5669 }
 0x70f   :  { %v2730_v55 = vmax.f32 %v2728_v56, %v2729_v31  ;;  %v2736_v18 = vrot.slane %v2735_v35, 2  ;;  %v2743_v13 = vrot.slane %v2742_v32, 2  ;;  %v2749_v48 = vmax.f32 %v2747_v21, %v2748_v43  ;;  %v5672_v42 = vpop.eup %5671 }
 0x710   :  { %v2702_v22 = vmax.f32 %v2700_v37, %v2701_v12  ;;  %v2708_v63 = vrot.slane %v2707_v61, 2  ;;  %v2713_v6 = vrot.slane %v2712_v53, 4  ;;  %v2719_v20 = vsel %vm1525_vm1, %v2667_v11, -inf }
 0x711   :  { %v2731_v29 = vrot.slane %v2730_v55, 1  ;;  %v2737_v2 = vmax.f32 %v2735_v35, %v2736_v18  ;;  %v2744_v50 = vmax.f32 %v2742_v32, %v2743_v13  ;;  %v2750_v3 = vrot.slane %v2749_v48, 2  ;;  %v5674_v13 = vpop.eup %5673 }
 0x712   :  { %v2703_v49 = vrot.slane %v2702_v22, 1  ;;  %v2709_v52 = vmax.f32 %v2707_v61, %v2708_v63  ;;  %v2714_v47 = vmax.f32 %v2712_v53, %v2713_v6  ;;  %v2720_v28 = vrot.slane %v2719_v20, 4 }
 0x713   :  { %v2751_v36 = vmax.f32 %v2749_v48, %v2750_v3  ;;  %v2732_v4 = vmax.f32 %v2730_v55, %v2731_v29  ;;  %v2738_v8 = vrot.slane %v2737_v2, 1  ;;  %v2745_v46 = vrot.slane %v2744_v50, 1 }
 0x714   :  { %v2715_v33 = vrot.slane %v2714_v47, 2  ;;  %v2721_v24 = vmax.f32 %v2719_v20, %v2720_v28  ;;  %v2704_v44 = vmax.f32 %v2702_v22, %v2703_v49  ;;  %v7079_v10 = vmul.f32 %v5668_v59, %v7033_v34 }
 0x715   :  { %v2710_v25 = vrot.slane %v2709_v52, 1  ;;  %v7082_v1 = vmul.f32 %v5670_v54, %v7036_v60  ;;  %v2752_v62 = vrot.slane %v2751_v36, 1  ;;  %v7089_v26 = vmul.f32 %v5672_v42, %v7040_v27 }
 0x716   :  { %v2716_v15 = vmax.f32 %v2714_v47, %v2715_v33  ;;  %v2722_v58 = vrot.slane %v2721_v24, 2  ;;  %v2672_v38 = vcombine.high %v7079_v10, %v7079_v10  ;;  %v2782_v51 = vsel %vm1525_vm1, %v7079_v10, -inf }
 0x717   :  { %v2783_v34 = vrot.slane %v2782_v51, 4  ;;  %v2670_v40 = vcombine.high %v7082_v1, %v7082_v1  ;;  %v2754_v60 = vsel %vm1525_vm1, %v7082_v1, -inf  ;;  %v2673_v56 = vcombine.high %v7089_v26, %v7089_v26 }
 0x718   :  { %v2717_v23 = vrot.slane %v2716_v15, 1  ;;  %v2723_v45 = vmax.f32 %v2721_v24, %v2722_v58  ;;  %v2789_v16 = vsel %vm1525_vm1, %v2672_v38, -inf  ;;  %v2796_v17 = vsel %vm1525_vm1, %v7089_v26, -inf }
 0x719   :  { %v2711_v39 = vmax.f32 %v2709_v52, %v2710_v25  ;;  %v2790_v37 = vrot.slane %v2789_v16, 4  ;;  %v2755_v41 = vrot.slane %v2754_v60, 4  ;;  %v2761_v21 = vsel %vm1525_vm1, %v2670_v40, -inf  ;;  %v5119_v6 = vpop.f32.mrb[40].mxu0 }
 0x71a   :  { %v2718_v27 = vmax.f32 %v2716_v15, %v2717_v23  ;;  %v2724_v5 = vrot.slane %v2723_v45, 1  ;;  %v2797_v31 = vrot.slane %v2796_v17, 4  ;;  %v2803_v35 = vsel %vm1525_vm1, %v2673_v56, -inf  ;;  %v2507_v29 = vpop.f32.mrb[41].mxu0 }
 0x71b   :  { %v2784_v12 = vmax.f32 %v2782_v51, %v2783_v34  ;;  %v2791_v61 = vmax.f32 %v2789_v16, %v2790_v37  ;;  %v2756_v11 = vmax.f32 %v2754_v60, %v2755_v41  ;;  %v2762_v53 = vrot.slane %v2761_v21, 4  ;;  %v5120_v52 = vpop.f32.mrb[42].mxu0 }
 0x71c   :  { %v2725_v32 = vmax.f32 %v2723_v45, %v2724_v5  ;;  %v2922_v43 = vmax.f32 %v2704_v44, %v2718_v27  ;;  %v2798_v55 = vmax.f32 %v2796_v17, %v2797_v31  ;;  %v2804_v18 = vrot.slane %v2803_v35, 4  ;;  %v2510_v44 = vpop.f32.mrb[43].mxu0 }
 0x71d   :  { %v2739_v48 = vmax.f32 %v2737_v2, %v2738_v8  ;;  %v2746_v59 = vmax.f32 %v2744_v50, %v2745_v46  ;;  %v2757_v20 = vrot.slane %v2756_v11, 2  ;;  %v2763_v54 = vmax.f32 %v2761_v21, %v2762_v53 }
 0x71e   :  { %v2923_v22 = vmax.f32 %v2922_v43, %v2732_v4  ;;  %v2925_v63 = vmax.f32 %v2711_v39, %v2725_v32  ;;  %v2753_v3 = vmax.f32 %v2751_v36, %v2752_v62  ;;  %v2785_v47 = vrot.slane %v2784_v12, 2 }
 0x71f   :  { %v2792_v28 = vrot.slane %v2791_v61, 2  ;;  %v2799_v33 = vrot.slane %v2798_v55, 2  ;;  %v2805_v24 = vmax.f32 %v2803_v35, %v2804_v18  ;;  %v2639_v15 = vmul.f32 %v5674_v13, %v7044_v57 }
 0x720   :  { %v2924_v42 = vmax.f32 %v2923_v22, %v2746_v59  ;;  %v2926_v49 = vmax.f32 %v2925_v63, %v2739_v48  ;;  %v2758_v2 = vmax.f32 %v2756_v11, %v2757_v20  ;;  %v2764_v50 = vrot.slane %v2763_v54, 2 }
 0x721   :  { %v2671_v8 = vcombine.high %v2639_v15, %v2639_v15  ;;  %v2768_v46 = vsel %vm1525_vm1, %v2639_v15, -inf  ;;  %v2786_v58 = vmax.f32 %v2784_v12, %v2785_v47  ;;  %v2793_v38 = vmax.f32 %v2791_v61, %v2792_v28  ;;  %v5123_v57 = vpop.f32.mrb[44].mxu0 }
 0x722   :  { %v2927_v25 = vmax.f32 %v2926_v49, %v2753_v3  ;;  %v2800_v36 = vmax.f32 %v2798_v55, %v2799_v33  ;;  %v2806_v62 = vrot.slane %v2805_v24, 2  ;;  %v2769_v23 = vrot.slane %v2768_v46, 4  ;;  %v2523_v17 = vpop.f32.mrb[45].mxu0 }
 0x723   :  { %v2775_v45 = vsel %vm1525_vm1, %v2671_v8, -inf  ;;  %v7109_v34 = vadd.f32 %v5119_v6, %v7026_v14  ;;  %v2759_v40 = vrot.slane %v2758_v2, 1  ;;  %v2765_v16 = vmax.f32 %v2763_v54, %v2764_v50  ;;  %v5124_v41 = vpop.f32.mrb[46].mxu0 }
 0x724   :  { %v3591_v4 = vrot.slane %v2927_v25, 7  ;;  %v2776_v60 = vrot.slane %v2775_v45, 4  ;;  %v7112_v56 = vadd.f32 %v7026_v14, %v2507_v29  ;;  %v2770_v39 = vmax.f32 %v2768_v46, %v2769_v23  ;;  %v2526_v43 = vpop.f32.mrb[47].mxu0 }
 0x725   :  { %v4656_v27 = vmul.f32 -1.442695, %v7109_v34  ;;  %v7116_v5 = vadd.f32 %v5120_v52, %v7026_v14  ;;  %v7119_v37 = vadd.f32 %v7026_v14, %v2510_v44  ;;  %v7123_v35 = vadd.f32 %v5123_v57, %v7026_v14 }
 0x726   :  { %v7105_v51 = vsel %vm3565_vm2, %v3591_v4, %v2924_v42  ;;  %v2777_v21 = vmax.f32 %v2775_v45, %v2776_v60  ;;  %v4654_v31 = vmul.f32 -1.442695, %v7112_v56  ;;  %v7126_v32 = vadd.f32 %v7026_v14, %v2523_v17 }
 0x727   :  { %v2771_v12 = vrot.slane %v2770_v39, 2  ;;  %5675 = vpow2.f32 %v4656_v27  ;;  %v4657_v61 = vmul.f32 -1.442695, %v7116_v5  ;;  %v4655_v11 = vmul.f32 -1.442695, %v7119_v37 }
 0x728   :  { %v2766_v53 = vrot.slane %v2765_v16, 1  ;;  %v2807_v55 = vmax.f32 %v2805_v24, %v2806_v62  ;;  %v2778_v18 = vrot.slane %v2777_v21, 2  ;;  %5677 = vpow2.f32 %v4654_v31 }
 0x729   :  { %v2772_v13 = vmax.f32 %v2770_v39, %v2771_v12  ;;  %5679 = vpow2.f32 %v4657_v61  ;;  %v4660_v48 = vmul.f32 -1.442695, %v7123_v35  ;;  %v7132_v59 = vadd.f32 %v5124_v41, %v7026_v14 }
 0x72a   :  { %v2779_v22 = vmax.f32 %v2777_v21, %v2778_v18  ;;  %5681 = vpow2.f32 %v4655_v11  ;;  %v2965_v63 = vpack.c.bf16 %v7062_v7, %v7050_v19  ;;  %v2967_v6 = vpack.c.bf16 %v2639_v15, %v7082_v1 }
 0x72b   :  { %v2787_v20 = vrot.slane %v2786_v58, 1  ;;  %v2773_v54 = vrot.slane %v2772_v13, 1  ;;  %v4658_v29 = vmul.f32 -1.442695, %v7126_v32  ;;  %v2794_v3 = vrot.slane %v2793_v38, 1 }
 0x72c   :  { %v2780_v42 = vrot.slane %v2779_v22, 1  ;;  %v4661_v49 = vmul.f32 -1.442695, %v7132_v59  ;;  %5141 = vmatprep.mubr.bf16.mxu1 %v2965_v63  ;;  %v2968_v52 = vpack.c.bf16 %v7089_v26, %v7079_v10  ;;  %v2760_v47 = vmax.f32 %v2758_v2, %v2759_v40 }
 0x72d   :  { %v2801_v28 = vrot.slane %v2800_v36, 1  ;;  %v2774_v33 = vmax.f32 %v2772_v13, %v2773_v54  ;;  %5142 = vmatmul.mubr.bf16.vlgmr.msra.gmra.mrb[64].mxu1 %v2966_v30  ;;  %v2767_v19 = vmax.f32 %v2765_v16, %v2766_v53  ;;  %v2808_v7 = vrot.slane %v2807_v55, 1 }
 0x72e   :  { %v2781_v1 = vmax.f32 %v2779_v22, %v2780_v42  ;;  %5683 = vpow2.f32 %v4660_v48  ;;  %5145 = vmatprep.mubr.bf16.mxu1 %v2967_v6  ;;  %v2788_v24 = vmax.f32 %v2786_v58, %v2787_v20  ;;  %v2795_v25 = vmax.f32 %v2793_v38, %v2794_v3 }
 0x72f   :  { %v2928_v44 = vmax.f32 %v2760_v47, %v2774_v33  ;;  %5685 = vpow2.f32 %v4658_v29  ;;  %v2802_v10 = vmax.f32 %v2800_v36, %v2801_v28  ;;  %v2809_v4 = vmax.f32 %v2807_v55, %v2808_v7 }
 0x730   :  { %v2931_v15 = vmax.f32 %v2767_v19, %v2781_v1  ;;  %5687 = vpow2.f32 %v4661_v49  ;;  %v7145_v62 = vadd.f32 %v7026_v14, %v2526_v43 }
 0x731   :  { %v5676_v50 = vpop.eup %5675  ;;  %v2929_v26 = vmax.f32 %v2928_v44, %v2788_v24 }
 0x732   :  { %v5678_v2 = vpop.eup %5677  ;;  %v2932_v8 = vmax.f32 %v2931_v15, %v2795_v25  ;;  %v2596_v46 = vadd.f32 1.0, %v5676_v50  ;;  %v4659_v16 = vmul.f32 -1.442695, %v7145_v62 }
 0x733   :  { %v5680_v0 = vpop.eup %5679  ;;  %v2930_v9 = vmax.f32 %v2929_v26, %v2802_v10  ;;  %v2594_v30 = vadd.f32 1.0, %v5678_v2 }
 0x734   :  { %v5682_v23 = vpop.eup %5681  ;;  %v2933_v58 = vmax.f32 %v2932_v8, %v2809_v4  ;;  %5689 = vrcp.f32 %v2596_v46  ;;  %v2597_v45 = vadd.f32 1.0, %v5680_v0 }
 0x735   :  { %v3593_v38 = vrot.slane %v2930_v9, 6  ;;  %5691 = vrcp.f32 %v2594_v30  ;;  %v2595_v57 = vadd.f32 1.0, %v5682_v23  ;;  %5146 = vmatmul.mubr.bf16.gmra.mrb[68].mxu1 %v2968_v52 }
 0x736   :  { %v3595_v36 = vrot.slane %v2933_v58, 5  ;;  %5693 = vrcp.f32 %v2597_v45 }
 0x737   :  { %v3594_v40 = vsel %vm3568_vm3, %v3593_v38, %v7105_v51  ;;  %5695 = vrcp.f32 %v2595_v57 }
 0x738   :  { %v5684_v60 = vpop.eup %5683  ;;  %v3596_v14 = vsel %vm3571_vm4, %v3595_v36, %v3594_v40  ;;  %5697 = vpow2.f32 %v4659_v16 }
 0x739   :  { %v5686_v17 = vpop.eup %5685  ;;  %3627 = vst [vmem:[%s7755_s11 + $0x10] sm:$0xf] %v3596_v14  ;;  %v2600_v27 = vadd.f32 1.0, %v5684_v60 }
 0x73a   :  { %v5688_v39 = vpop.eup %5687  ;;  %v2598_v41 = vadd.f32 1.0, %v5686_v17 }
 0x73b   :  { %v2601_v21 = vadd.f32 1.0, %v5688_v39  ;;  %5699 = vrcp.f32 %v2600_v27 }
 0x73c   :  { %5701 = vrcp.f32 %v2598_v41 }
 0x73d   :  { %5703 = vrcp.f32 %v2601_v21 }
 0x73e   :  { %v5690_v31 = vpop.eup %5689 }
 0x73f   :  { %v5692_v43 = vpop.eup %5691  ;;  %v7155_v51 = vmul.f32 %v5690_v31, %v7109_v34 }
 0x740   :  { %v5694_v12 = vpop.eup %5693  ;;  %v7158_v61 = vmul.f32 %v5692_v43, %v7112_v56 }
 0x741   :  { %v5696_v11 = vpop.eup %5695  ;;  %v2676_v53 = vcombine.high %v7155_v51, %v7155_v51  ;;  %v2838_v55 = vsel %vm1525_vm1, %v7155_v51, -inf  ;;  %v7165_v18 = vmul.f32 %v5694_v12, %v7116_v5 }
 0x742   :  { %v2839_v13 = vrot.slane %v2838_v55, 4  ;;  %v2674_v34 = vcombine.high %v7158_v61, %v7158_v61  ;;  %v2810_v56 = vsel %vm1525_vm1, %v7158_v61, -inf  ;;  %v7172_v48 = vmul.f32 %v5696_v11, %v7119_v37  ;;  %v5698_v42 = vpop.eup %5697 }
 0x743   :  { %v2845_v22 = vsel %vm1525_vm1, %v2676_v53, -inf  ;;  %v2811_v63 = vrot.slane %v2810_v56, 4  ;;  %v2677_v6 = vcombine.high %v7165_v18, %v7165_v18  ;;  %v2852_v5 = vsel %vm1525_vm1, %v7165_v18, -inf }
 0x744   :  { %v2840_v20 = vmax.f32 %v2838_v55, %v2839_v13  ;;  %v2846_v54 = vrot.slane %v2845_v22, 4  ;;  %v2817_v29 = vsel %vm1525_vm1, %v2674_v34, -inf  ;;  %v2853_v3 = vrot.slane %v2852_v5, 4 }
 0x745   :  { %v2812_v49 = vmax.f32 %v2810_v56, %v2811_v63  ;;  %v2818_v52 = vrot.slane %v2817_v29, 4  ;;  %v2859_v37 = vsel %vm1525_vm1, %v2677_v6, -inf  ;;  %v2675_v47 = vcombine.high %v7172_v48, %v7172_v48  ;;  %v5700_v26 = vpop.eup %5699 }
 0x746   :  { %v2847_v28 = vmax.f32 %v2845_v22, %v2846_v54  ;;  %v2854_v33 = vmax.f32 %v2852_v5, %v2853_v3  ;;  %v2860_v19 = vrot.slane %v2859_v37, 4  ;;  %v2824_v24 = vsel %vm1525_vm1, %v7172_v48, -inf  ;;  %v5702_v0 = vpop.eup %5701 }
 0x747   :  { %v2813_v7 = vrot.slane %v2812_v49, 2  ;;  %v2819_v1 = vmax.f32 %v2817_v29, %v2818_v52  ;;  %v2831_v44 = vsel %vm1525_vm1, %v2675_v47, -inf  ;;  %v2841_v25 = vrot.slane %v2840_v20, 2  ;;  %v5704_v23 = vpop.eup %5703 }
 0x748   :  { %v2848_v15 = vrot.slane %v2847_v28, 2  ;;  %v2861_v50 = vmax.f32 %v2859_v37, %v2860_v19  ;;  %v2599_v10 = vadd.f32 1.0, %v5698_v42  ;;  %v2855_v4 = vrot.slane %v2854_v33, 2 }
 0x749   :  { %v2820_v2 = vrot.slane %v2819_v1, 2  ;;  %v2825_v8 = vrot.slane %v2824_v24, 4  ;;  %v2832_v46 = vrot.slane %v2831_v44, 4  ;;  %v2814_v9 = vmax.f32 %v2812_v49, %v2813_v7 }
 0x74a   :  { %v2862_v30 = vrot.slane %v2861_v50, 2  ;;  %v2842_v57 = vmax.f32 %v2840_v20, %v2841_v25  ;;  %v2849_v36 = vmax.f32 %v2847_v28, %v2848_v15  ;;  %v2856_v40 = vmax.f32 %v2854_v33, %v2855_v4 }
 0x74b   :  { %v2821_v58 = vmax.f32 %v2819_v1, %v2820_v2  ;;  %v2826_v45 = vmax.f32 %v2824_v24, %v2825_v8  ;;  %v2833_v38 = vmax.f32 %v2831_v44, %v2832_v46  ;;  %5705 = vrcp.f32 %v2599_v10 }
 0x74c   :  { %v2815_v14 = vrot.slane %v2814_v9, 1  ;;  %v2863_v39 = vmax.f32 %v2861_v50, %v2862_v30  ;;  %v7187_v27 = vmul.f32 %v5700_v26, %v7123_v35  ;;  %v7190_v31 = vmul.f32 %v5702_v0, %v7126_v32 }
 0x74d   :  { %v2827_v16 = vrot.slane %v2826_v45, 2  ;;  %v2834_v60 = vrot.slane %v2833_v38, 2  ;;  %v2822_v17 = vrot.slane %v2821_v58, 1  ;;  %v2843_v43 = vrot.slane %v2842_v57, 1 }
 0x74e   :  { %v2850_v12 = vrot.slane %v2849_v36, 1  ;;  %v2680_v11 = vcombine.high %v7187_v27, %v7187_v27  ;;  %v7195_v53 = vmul.f32 %v5704_v23, %v7132_v59  ;;  %v2857_v55 = vrot.slane %v2856_v40, 1 }
 0x74f   :  { %v2828_v41 = vmax.f32 %v2826_v45, %v2827_v16  ;;  %v2835_v21 = vmax.f32 %v2833_v38, %v2834_v60  ;;  %v2678_v35 = vcombine.high %v7190_v31, %v7190_v31  ;;  %v2816_v56 = vmax.f32 %v2814_v9, %v2815_v14 }
 0x750   :  { %v2823_v22 = vmax.f32 %v2821_v58, %v2822_v17  ;;  %v2864_v63 = vrot.slane %v2863_v39, 1  ;;  %v2866_v32 = vsel %vm1525_vm1, %v7190_v31, -inf  ;;  %v2894_v20 = vsel %vm1525_vm1, %v7187_v27, -inf }
 0x751   :  { %v2829_v13 = vrot.slane %v2828_v41, 1  ;;  %v2836_v34 = vrot.slane %v2835_v21, 1  ;;  %v2681_v59 = vcombine.high %v7195_v53, %v7195_v53  ;;  %v2844_v54 = vmax.f32 %v2842_v57, %v2843_v43 }
 0x752   :  { %v2851_v29 = vmax.f32 %v2849_v36, %v2850_v12  ;;  %v2901_v3 = vsel %vm1525_vm1, %v2680_v11, -inf  ;;  %v2873_v42 = vsel %vm1525_vm1, %v2678_v35, -inf  ;;  %v2867_v37 = vrot.slane %v2866_v32, 4 }
 0x753   :  { %v2830_v6 = vmax.f32 %v2828_v41, %v2829_v13  ;;  %v2837_v5 = vmax.f32 %v2835_v21, %v2836_v34  ;;  %v2908_v47 = vsel %vm1525_vm1, %v7195_v53, -inf  ;;  %v2858_v28 = vmax.f32 %v2856_v40, %v2857_v55 }
 0x754   :  { %v2895_v33 = vrot.slane %v2894_v20, 4  ;;  %v2874_v19 = vrot.slane %v2873_v42, 4  ;;  %v2865_v1 = vmax.f32 %v2863_v39, %v2864_v63  ;;  %v2915_v25 = vsel %vm1525_vm1, %v2681_v59, -inf }
 0x755   :  { %v2934_v49 = vmax.f32 %v2816_v56, %v2830_v6  ;;  %v2937_v52 = vmax.f32 %v2823_v22, %v2837_v5  ;;  %v5706_v7 = vpop.eup %5705  ;;  %v2902_v15 = vrot.slane %v2901_v3, 4  ;;  %v2909_v50 = vrot.slane %v2908_v47, 4 }
 0x756   :  { %v2868_v2 = vmax.f32 %v2866_v32, %v2867_v37  ;;  %v2896_v4 = vmax.f32 %v2894_v20, %v2895_v33  ;;  %v2875_v8 = vmax.f32 %v2873_v42, %v2874_v19  ;;  %v2916_v46 = vrot.slane %v2915_v25, 4 }
 0x757   :  { %v2935_v24 = vmax.f32 %v2934_v49, %v2844_v54  ;;  %v2938_v44 = vmax.f32 %v2937_v52, %v2851_v29  ;;  %v2647_v9 = vmul.f32 %v5706_v7, %v7145_v62  ;;  %v2903_v30 = vmax.f32 %v2901_v3, %v2902_v15 }
 0x758   :  { %v2910_v23 = vmax.f32 %v2908_v47, %v2909_v50  ;;  %v2869_v45 = vrot.slane %v2868_v2, 2  ;;  %v2897_v36 = vrot.slane %v2896_v4, 2  ;;  %v2876_v40 = vrot.slane %v2875_v8, 2 }
 0x759   :  { %v2936_v10 = vmax.f32 %v2935_v24, %v2858_v28  ;;  %v2939_v26 = vmax.f32 %v2938_v44, %v2865_v1  ;;  %v2679_v38 = vcombine.high %v2647_v9, %v2647_v9  ;;  %v2880_v57 = vsel %vm1525_vm1, %v2647_v9, -inf }
 0x75a   :  { %v2917_v16 = vmax.f32 %v2915_v25, %v2916_v46  ;;  %v2881_v60 = vrot.slane %v2880_v57, 4  ;;  %v2969_v17 = vpack.c.bf16 %v7172_v48, %v7158_v61  ;;  %v2970_v62 = vpack.c.bf16 %v7165_v18, %v7155_v51  ;;  %v5227_v46 = vld [vmem:[%s7749_s5 + $0x24] ss:$8 sps:$4 sm:$0xff]  }
 0x75b   :  { %v3597_v0 = vrot.slane %v2939_v26, 7  ;;  %v2887_v14 = vsel %vm1525_vm1, %v2679_v38, -inf  ;;  %v2904_v39 = vrot.slane %v2903_v30, 2  ;;  %v2971_v21 = vpack.c.bf16 %v2647_v9, %v7190_v31  ;;  %v5221_v26 = vld [vmem:[%s7749_s5 + $0x4] ss:$8 sps:$4 sm:$0xff]  }
 0x75c   :  { %v2888_v41 = vrot.slane %v2887_v14, 4  ;;  %v2870_v43 = vmax.f32 %v2868_v2, %v2869_v45  ;;  %v2911_v12 = vrot.slane %v2910_v23, 2  ;;  %v2882_v11 = vmax.f32 %v2880_v57, %v2881_v60  ;;  %5149 = vmatprep.mubr.bf16.mxu1 %v2969_v17  ;;  %v5219_v2 = vld [vmem:[%s7749_s5] ss:$8 sps:$4 sm:$0xff]   ;;  %3747 = vmatprep.subr.bf16.mxu0 %v5221_v26  ;;  %v5230_v9 = vld [vmem:[%s7749_s5 + $0x34] ss:$8 sps:$4 sm:$0xff]  }
 0x75d   :  { %v3598_v58 = vsel %vm3565_vm2, %v3597_v0, %v2936_v10  ;;  %v2972_v55 = vpack.c.bf16 %v7195_v53, %v7187_v27  ;;  %v2877_v13 = vmax.f32 %v2875_v8, %v2876_v40  ;;  %v2918_v34 = vrot.slane %v2917_v16, 2  ;;  %5150 = vmatmul.mubr.bf16.gmra.mrb[72].mxu1 %v2970_v62  ;;  %3748 = vmatpush1.bf16.msra.mxu0 %v5219_v2  ;;  %v5222_v8 = vld [vmem:[%s7749_s5 + $0x10] ss:$8 sps:$4 sm:$0xff]   ;;  %v5225_v0 = vld [vmem:[%s7749_s5 + $0x20] ss:$8 sps:$4 sm:$0xff]  }
 0x75e   :  { %v2889_v35 = vmax.f32 %v2887_v14, %v2888_v41  ;;  %v2898_v56 = vmax.f32 %v2896_v4, %v2897_v36  ;;  %v2883_v61 = vrot.slane %v2882_v11, 2  ;;  %5153 = vmatprep.mubr.bf16.mxu1 %v2971_v21  ;;  %v2905_v48 = vmax.f32 %v2903_v30, %v2904_v39  ;;  %v5224_v4 = vld [vmem:[%s7749_s5 + $0x14] ss:$8 sps:$4 sm:$0xff]   ;;  %v5228_v30 = vld [vmem:[%s7749_s5 + $0x30] ss:$8 sps:$4 sm:$0xff]  }
 0x75f   :  { %v2871_v18 = vrot.slane %v2870_v43, 1  ;;  %v2912_v22 = vmax.f32 %v2910_v23, %v2911_v12  ;;  %v2878_v31 = vrot.slane %v2877_v13, 1  ;;  %v2919_v32 = vmax.f32 %v2917_v16, %v2918_v34  ;;  %3749 = vmatprep.subr.bf16.mxu0 %v5224_v4  ;;  %v5233_v23 = vld [vmem:[%s7749_s5 + $0x44] ss:$8 sps:$4 sm:$0xff]   ;;  %v5236_v45 = vld [vmem:[%s7749_s5 + $0x54] ss:$8 sps:$4 sm:$0xff]  }
 0x760   :  { %v2890_v51 = vrot.slane %v2889_v35, 2  ;;  %v2884_v63 = vmax.f32 %v2882_v11, %v2883_v61  ;;  %v2899_v5 = vrot.slane %v2898_v56, 1  ;;  %v2906_v59 = vrot.slane %v2905_v48, 1  ;;  %v5234_v38 = vld [vmem:[%s7749_s5 + $0x50] ss:$8 sps:$4 sm:$0xff]  }
 0x761   :  { %v2872_v27 = vmax.f32 %v2870_v43, %v2871_v18  ;;  %v2913_v53 = vrot.slane %v2912_v22, 1  ;;  %v2879_v3 = vmax.f32 %v2877_v13, %v2878_v31  ;;  %v2920_v42 = vrot.slane %v2919_v32, 1  ;;  %3750 = vmatpush1.bf16.msra.mxu0 %v5222_v8  ;;  %v5239_v57 = vld [vmem:[%s7749_s5 + $0x64] ss:$8 sps:$4 sm:$0xff]   ;;  %v5237_v36 = vld [vmem:[%s7749_s5 + $0x60] ss:$8 sps:$4 sm:$0xff]  }
 0x762   :  { %v2891_v6 = vmax.f32 %v2889_v35, %v2890_v51  ;;  %v2885_v20 = vrot.slane %v2884_v63, 1  ;;  %v2900_v52 = vmax.f32 %v2898_v56, %v2899_v5  ;;  %v2907_v47 = vmax.f32 %v2905_v48, %v2906_v59  ;;  %3751 = vmatprep.subr.bf16.mxu0 %v5227_v46  ;;  %v5242_v40 = vld [vmem:[%s7749_s5 + $0x74] ss:$8 sps:$4 sm:$0xff]   ;;  %v5240_v16 = vld [vmem:[%s7749_s5 + $0x70] ss:$8 sps:$4 sm:$0xff]  }
 0x763   :  { %v2914_v33 = vmax.f32 %v2912_v22, %v2913_v53  ;;  %v2921_v7 = vmax.f32 %v2919_v32, %v2920_v42  ;;  %v5947_v60 = vmov 0   ;;  %v7278_v14 = vld [vmem:[%s7748_s4 + $0x6] ss:$0 sm:$0xff] }
 0x764   :  { %v2892_v54 = vrot.slane %v2891_v6, 1  ;;  %v2886_v29 = vmax.f32 %v2884_v63, %v2885_v20  ;;  %3779 = vmatprep.mubr.bf16.mxu0 %v5947_v60 }
 0x765   :  { %5154 = vmatmul.mubr.bf16.gmra.mrb[76].mxu1 %v2972_v55  ;;  %3752 = vmatpush1.bf16.msra.mxu0 %v5225_v0 }
 0x766   :  { %v2893_v49 = vmax.f32 %v2891_v6, %v2892_v54  ;;  %v2940_v37 = vmax.f32 %v2872_v27, %v2886_v29  ;;  %3753 = vmatprep.subr.bf16.mxu0 %v5230_v9 }
 0x768   :  { %v2943_v28 = vmax.f32 %v2879_v3, %v2893_v49  ;;  %v2941_v19 = vmax.f32 %v2940_v37, %v2900_v52 }
 0x769   :  { %3754 = vmatpush1.bf16.msra.mxu0 %v5228_v30 }
 0x76a   :  { %v2944_v1 = vmax.f32 %v2943_v28, %v2907_v47  ;;  %v2942_v24 = vmax.f32 %v2941_v19, %v2914_v33  ;;  %3755 = vmatprep.subr.bf16.mxu0 %v5233_v23 }
 0x76c   :  { %v2945_v44 = vmax.f32 %v2944_v1, %v2921_v7  ;;  %v3599_v25 = vrot.slane %v2942_v24, 6 }
 0x76e   :  { %v3601_v15 = vrot.slane %v2945_v44, 5  ;;  %v3600_v50 = vsel %vm3568_vm3, %v3599_v25, %v3598_v58  ;;  %v5231_v58 = vld [vmem:[%s7749_s5 + $0x40] ss:$8 sps:$4 sm:$0xff]  }
 0x76f   :  { %3756 = vmatpush1.bf16.msra.mxu0 %v5231_v58 }
 0x770   :  { %v3602_v10 = vsel %vm3571_vm4, %v3601_v15, %v3600_v50  ;;  %3757 = vmatprep.subr.bf16.mxu0 %v5236_v45 }
 0x771   :  { %3628 = vst [vmem:[%s7755_s11 + $0x14] sm:$0xf] %v3602_v10 }
 0x773   :  { %3758 = vmatpush1.bf16.msra.mxu0 %v5234_v38 }
 0x774   :  { %3759 = vmatprep.subr.bf16.mxu0 %v5239_v57 }
 0x777   :  { %3760 = vmatpush1.bf16.msra.mxu0 %v5237_v36 }
 0x778   :  { %3761 = vmatprep.subr.bf16.mxu0 %v5242_v40 }
 0x77b   :  { %3762 = vmatpush1.bf16.msra.mxu0 %v5240_v16 }
 0x800   :  { %v5143_v17 = vpop.f32.mrb[64].mxu1 }
 0x801   :  { %v3070_v62 = vadd.f32 %v5143_v17, %v7278_v14  ;;  %v3061_v39 = vpop.f32.mrb[65].mxu1 }
 0x802   :  { %v3062_v41 = vadd.f32 %v7278_v14, %v3061_v39  ;;  %v5144_v21 = vpop.f32.mrb[66].mxu1 }
 0x803   :  { %v4690_v43 = vmul.f32 -1.442695, %v3070_v62  ;;  %v3073_v12 = vadd.f32 %v5144_v21, %v7278_v14  ;;  %v3064_v11 = vpop.f32.mrb[67].mxu1 }
 0x804   :  { %v4688_v55 = vmul.f32 -1.442695, %v3062_v41  ;;  %v3065_v13 = vadd.f32 %v7278_v14, %v3064_v11 }
 0x805   :  { %5707 = vpow2.f32 %v4690_v43  ;;  %v4691_v34 = vmul.f32 -1.442695, %v3073_v12 }
 0x806   :  { %5709 = vpow2.f32 %v4688_v55  ;;  %v4689_v35 = vmul.f32 -1.442695, %v3065_v13 }
 0x807   :  { %5711 = vpow2.f32 %v4691_v34 }
 0x808   :  { %5713 = vpow2.f32 %v4689_v35  ;;  %v5147_v56 = vpop.f32.mrb[68].mxu1 }
 0x809   :  { %v7285_v61 = vadd.f32 %v5147_v56, %v7278_v14  ;;  %v3077_v48 = vpop.f32.mrb[69].mxu1 }
 0x80a   :  { %v7288_v51 = vadd.f32 %v7278_v14, %v3077_v48  ;;  %v5148_v18 = vpop.f32.mrb[70].mxu1 }
 0x80b   :  { %v4694_v22 = vmul.f32 -1.442695, %v7285_v61  ;;  %v7292_v63 = vadd.f32 %v5148_v18, %v7278_v14  ;;  %v3080_v31 = vpop.f32.mrb[71].mxu1 }
 0x80c   :  { %v4692_v32 = vmul.f32 -1.442695, %v7288_v51  ;;  %v7296_v6 = vadd.f32 %v7278_v14, %v3080_v31 }
 0x80d   :  { %5715 = vpow2.f32 %v4694_v22  ;;  %v4695_v5 = vmul.f32 -1.442695, %v7292_v63 }
 0x80e   :  { %5717 = vpow2.f32 %v4692_v32  ;;  %v4693_v20 = vmul.f32 -1.442695, %v7296_v6 }
 0x80f   :  { %v5708_v59 = vpop.eup %5707  ;;  %5719 = vpow2.f32 %v4695_v5 }
 0x810   :  { %v5710_v54 = vpop.eup %5709  ;;  %v3174_v27 = vadd.f32 1.0, %v5708_v59  ;;  %5721 = vpow2.f32 %v4693_v20 }
 0x811   :  { %v5712_v53 = vpop.eup %5711  ;;  %v3172_v29 = vadd.f32 1.0, %v5710_v54 }
 0x812   :  { %v5714_v3 = vpop.eup %5713  ;;  %5723 = vrcp.f32 %v3174_v27  ;;  %v3175_v42 = vadd.f32 1.0, %v5712_v53 }
 0x813   :  { %5725 = vrcp.f32 %v3172_v29  ;;  %v3173_v49 = vadd.f32 1.0, %v5714_v3 }
 0x814   :  { %5727 = vrcp.f32 %v3175_v42 }
 0x815   :  { %5729 = vrcp.f32 %v3173_v49 }
 0x817   :  { %v5716_v52 = vpop.eup %5715 }
 0x818   :  { %v5718_v37 = vpop.eup %5717  ;;  %v3178_v47 = vadd.f32 1.0, %v5716_v52 }
 0x819   :  { %v5720_v28 = vpop.eup %5719  ;;  %v3176_v33 = vadd.f32 1.0, %v5718_v37 }
 0x81a   :  { %v5722_v19 = vpop.eup %5721  ;;  %v3179_v7 = vadd.f32 1.0, %v5720_v28  ;;  %5731 = vrcp.f32 %v3178_v47 }
 0x81b   :  { %v3177_v1 = vadd.f32 1.0, %v5722_v19  ;;  %5733 = vrcp.f32 %v3176_v33 }
 0x81c   :  { %v5724_v24 = vpop.eup %5723  ;;  %5735 = vrcp.f32 %v3179_v7 }
 0x81d   :  { %v5726_v44 = vpop.eup %5725  ;;  %v7300_v25 = vmul.f32 %v5724_v24, %v3070_v62  ;;  %5737 = vrcp.f32 %v3177_v1 }
 0x81e   :  { %v5728_v15 = vpop.eup %5727  ;;  %v7302_v50 = vmul.f32 %v5726_v44, %v3062_v41 }
 0x81f   :  { %v5730_v10 = vpop.eup %5729  ;;  %v3254_v26 = vcombine.high %v7300_v25, %v7300_v25  ;;  %v3312_v2 = vsel %vm1525_vm1, %v7300_v25, -inf  ;;  %v7308_v4 = vmul.f32 %v5728_v15, %v3073_v12 }
 0x820   :  { %v3313_v8 = vrot.slane %v3312_v2, 4  ;;  %v3252_v46 = vcombine.high %v7302_v50, %v7302_v50  ;;  %v3284_v0 = vsel %vm1525_vm1, %v7302_v50, -inf  ;;  %v3221_v9 = vmul.f32 %v5730_v10, %v3065_v13 }
 0x821   :  { %v3319_v30 = vsel %vm1525_vm1, %v3254_v26, -inf  ;;  %v3285_v23 = vrot.slane %v3284_v0, 4  ;;  %v3255_v58 = vcombine.high %v7308_v4, %v7308_v4  ;;  %v3326_v45 = vsel %vm1525_vm1, %v7308_v4, -inf }
 0x822   :  { %v3314_v38 = vmax.f32 %v3312_v2, %v3313_v8  ;;  %v3320_v57 = vrot.slane %v3319_v30, 4  ;;  %v3291_v36 = vsel %vm1525_vm1, %v3252_v46, -inf  ;;  %v3327_v40 = vrot.slane %v3326_v45, 4 }
 0x823   :  { %v3286_v16 = vmax.f32 %v3284_v0, %v3285_v23  ;;  %v3292_v17 = vrot.slane %v3291_v36, 4  ;;  %v3333_v62 = vsel %vm1525_vm1, %v3255_v58, -inf  ;;  %v3253_v39 = vcombine.high %v3221_v9, %v3221_v9 }
 0x824   :  { %v3315_v41 = vrot.slane %v3314_v38, 2  ;;  %v3321_v21 = vmax.f32 %v3319_v30, %v3320_v57  ;;  %v3328_v43 = vmax.f32 %v3326_v45, %v3327_v40  ;;  %v3334_v12 = vrot.slane %v3333_v62, 4  ;;  %v5732_v35 = vpop.eup %5731 }
 0x825   :  { %v3287_v11 = vrot.slane %v3286_v16, 2  ;;  %v3293_v55 = vmax.f32 %v3291_v36, %v3292_v17  ;;  %v3298_v13 = vsel %vm1525_vm1, %v3221_v9, -inf  ;;  %v3305_v34 = vsel %vm1525_vm1, %v3253_v39, -inf  ;;  %v5734_v31 = vpop.eup %5733 }
 0x826   :  { %v3316_v56 = vmax.f32 %v3314_v38, %v3315_v41  ;;  %v3322_v48 = vrot.slane %v3321_v21, 2  ;;  %v3329_v18 = vrot.slane %v3328_v43, 2  ;;  %v3335_v22 = vmax.f32 %v3333_v62, %v3334_v12  ;;  %v5736_v54 = vpop.eup %5735 }
 0x827   :  { %v3288_v32 = vmax.f32 %v3286_v16, %v3287_v11  ;;  %v3294_v5 = vrot.slane %v3293_v55, 2  ;;  %v3299_v20 = vrot.slane %v3298_v13, 4  ;;  %v3306_v59 = vrot.slane %v3305_v34, 4  ;;  %v5738_v42 = vpop.eup %5737 }
 0x828   :  { %v3317_v27 = vrot.slane %v3316_v56, 1  ;;  %v3323_v53 = vmax.f32 %v3321_v21, %v3322_v48  ;;  %v3330_v29 = vmax.f32 %v3328_v43, %v3329_v18  ;;  %v3336_v3 = vrot.slane %v3335_v22, 2 }
 0x829   :  { %v3289_v49 = vrot.slane %v3288_v32, 1  ;;  %v3295_v52 = vmax.f32 %v3293_v55, %v3294_v5  ;;  %v3300_v37 = vmax.f32 %v3298_v13, %v3299_v20  ;;  %v3307_v47 = vmax.f32 %v3305_v34, %v3306_v59 }
 0x82a   :  { %v3318_v28 = vmax.f32 %v3316_v56, %v3317_v27  ;;  %v3324_v33 = vrot.slane %v3323_v53, 1  ;;  %v3331_v19 = vrot.slane %v3330_v29, 1  ;;  %v3337_v7 = vmax.f32 %v3335_v22, %v3336_v3 }
 0x82b   :  { %v3290_v1 = vmax.f32 %v3288_v32, %v3289_v49  ;;  %v3296_v24 = vrot.slane %v3295_v52, 1  ;;  %v3301_v44 = vrot.slane %v3300_v37, 2  ;;  %v3308_v15 = vrot.slane %v3307_v47, 2 }
 0x82c   :  { %v3325_v10 = vmax.f32 %v3323_v53, %v3324_v33  ;;  %v3332_v26 = vmax.f32 %v3330_v29, %v3331_v19  ;;  %v3338_v2 = vrot.slane %v3337_v7, 1  ;;  %v3648_v8 = vpack.c.bf16 %v3221_v9, %v7302_v50 }
 0x82d   :  { %v3297_v46 = vmax.f32 %v3295_v52, %v3296_v24  ;;  %v3302_v0 = vmax.f32 %v3300_v37, %v3301_v44  ;;  %v3309_v30 = vmax.f32 %v3307_v47, %v3308_v15  ;;  %v7325_v23 = vmul.f32 %v5732_v35, %v7285_v61 }
 0x82e   :  { %v3339_v58 = vmax.f32 %v3337_v7, %v3338_v2  ;;  %v7328_v45 = vmul.f32 %v5734_v31, %v7288_v51  ;;  %v7331_v38 = vmul.f32 %v5736_v54, %v7292_v63  ;;  %v7334_v57 = vmul.f32 %v5738_v42, %v7296_v6  ;;  %3780 = vmatmul.mubr.bf16.vlgmr.msra.gmra.mrb[48].mxu0 %v3648_v8 }
 0x82f   :  { %v3303_v36 = vrot.slane %v3302_v0, 1  ;;  %v3310_v40 = vrot.slane %v3309_v30, 1  ;;  %v3258_v50 = vcombine.high %v7325_v23, %v7325_v23  ;;  %v3368_v61 = vsel %vm1525_vm1, %v7325_v23, -inf  ;;  %3789 = vmatprep.mubr.bf16.mxu0 %v5947_v60 }
 0x830   :  { %v3369_v9 = vrot.slane %v3368_v61, 4  ;;  %v3256_v51 = vcombine.high %v7328_v45, %v7328_v45  ;;  %v3340_v63 = vsel %vm1525_vm1, %v7328_v45, -inf  ;;  %v3259_v6 = vcombine.high %v7331_v38, %v7331_v38  ;;  %v5151_v20 = vpop.f32.mrb[72].mxu1 }
 0x831   :  { %v3304_v16 = vmax.f32 %v3302_v0, %v3303_v36  ;;  %v3311_v17 = vmax.f32 %v3309_v30, %v3310_v40  ;;  %v3375_v62 = vsel %vm1525_vm1, %v3258_v50, -inf  ;;  %v3341_v39 = vrot.slane %v3340_v63, 4  ;;  %v3093_v27 = vpop.f32.mrb[73].mxu1 }
 0x832   :  { %v3370_v41 = vmax.f32 %v3368_v61, %v3369_v9  ;;  %v3376_v21 = vrot.slane %v3375_v62, 4  ;;  %v3347_v43 = vsel %vm1525_vm1, %v3256_v51, -inf  ;;  %v3382_v12 = vsel %vm1525_vm1, %v7331_v38, -inf  ;;  %v5152_v3 = vpop.f32.mrb[74].mxu1 }
 0x833   :  { %v3508_v11 = vmax.f32 %v3290_v1, %v3304_v16  ;;  %v3511_v55 = vmax.f32 %v3297_v46, %v3311_v17  ;;  %v3342_v13 = vmax.f32 %v3340_v63, %v3341_v39  ;;  %v3348_v34 = vrot.slane %v3347_v43, 4  ;;  %v3096_v37 = vpop.f32.mrb[75].mxu1 }
 0x834   :  { %v3371_v35 = vrot.slane %v3370_v41, 2  ;;  %v3377_v56 = vmax.f32 %v3375_v62, %v3376_v21  ;;  %v3383_v48 = vrot.slane %v3382_v12, 4  ;;  %v3389_v18 = vsel %vm1525_vm1, %v3259_v6, -inf }
 0x835   :  { %v3509_v22 = vmax.f32 %v3508_v11, %v3318_v28  ;;  %v3512_v31 = vmax.f32 %v3511_v55, %v3325_v10  ;;  %v3343_v32 = vrot.slane %v3342_v13, 2  ;;  %v3349_v5 = vmax.f32 %v3347_v43, %v3348_v34 }
 0x836   :  { %v3378_v59 = vrot.slane %v3377_v56, 2  ;;  %v3390_v54 = vrot.slane %v3389_v18, 4  ;;  %v3372_v42 = vmax.f32 %v3370_v41, %v3371_v35  ;;  %v3384_v52 = vmax.f32 %v3382_v12, %v3383_v48 }
 0x837   :  { %v3510_v53 = vmax.f32 %v3509_v22, %v3332_v26  ;;  %v3513_v29 = vmax.f32 %v3512_v31, %v3339_v58  ;;  %v3344_v49 = vmax.f32 %v3342_v13, %v3343_v32  ;;  %v3350_v33 = vrot.slane %v3349_v5, 2 }
 0x838   :  { %v3257_v19 = vcombine.high %v7334_v57, %v7334_v57  ;;  %v3379_v28 = vmax.f32 %v3377_v56, %v3378_v59  ;;  %v3391_v7 = vmax.f32 %v3389_v18, %v3390_v54  ;;  %v3354_v24 = vsel %vm1525_vm1, %v7334_v57, -inf  ;;  %v5155_v30 = vpop.f32.mrb[76].mxu1 }
 0x839   :  { %v3603_v47 = vrot.slane %v3513_v29, 7  ;;  %v3373_v44 = vrot.slane %v3372_v42, 1  ;;  %v3345_v15 = vrot.slane %v3344_v49, 1  ;;  %v3385_v10 = vrot.slane %v3384_v52, 2  ;;  %v3109_v61 = vpop.f32.mrb[77].mxu1 }
 0x83a   :  { %v3355_v26 = vrot.slane %v3354_v24, 4  ;;  %v3351_v2 = vmax.f32 %v3349_v5, %v3350_v33  ;;  %v3361_v8 = vsel %vm1525_vm1, %v3257_v19, -inf  ;;  %v7361_v46 = vadd.f32 %v5151_v20, %v7278_v14  ;;  %v5156_v16 = vpop.f32.mrb[78].mxu1 }
 0x83b   :  { %v7355_v1 = vsel %vm3565_vm2, %v3603_v47, %v3510_v53  ;;  %v7364_v0 = vadd.f32 %v7278_v14, %v3093_v27  ;;  %v3380_v58 = vrot.slane %v3379_v28, 1  ;;  %v3392_v36 = vrot.slane %v3391_v7, 2  ;;  %v3112_v21 = vpop.f32.mrb[79].mxu1 }
 0x83c   :  { %v3356_v40 = vmax.f32 %v3354_v24, %v3355_v26  ;;  %v3362_v50 = vrot.slane %v3361_v8, 4  ;;  %v4698_v9 = vmul.f32 -1.442695, %v7361_v46  ;;  %v7369_v63 = vadd.f32 %v5152_v3, %v7278_v14 }
 0x83d   :  { %v4696_v51 = vmul.f32 -1.442695, %v7364_v0  ;;  %v7372_v6 = vadd.f32 %v7278_v14, %v3096_v37  ;;  %v3386_v17 = vmax.f32 %v3384_v52, %v3385_v10  ;;  %v7375_v41 = vadd.f32 %v5155_v30, %v7278_v14 }
 0x83e   :  { %v3357_v62 = vrot.slane %v3356_v40, 2  ;;  %v3363_v39 = vmax.f32 %v3361_v8, %v3362_v50  ;;  %5739 = vpow2.f32 %v4698_v9  ;;  %v4699_v43 = vmul.f32 -1.442695, %v7369_v63 }
 0x83f   :  { %v4697_v12 = vmul.f32 -1.442695, %v7372_v6  ;;  %v7380_v11 = vadd.f32 %v7278_v14, %v3109_v61  ;;  %v3352_v55 = vrot.slane %v3351_v2, 1  ;;  %5741 = vpow2.f32 %v4696_v51 }
 0x840   :  { %v3358_v13 = vmax.f32 %v3356_v40, %v3357_v62  ;;  %v3364_v34 = vrot.slane %v3363_v39, 2  ;;  %v3393_v35 = vmax.f32 %v3391_v7, %v3392_v36  ;;  %5743 = vpow2.f32 %v4699_v43 }
 0x841   :  { %v4702_v56 = vmul.f32 -1.442695, %v7375_v41  ;;  %v7384_v48 = vadd.f32 %v5156_v16, %v7278_v14  ;;  %5745 = vpow2.f32 %v4697_v12  ;;  %v3649_v31 = vpack.c.bf16 %v7308_v4, %v7300_v25 }
 0x842   :  { %v3359_v18 = vrot.slane %v3358_v13, 1  ;;  %v3365_v22 = vmax.f32 %v3363_v39, %v3364_v34  ;;  %v3346_v32 = vmax.f32 %v3344_v49, %v3345_v15  ;;  %v3387_v5 = vrot.slane %v3386_v17, 1 }
 0x843   :  { %v4700_v20 = vmul.f32 -1.442695, %v7380_v11  ;;  %v3650_v59 = vpack.c.bf16 %v7334_v57, %v7328_v45  ;;  %v4703_v53 = vmul.f32 -1.442695, %v7384_v48  ;;  %3790 = vmatmul.mubr.bf16.gmra.mrb[52].mxu0 %v3649_v31  ;;  %v3651_v29 = vpack.c.bf16 %v7331_v38, %v7325_v23 }
 0x844   :  { %v3360_v54 = vmax.f32 %v3358_v13, %v3359_v18  ;;  %v3366_v27 = vrot.slane %v3365_v22, 1  ;;  %v3374_v3 = vmax.f32 %v3372_v42, %v3373_v44  ;;  %v3353_v52 = vmax.f32 %v3351_v2, %v3352_v55  ;;  %3799 = vmatprep.mubr.bf16.mxu0 %v5947_v60 }
 0x845   :  { %v3394_v25 = vrot.slane %v3393_v35, 1  ;;  %5747 = vpow2.f32 %v4702_v56  ;;  %v3381_v37 = vmax.f32 %v3379_v28, %v3380_v58  ;;  %v3388_v47 = vmax.f32 %v3386_v17, %v3387_v5 }
 0x846   :  { %v3367_v4 = vmax.f32 %v3365_v22, %v3366_v27  ;;  %v3514_v49 = vmax.f32 %v3346_v32, %v3360_v54  ;;  %5749 = vpow2.f32 %v4700_v20  ;;  %v7396_v44 = vadd.f32 %v7278_v14, %v3112_v21 }
 0x847   :  { %5751 = vpow2.f32 %v4703_v53  ;;  %v3395_v7 = vmax.f32 %v3393_v35, %v3394_v25 }
 0x848   :  { %v3515_v45 = vmax.f32 %v3514_v49, %v3374_v3  ;;  %v3517_v57 = vmax.f32 %v3353_v52, %v3367_v4  ;;  %v5740_v33 = vpop.eup %5739  ;;  %v4701_v36 = vmul.f32 -1.442695, %v7396_v44 }
 0x849   :  { %v5742_v19 = vpop.eup %5741  ;;  %v3182_v23 = vadd.f32 1.0, %v5740_v33 }
 0x84a   :  { %v3516_v24 = vmax.f32 %v3515_v45, %v3388_v47  ;;  %v3518_v15 = vmax.f32 %v3517_v57, %v3381_v37  ;;  %v5744_v38 = vpop.eup %5743  ;;  %v3180_v42 = vadd.f32 1.0, %v5742_v19 }
 0x84b   :  { %v5746_v10 = vpop.eup %5745  ;;  %5753 = vrcp.f32 %v3182_v23  ;;  %v3183_v28 = vadd.f32 1.0, %v5744_v38  ;;  %3800 = vmatmul.mubr.bf16.gmra.mrb[56].mxu0 %v3650_v59 }
 0x84c   :  { %v3519_v26 = vmax.f32 %v3518_v15, %v3395_v7  ;;  %v3605_v2 = vrot.slane %v3516_v24, 6  ;;  %5755 = vrcp.f32 %v3180_v42  ;;  %v3181_v8 = vadd.f32 1.0, %v5746_v10  ;;  %3809 = vmatprep.mubr.bf16.mxu0 %v5947_v60 }
 0x84d   :  { %5757 = vrcp.f32 %v3183_v28 }
 0x84e   :  { %v3606_v30 = vsel %vm3568_vm3, %v3605_v2, %v7355_v1  ;;  %v3607_v58 = vrot.slane %v3519_v26, 5  ;;  %5759 = vrcp.f32 %v3181_v8 }
 0x84f   :  { %v5748_v14 = vpop.eup %5747  ;;  %5761 = vpow2.f32 %v4701_v36 }
 0x850   :  { %v3608_v40 = vsel %vm3571_vm4, %v3607_v58, %v3606_v30  ;;  %v5750_v50 = vpop.eup %5749  ;;  %v3186_v9 = vadd.f32 1.0, %v5748_v14 }
 0x851   :  { %3629 = vst [vmem:[%s7755_s11 + $0x18] sm:$0xf] %v3608_v40  ;;  %v5752_v61 = vpop.eup %5751  ;;  %v3184_v51 = vadd.f32 1.0, %v5750_v50 }
 0x852   :  { %v3187_v16 = vadd.f32 1.0, %v5752_v61  ;;  %5763 = vrcp.f32 %v3186_v9 }
 0x853   :  { %3810 = vmatmul.mubr.bf16.gmra.mrb[60].mxu0 %v3651_v29  ;;  %5765 = vrcp.f32 %v3184_v51 }
 0x854   :  { %3819 = vmatprep.mubr.bf16.mxu0 %v5947_v60  ;;  %5767 = vrcp.f32 %v3187_v16 }
 0x855   :  { %v5754_v1 = vpop.eup %5753 }
 0x856   :  { %v5756_v17 = vpop.eup %5755  ;;  %v7408_v62 = vmul.f32 %v5754_v1, %v7361_v46 }
 0x857   :  { %v5758_v39 = vpop.eup %5757  ;;  %v7411_v21 = vmul.f32 %v5756_v17, %v7364_v0 }
 0x858   :  { %v5760_v43 = vpop.eup %5759  ;;  %v3262_v12 = vcombine.high %v7408_v62, %v7408_v62  ;;  %v3424_v55 = vsel %vm1525_vm1, %v7408_v62, -inf  ;;  %v7418_v13 = vmul.f32 %v5758_v39, %v7369_v63 }
 0x859   :  { %v3425_v34 = vrot.slane %v3424_v55, 4  ;;  %v3260_v46 = vcombine.high %v7411_v21, %v7411_v21  ;;  %v3396_v0 = vsel %vm1525_vm1, %v7411_v21, -inf  ;;  %v7425_v35 = vmul.f32 %v5760_v43, %v7372_v6  ;;  %v5762_v59 = vpop.eup %5761 }
 0x85a   :  { %v3431_v56 = vsel %vm1525_vm1, %v3262_v12, -inf  ;;  %v3397_v18 = vrot.slane %v3396_v0, 4  ;;  %v3263_v22 = vcombine.high %v7418_v13, %v7418_v13  ;;  %v3438_v63 = vsel %vm1525_vm1, %v7418_v13, -inf }
 0x85b   :  { %v3426_v31 = vmax.f32 %v3424_v55, %v3425_v34  ;;  %v3432_v32 = vrot.slane %v3431_v56, 4  ;;  %v3403_v5 = vsel %vm1525_vm1, %v3260_v46, -inf  ;;  %v3439_v20 = vrot.slane %v3438_v63, 4 }
 0x85c   :  { %v3398_v54 = vmax.f32 %v3396_v0, %v3397_v18  ;;  %v3404_v27 = vrot.slane %v3403_v5, 4  ;;  %v3445_v6 = vsel %vm1525_vm1, %v3263_v22, -inf  ;;  %v3261_v53 = vcombine.high %v7425_v35, %v7425_v35  ;;  %v5764_v19 = vpop.eup %5763 }
 0x85d   :  { %v3433_v29 = vmax.f32 %v3431_v56, %v3432_v32  ;;  %v3440_v3 = vmax.f32 %v3438_v63, %v3439_v20  ;;  %v3446_v52 = vrot.slane %v3445_v6, 4  ;;  %v3410_v49 = vsel %vm1525_vm1, %v7425_v35, -inf  ;;  %v5766_v38 = vpop.eup %5765 }
 0x85e   :  { %v3399_v25 = vrot.slane %v3398_v54, 2  ;;  %v3405_v4 = vmax.f32 %v3403_v5, %v3404_v27  ;;  %v3417_v37 = vsel %vm1525_vm1, %v3261_v53, -inf  ;;  %v3427_v47 = vrot.slane %v3426_v31, 2  ;;  %v5768_v26 = vpop.eup %5767 }
 0x85f   :  { %v3434_v45 = vrot.slane %v3433_v29, 2  ;;  %v3447_v57 = vmax.f32 %v3445_v6, %v3446_v52  ;;  %v3185_v33 = vadd.f32 1.0, %v5762_v59  ;;  %v3441_v24 = vrot.slane %v3440_v3, 2 }
 0x860   :  { %v3406_v7 = vrot.slane %v3405_v4, 2  ;;  %v3411_v15 = vrot.slane %v3410_v49, 4  ;;  %v3418_v23 = vrot.slane %v3417_v37, 4  ;;  %v3400_v42 = vmax.f32 %v3398_v54, %v3399_v25 }
 0x861   :  { %v3448_v10 = vrot.slane %v3447_v57, 2  ;;  %v3428_v30 = vmax.f32 %v3426_v31, %v3427_v47  ;;  %v3435_v58 = vmax.f32 %v3433_v29, %v3434_v45  ;;  %v3442_v36 = vmax.f32 %v3440_v3, %v3441_v24 }
 0x862   :  { %v3407_v2 = vmax.f32 %v3405_v4, %v3406_v7  ;;  %v3412_v28 = vmax.f32 %v3410_v49, %v3411_v15  ;;  %v3419_v8 = vmax.f32 %v3417_v37, %v3418_v23  ;;  %5769 = vrcp.f32 %v3185_v33 }
 0x863   :  { %v3401_v50 = vrot.slane %v3400_v42, 1  ;;  %v3449_v9 = vmax.f32 %v3447_v57, %v3448_v10  ;;  %v7440_v51 = vmul.f32 %v5764_v19, %v7375_v41  ;;  %v7443_v17 = vmul.f32 %v5766_v38, %v7380_v11 }
 0x864   :  { %v3413_v14 = vrot.slane %v3412_v28, 2  ;;  %v3420_v40 = vrot.slane %v3419_v8, 2  ;;  %v3408_v61 = vrot.slane %v3407_v2, 1  ;;  %v3429_v39 = vrot.slane %v3428_v30, 1 }
 0x865   :  { %v3436_v43 = vrot.slane %v3435_v58, 1  ;;  %v3266_v12 = vcombine.high %v7440_v51, %v7440_v51  ;;  %v7448_v55 = vmul.f32 %v5768_v26, %v7384_v48  ;;  %v3443_v34 = vrot.slane %v3442_v36, 1 }
 0x866   :  { %v3414_v16 = vmax.f32 %v3412_v28, %v3413_v14  ;;  %v3421_v1 = vmax.f32 %v3419_v8, %v3420_v40  ;;  %v3264_v41 = vcombine.high %v7443_v17, %v7443_v17  ;;  %v3402_v56 = vmax.f32 %v3400_v42, %v3401_v50 }
 0x867   :  { %v3409_v18 = vmax.f32 %v3407_v2, %v3408_v61  ;;  %v3450_v22 = vrot.slane %v3449_v9, 1  ;;  %v3452_v11 = vsel %vm1525_vm1, %v7443_v17, -inf  ;;  %v3480_v32 = vsel %vm1525_vm1, %v7440_v51, -inf }
 0x868   :  { %v3415_v46 = vrot.slane %v3414_v16, 1  ;;  %v3422_v0 = vrot.slane %v3421_v1, 1  ;;  %v3267_v48 = vcombine.high %v7448_v55, %v7448_v55  ;;  %v3430_v5 = vmax.f32 %v3428_v30, %v3429_v39 }
 0x869   :  { %v3437_v20 = vmax.f32 %v3435_v58, %v3436_v43  ;;  %v3487_v59 = vsel %vm1525_vm1, %v3266_v12, -inf  ;;  %v3459_v54 = vsel %vm1525_vm1, %v3264_v41, -inf  ;;  %v3453_v53 = vrot.slane %v3452_v11, 4 }
 0x86a   :  { %v3416_v63 = vmax.f32 %v3414_v16, %v3415_v46  ;;  %v3423_v31 = vmax.f32 %v3421_v1, %v3422_v0  ;;  %v3494_v29 = vsel %vm1525_vm1, %v7448_v55, -inf  ;;  %v3444_v3 = vmax.f32 %v3442_v36, %v3443_v34 }
 0x86b   :  { %v3481_v52 = vrot.slane %v3480_v32, 4  ;;  %v3460_v25 = vrot.slane %v3459_v54, 4  ;;  %v3451_v49 = vmax.f32 %v3449_v9, %v3450_v22  ;;  %v3501_v45 = vsel %vm1525_vm1, %v3267_v48, -inf }
 0x86c   :  { %v3520_v27 = vmax.f32 %v3402_v56, %v3416_v63  ;;  %v3523_v6 = vmax.f32 %v3409_v18, %v3423_v31  ;;  %v5770_v4 = vpop.eup %5769  ;;  %v3488_v57 = vrot.slane %v3487_v59, 4  ;;  %v3495_v33 = vrot.slane %v3494_v29, 4 }
 0x86d   :  { %v3454_v24 = vmax.f32 %v3452_v11, %v3453_v53  ;;  %v3482_v15 = vmax.f32 %v3480_v32, %v3481_v52  ;;  %v3461_v23 = vmax.f32 %v3459_v54, %v3460_v25  ;;  %v3502_v38 = vrot.slane %v3501_v45, 4 }
 0x86e   :  { %v3521_v37 = vmax.f32 %v3520_v27, %v3430_v5  ;;  %v3524_v47 = vmax.f32 %v3523_v6, %v3437_v20  ;;  %v3233_v10 = vmul.f32 %v5770_v4, %v7396_v44  ;;  %v3489_v26 = vmax.f32 %v3487_v59, %v3488_v57 }
 0x86f   :  { %v3496_v2 = vmax.f32 %v3494_v29, %v3495_v33  ;;  %v3455_v8 = vrot.slane %v3454_v24, 2  ;;  %v3483_v36 = vrot.slane %v3482_v15, 2  ;;  %v3462_v14 = vrot.slane %v3461_v23, 2 }
 0x870   :  { %v3522_v19 = vmax.f32 %v3521_v37, %v3444_v3  ;;  %v3525_v7 = vmax.f32 %v3524_v47, %v3451_v49  ;;  %v3265_v30 = vcombine.high %v3233_v10, %v3233_v10  ;;  %v3466_v58 = vsel %vm1525_vm1, %v3233_v10, -inf }
 0x871   :  { %v3503_v40 = vmax.f32 %v3501_v45, %v3502_v38  ;;  %v3467_v50 = vrot.slane %v3466_v58, 4  ;;  %v3652_v9 = vpack.c.bf16 %v7425_v35, %v7411_v21  ;;  %v3653_v44 = vpack.c.bf16 %v7418_v13, %v7408_v62  ;;  %v3647_v38 = vld [vmem:[%s7750_s6] sm:$0x3] }
 0x872   :  { %v3609_v42 = vrot.slane %v3525_v7, 7  ;;  %v3473_v61 = vsel %vm1525_vm1, %v3265_v30, -inf  ;;  %v3490_v16 = vrot.slane %v3489_v26, 2  ;;  %v3654_v39 = vpack.c.bf16 %v3233_v10, %v7443_v17 }
 0x873   :  { %v3474_v1 = vrot.slane %v3473_v61, 4  ;;  %v3456_v43 = vmax.f32 %v3454_v24, %v3455_v8  ;;  %v3497_v12 = vrot.slane %v3496_v2, 2  ;;  %v3468_v34 = vmax.f32 %v3466_v58, %v3467_v50  ;;  %3820 = vmatmul.mubr.bf16.gmra.mrb[64].mxu0 %v3652_v9 }
 0x874   :  { %v3610_v28 = vsel %vm3565_vm2, %v3609_v42, %v3522_v19  ;;  %v3655_v46 = vpack.c.bf16 %v7448_v55, %v7440_v51  ;;  %v3463_v0 = vmax.f32 %v3461_v23, %v3462_v14  ;;  %v3504_v41 = vrot.slane %v3503_v40, 2  ;;  %3829 = vmatprep.mubr.bf16.mxu0 %v5947_v60 }
 0x875   :  { %v3475_v56 = vmax.f32 %v3473_v61, %v3474_v1  ;;  %v3484_v21 = vmax.f32 %v3482_v15, %v3483_v36  ;;  %v3469_v35 = vrot.slane %v3468_v34, 2  ;;  %v3491_v18 = vmax.f32 %v3489_v26, %v3490_v16  ;;  %v5244_v1 = vld [vmem:[%s7751_s7] sm:$0xff]  }
 0x876   :  { %v3457_v13 = vrot.slane %v3456_v43, 1  ;;  %v3498_v22 = vmax.f32 %v3496_v2, %v3497_v12  ;;  %v3464_v17 = vrot.slane %v3463_v0, 1  ;;  %v3505_v63 = vmax.f32 %v3503_v40, %v3504_v41  ;;  %v5245_v41 = vld [vmem:[%s7751_s7 + $0x48] sm:$0xff]  }
 0x877   :  { %v3476_v62 = vrot.slane %v3475_v56, 2  ;;  %v3470_v11 = vmax.f32 %v3468_v34, %v3469_v35  ;;  %v3485_v32 = vrot.slane %v3484_v21, 1  ;;  %v3492_v5 = vrot.slane %v3491_v18, 1  ;;  %v5247_v35 = vld [vmem:[%s7751_s7 + $0x50] sm:$0xff]  }
 0x878   :  { %v3458_v51 = vmax.f32 %v3456_v43, %v3457_v13  ;;  %v3499_v55 = vrot.slane %v3498_v22, 1  ;;  %v3465_v54 = vmax.f32 %v3463_v0, %v3464_v17  ;;  %v3506_v27 = vrot.slane %v3505_v63, 1  ;;  %v5250_v17 = vld [vmem:[%s7751_s7 + $0x18] sm:$0xff]  }
 0x879   :  { %v3477_v31 = vmax.f32 %v3475_v56, %v3476_v62  ;;  %v3471_v48 = vrot.slane %v3470_v11, 1  ;;  %v3486_v53 = vmax.f32 %v3484_v21, %v3485_v32  ;;  %v3493_v3 = vmax.f32 %v3491_v18, %v3492_v5  ;;  %v5246_v21 = vld [vmem:[%s7751_s7 + $0x8] sm:$0xff]   ;;  %v5248_v18 = vld [vmem:[%s7751_s7 + $0x10] sm:$0xff]   ;;  %v5251_v32 = vld [vmem:[%s7751_s7 + $0x60] sm:$0xff]  }
 0x87a   :  { %v3500_v25 = vmax.f32 %v3498_v22, %v3499_v55  ;;  %v3507_v49 = vmax.f32 %v3505_v63, %v3506_v27  ;;  %v3657_v24 = vlaneseq }
 0x87b   :  { %v3478_v20 = vrot.slane %v3477_v31, 1  ;;  %v3472_v59 = vmax.f32 %v3470_v11, %v3471_v48  ;;  %3830 = vmatmul.mubr.bf16.gmra.mrb[68].mxu0 %v3653_v44  ;;  %v5243_v44 = vld [vmem:[%s7751_s7 + $0x40] sm:$0xff]   ;;  %v5249_v11 = vld [vmem:[%s7751_s7 + $0x58] sm:$0xff]  }
 0x87c   :  { %3839 = vmatprep.mubr.bf16.mxu0 %v5947_v60  ;;  %v7482_v15 = vshrl.u32 %v3657_v24, 7  ;;  %4891 = vmatprep.subr.bf16.mxu1 %v5243_v44 }
 0x87d   :  { %v3479_v6 = vmax.f32 %v3477_v31, %v3478_v20  ;;  %v3526_v29 = vmax.f32 %v3458_v51, %v3472_v59  ;;  %4892 = vmatpush3.bf16.msra.mxu1 %v5244_v1 }
 0x87e   :  { %v3659_v23 = vsub.s32 0, %v7482_v15  ;;  %4893 = vmatprep.subr.bf16.mxu1 %v5245_v41 }
 0x87f   :  { %v3529_v52 = vmax.f32 %v3465_v54, %v3479_v6  ;;  %v3527_v4 = vmax.f32 %v3526_v29, %v3486_v53  ;;  %v5252_v6 = vld [vmem:[%s7751_s7 + $0x20] sm:$0xff]  }
 0x880   :  { %v7489_v42 = vrot.slane %v3647_v38, %v3659_v23 }
 0x881   :  { %v3530_v37 = vmax.f32 %v3529_v52, %v3493_v3  ;;  %v3528_v47 = vmax.f32 %v3527_v4, %v3500_v25  ;;  %4894 = vmatpush3.bf16.msra.mxu1 %v5246_v21  ;;  %v5253_v3 = vld [vmem:[%s7751_s7 + $0x68] sm:$0xff]  }
 0x882   :  { %4895 = vmatprep.subr.bf16.mxu1 %v5247_v35 }
 0x883   :  { %v3531_v45 = vmax.f32 %v3530_v37, %v3507_v49  ;;  %v3611_v57 = vrot.slane %v3528_v47, 6  ;;  %3840 = vmatmul.mubr.bf16.gmra.mrb[72].mxu0 %v3654_v39 }
 0x884   :  { %3849 = vmatprep.mubr.bf16.mxu0 %v5947_v60  ;;  %v3663_v60 = vsub.s32 1, %v7482_v15 }
 0x885   :  { %v3613_v33 = vrot.slane %v3531_v45, 5  ;;  %v3612_v19 = vsel %vm3568_vm3, %v3611_v57, %v3610_v28  ;;  %4896 = vmatpush3.bf16.msra.mxu1 %v5248_v18 }
 0x886   :  { %v7491_v10 = vrot.slane %v3647_v38, %v3663_v60  ;;  %4897 = vmatprep.subr.bf16.mxu1 %v5249_v11  ;;  %v5255_v38 = vld [vmem:[%s7751_s7 + $0x70] sm:$0xff]  }
 0x887   :  { %v3614_v7 = vsel %vm3571_vm4, %v3613_v33, %v3612_v19  ;;  %v5254_v19 = vld [vmem:[%s7751_s7 + $0x28] sm:$0xff]  }
 0x888   :  { %3630 = vst [vmem:[%s7755_s11 + $0x1c] sm:$0xf] %v3614_v7 }
 0x889   :  { %4898 = vmatpush3.bf16.msra.mxu1 %v5250_v17 }
 0x88a   :  { %4899 = vmatprep.subr.bf16.mxu1 %v5251_v32 }
 0x88b   :  { %3850 = vmatmul.mubr.bf16.gmra.mrb[76].mxu0 %v3655_v46 }
 0x88d   :  { %4900 = vmatpush3.bf16.msra.mxu1 %v5252_v6 }
 0x88e   :  { %4901 = vmatprep.subr.bf16.mxu1 %v5253_v3 }
 0x891   :  { %4902 = vmatpush3.bf16.msra.mxu1 %v5254_v19 }
 0x892   :  { %4903 = vmatprep.subr.bf16.mxu1 %v5255_v38 }
 0x901   :  { %v3781_v26 = vpop.f32.mrb[48].mxu0 }
 0x902   :  { %v7494_v2 = vadd.f32 %v3781_v26, %v7489_v42  ;;  %v3783_v28 = vpop.f32.mrb[49].mxu0 }
 0x903   :  { %v7497_v8 = vadd.f32 %v3783_v28, %v7491_v10  ;;  %v3785_v30 = vpop.f32.mrb[50].mxu0 }
 0x904   :  { %v4720_v58 = vmul.f32 -1.442695, %v7494_v2  ;;  %v3786_v36 = vadd.f32 %v3785_v30, %v7489_v42  ;;  %v3787_v14 = vpop.f32.mrb[51].mxu0 }
 0x905   :  { %v4721_v40 = vmul.f32 -1.442695, %v7497_v8  ;;  %v3788_v50 = vadd.f32 %v3787_v14, %v7491_v10  ;;  %v5257_v14 = vld [vmem:[%s7751_s7 + $0x78] sm:$0xff]  }
 0x906   :  { %5771 = vpow2.f32 %v4720_v58  ;;  %v4722_v61 = vmul.f32 -1.442695, %v3786_v36  ;;  %v5256_v58 = vld [vmem:[%s7751_s7 + $0x30] sm:$0xff]  }
 0x907   :  { %5773 = vpow2.f32 %v4721_v40  ;;  %v4723_v9 = vmul.f32 -1.442695, %v3788_v50  ;;  %4904 = vmatpush3.bf16.msra.mxu1 %v5256_v58 }
 0x908   :  { %5775 = vpow2.f32 %v4722_v61  ;;  %4905 = vmatprep.subr.bf16.mxu1 %v5257_v14 }
 0x909   :  { %5777 = vpow2.f32 %v4723_v9 }
 0x910   :  { %v5772_v16 = vpop.eup %5771 }
 0x911   :  { %v5774_v39 = vpop.eup %5773  ;;  %v3956_v43 = vadd.f32 1.0, %v5772_v16 }
 0x912   :  { %v5776_v12 = vpop.eup %5775  ;;  %v3957_v34 = vadd.f32 1.0, %v5774_v39 }
 0x913   :  { %v5778_v46 = vpop.eup %5777  ;;  %5779 = vrcp.f32 %v3956_v43  ;;  %v3958_v0 = vadd.f32 1.0, %v5776_v12  ;;  %v5258_v43 = vld [vmem:[%s7751_s7 + $0x38] sm:$0xff]   ;;  %s5949_s7 = smov [#allocation4]  }
 0x914   :  { %5781 = vrcp.f32 %v3957_v34  ;;  %v3959_v56 = vadd.f32 1.0, %v5778_v46  ;;  %4906 = vmatpush3.bf16.msra.mxu1 %v5258_v43  ;;  %s4384_s14 = sshll.u32 %s5949_s7, 4  ;;  %s4385_s14 = int_to_ptr.vmem [resolvable:$true] %s4384_s14 }
 0x915   :  { %5783 = vrcp.f32 %v3958_v0  ;;  %s5899_s3 = scalar_lea.vmem %s4385_s14, 64  ;;  %p5904_p1 = scmp.lt.s32.totalorder %s4385_s14, %s4385_s14 }
 0x916   :  { %5785 = vrcp.f32 %v3959_v56  ;;  %v3791_v62 = vpop.f32.mrb[52].mxu0  ;;  %p5900_p0 = scmp.ne.s32.totalorder %s4385_s14, %s5899_s3  ;;  %p5905_p2 = scmp.lt.s32.totalorder %s5899_s3, %s5899_s3 }
 0x917   :  { %v7522_v13 = vadd.f32 %v3791_v62, %v7489_v42  ;;  %v3793_v22 = vpop.f32.mrb[53].mxu0 }
 0x918   :  { %v7531_v63 = vadd.f32 %v3793_v22, %v7491_v10  ;;  %v3795_v31 = vpop.f32.mrb[54].mxu0  ;;  %p5906_p3 = por %p5905_p2, %p5904_p1 }
 0x919   :  { %v4724_v48 = vmul.f32 -1.442695, %v7522_v13  ;;  %v7538_v5 = vadd.f32 %v3795_v31, %v7489_v42  ;;  %v3797_v20 = vpop.f32.mrb[55].mxu0 }
 0x91a   :  { %v4725_v55 = vmul.f32 -1.442695, %v7531_v63  ;;  %v7542_v59 = vadd.f32 %v3797_v20, %v7491_v10  ;;  %p5907_p4 = pnand %p5906_p3, %p5900_p0 }
 0x91b   :  { %5787 = vpow2.f32 %v4724_v48  ;;  %v4726_v27 = vmul.f32 -1.442695, %v7538_v5 }
 0x91c   :  { %5789 = vpow2.f32 %v4725_v55  ;;  %v4727_v29 = vmul.f32 -1.442695, %v7542_v59 }
 0x91d   :  { %v5780_v51 = vpop.eup %5779  ;;  %5791 = vpow2.f32 %v4726_v27 }
 0x91e   :  { %v5782_v54 = vpop.eup %5781  ;;  %v4052_v25 = vmul.f32 %v5780_v51, %v7494_v2  ;;  %5793 = vpow2.f32 %v4727_v29  ;;  %v3801_v47 = vpop.f32.mrb[56].mxu0 }
 0x91f   :  { %v5784_v53 = vpop.eup %5783  ;;  %v4053_v49 = vmul.f32 %v5782_v54, %v7497_v8  ;;  %v7557_v57 = vadd.f32 %v3801_v47, %v7489_v42  ;;  %v3803_v33 = vpop.f32.mrb[57].mxu0 }
 0x920   :  { %v5786_v52 = vpop.eup %5785  ;;  %v4054_v4 = vmul.f32 %v5784_v53, %v3786_v36  ;;  %v7565_v24 = vadd.f32 %v3803_v33, %v7491_v10  ;;  %v3805_v23 = vpop.f32.mrb[58].mxu0 }
 0x921   :  { %v4055_v37 = vmul.f32 %v5786_v52, %v3788_v50  ;;  %v4728_v60 = vmul.f32 -1.442695, %v7557_v57  ;;  %v7572_v26 = vadd.f32 %v3805_v23, %v7489_v42  ;;  %v3807_v2 = vpop.f32.mrb[59].mxu0 }
 0x922   :  { %v7554_v45 = vadd.f32 %v4054_v4, %v4052_v25  ;;  %v4729_v28 = vmul.f32 -1.442695, %v7565_v24  ;;  %v7576_v8 = vadd.f32 %v3807_v2, %v7491_v10 }
 0x923   :  { %v7562_v7 = vadd.f32 %v4055_v37, %v4053_v49  ;;  %5795 = vpow2.f32 %v4728_v60  ;;  %v4730_v30 = vmul.f32 -1.442695, %v7572_v26 }
 0x924   :  { %5797 = vpow2.f32 %v4729_v28  ;;  %v4731_v36 = vmul.f32 -1.442695, %v7576_v8 }
 0x925   :  { %v5788_v40 = vpop.eup %5787  ;;  %5799 = vpow2.f32 %v4730_v30 }
 0x926   :  { %v5790_v50 = vpop.eup %5789  ;;  %v3960_v61 = vadd.f32 1.0, %v5788_v40  ;;  %5801 = vpow2.f32 %v4731_v36  ;;  %v3811_v9 = vpop.f32.mrb[60].mxu0 }
 0x927   :  { %v5792_v44 = vpop.eup %5791  ;;  %v3961_v16 = vadd.f32 1.0, %v5790_v50  ;;  %v7587_v1 = vadd.f32 %v3811_v9, %v7489_v42  ;;  %v3813_v39 = vpop.f32.mrb[61].mxu0 }
 0x928   :  { %v5794_v12 = vpop.eup %5793  ;;  %5803 = vrcp.f32 %v3960_v61  ;;  %v3962_v34 = vadd.f32 1.0, %v5792_v44  ;;  %v7593_v46 = vadd.f32 %v3813_v39, %v7491_v10  ;;  %v3815_v0 = vpop.f32.mrb[62].mxu0 }
 0x929   :  { %5805 = vrcp.f32 %v3961_v16  ;;  %v3963_v41 = vadd.f32 1.0, %v5794_v12  ;;  %v4732_v56 = vmul.f32 -1.442695, %v7587_v1  ;;  %v7597_v21 = vadd.f32 %v3815_v0, %v7489_v42  ;;  %v3817_v35 = vpop.f32.mrb[63].mxu0 }
 0x92a   :  { %5807 = vrcp.f32 %v3962_v34  ;;  %v4733_v18 = vmul.f32 -1.442695, %v7593_v46  ;;  %v7601_v62 = vadd.f32 %v3817_v35, %v7491_v10 }
 0x92b   :  { %5809 = vrcp.f32 %v3963_v41  ;;  %v4734_v22 = vmul.f32 -1.442695, %v7597_v21 }
 0x92c   :  { %5811 = vpow2.f32 %v4732_v56  ;;  %v4735_v11 = vmul.f32 -1.442695, %v7601_v62 }
 0x92d   :  { %v5796_v17 = vpop.eup %5795  ;;  %5813 = vpow2.f32 %v4733_v18 }
 0x92e   :  { %v5798_v31 = vpop.eup %5797  ;;  %v3964_v32 = vadd.f32 1.0, %v5796_v17  ;;  %5815 = vpow2.f32 %v4734_v22 }
 0x92f   :  { %v5800_v48 = vpop.eup %5799  ;;  %v3965_v20 = vadd.f32 1.0, %v5798_v31  ;;  %5817 = vpow2.f32 %v4735_v11 }
 0x930   :  { %v5802_v51 = vpop.eup %5801  ;;  %5819 = vrcp.f32 %v3964_v32  ;;  %v3966_v55 = vadd.f32 1.0, %v5800_v48 }
 0x931   :  { %5821 = vrcp.f32 %v3965_v20  ;;  %v3967_v54 = vadd.f32 1.0, %v5802_v51 }
 0x932   :  { %v5804_v27 = vpop.eup %5803  ;;  %5823 = vrcp.f32 %v3966_v55 }
 0x933   :  { %v5806_v6 = vpop.eup %5805  ;;  %v4056_v53 = vmul.f32 %v5804_v27, %v7522_v13  ;;  %5825 = vrcp.f32 %v3967_v54 }
 0x934   :  { %v5808_v29 = vpop.eup %5807  ;;  %v4057_v3 = vmul.f32 %v5806_v6, %v7531_v63 }
 0x935   :  { %v5810_v52 = vpop.eup %5809  ;;  %v4085_v25 = vadd.f32 %v7554_v45, %v4056_v53  ;;  %v4058_v4 = vmul.f32 %v5808_v29, %v7538_v5 }
 0x936   :  { %v5812_v49 = vpop.eup %5811  ;;  %v4098_v37 = vadd.f32 %v7562_v7, %v4057_v3  ;;  %v4059_v47 = vmul.f32 %v5810_v52, %v7542_v59 }
 0x937   :  { %v5814_v33 = vpop.eup %5813  ;;  %v4086_v19 = vadd.f32 %v4085_v25, %v4058_v4  ;;  %v3968_v23 = vadd.f32 1.0, %v5812_v49 }
 0x938   :  { %v5816_v38 = vpop.eup %5815  ;;  %v4099_v60 = vadd.f32 %v4098_v37, %v4059_v47  ;;  %v3969_v13 = vadd.f32 1.0, %v5814_v33 }
 0x939   :  { %v5818_v2 = vpop.eup %5817  ;;  %5827 = vrcp.f32 %v3968_v23  ;;  %v3970_v28 = vadd.f32 1.0, %v5816_v38 }
 0x93a   :  { %v5820_v63 = vpop.eup %5819  ;;  %5829 = vrcp.f32 %v3969_v13  ;;  %v3971_v30 = vadd.f32 1.0, %v5818_v2 }
 0x93b   :  { %v5822_v45 = vpop.eup %5821  ;;  %v4060_v5 = vmul.f32 %v5820_v63, %v7557_v57  ;;  %5831 = vrcp.f32 %v3970_v28 }
 0x93c   :  { %v5824_v58 = vpop.eup %5823  ;;  %v4061_v7 = vmul.f32 %v5822_v45, %v7565_v24  ;;  %5833 = vrcp.f32 %v3971_v30 }
 0x93d   :  { %v5826_v59 = vpop.eup %5825  ;;  %v4087_v36 = vadd.f32 %v4086_v19, %v4060_v5  ;;  %v4062_v14 = vmul.f32 %v5824_v58, %v7572_v26 }
 0x93e   :  { %v4100_v40 = vadd.f32 %v4099_v60, %v4061_v7  ;;  %v4063_v50 = vmul.f32 %v5826_v59, %v7576_v8 }
 0x93f   :  { %v4088_v61 = vadd.f32 %v4087_v36, %v4062_v14 }
 0x940   :  { %v4101_v9 = vadd.f32 %v4100_v40, %v4063_v50 }
 0x943   :  { %v5828_v44 = vpop.eup %5827 }
 0x944   :  { %v5830_v16 = vpop.eup %5829  ;;  %v4064_v39 = vmul.f32 %v5828_v44, %v7587_v1 }
 0x945   :  { %v5832_v43 = vpop.eup %5831  ;;  %v4065_v57 = vmul.f32 %v5830_v16, %v7593_v46 }
 0x946   :  { %v5834_v12 = vpop.eup %5833  ;;  %v4089_v34 = vadd.f32 %v4088_v61, %v4064_v39  ;;  %v4066_v24 = vmul.f32 %v5832_v43, %v7597_v21  ;;  %v3821_v18 = vpop.f32.mrb[64].mxu0 }
 0x947   :  { %v4102_v0 = vadd.f32 %v4101_v9, %v4065_v57  ;;  %v4067_v41 = vmul.f32 %v5834_v12, %v7601_v62  ;;  %v7620_v11 = vadd.f32 %v3821_v18, %v7489_v42  ;;  %v3823_v1 = vpop.f32.mrb[65].mxu0 }
 0x948   :  { %v4090_v26 = vadd.f32 %v4089_v34, %v4066_v24  ;;  %v7623_v46 = vadd.f32 %v3823_v1, %v7491_v10  ;;  %v3825_v31 = vpop.f32.mrb[66].mxu0 }
 0x949   :  { %v4103_v56 = vadd.f32 %v4102_v0, %v4067_v41  ;;  %v4736_v21 = vmul.f32 -1.442695, %v7620_v11  ;;  %v7627_v62 = vadd.f32 %v3825_v31, %v7489_v42  ;;  %v3827_v48 = vpop.f32.mrb[67].mxu0 }
 0x94a   :  { %v4091_v35 = vrot.slane %v4090_v26, 4  ;;  %v4737_v51 = vmul.f32 -1.442695, %v7623_v46  ;;  %v7631_v55 = vadd.f32 %v3827_v48, %v7491_v10 }
 0x94b   :  { %v4104_v8 = vrot.slane %v4103_v56, 4  ;;  %5835 = vpow2.f32 %v4736_v21  ;;  %v4738_v27 = vmul.f32 -1.442695, %v7627_v62 }
 0x94c   :  { %v4092_v22 = vadd.f32 %v4091_v35, %v4090_v26  ;;  %5837 = vpow2.f32 %v4737_v51  ;;  %v4739_v53 = vmul.f32 -1.442695, %v7631_v55 }
 0x94d   :  { %v4105_v17 = vadd.f32 %v4104_v8, %v4103_v56  ;;  %5839 = vpow2.f32 %v4738_v27 }
 0x94e   :  { %v4093_v32 = vrot.slane %v4092_v22, 2  ;;  %5841 = vpow2.f32 %v4739_v53  ;;  %v3831_v52 = vpop.f32.mrb[68].mxu0 }
 0x94f   :  { %v4106_v20 = vrot.slane %v4105_v17, 2  ;;  %v7636_v4 = vadd.f32 %v3831_v52, %v7489_v42  ;;  %v3833_v49 = vpop.f32.mrb[69].mxu0 }
 0x950   :  { %v4094_v54 = vadd.f32 %v4093_v32, %v4092_v22  ;;  %v7639_v47 = vadd.f32 %v3833_v49, %v7491_v10  ;;  %v3835_v33 = vpop.f32.mrb[70].mxu0 }
 0x951   :  { %v4107_v6 = vadd.f32 %v4106_v20, %v4105_v17  ;;  %v4740_v23 = vmul.f32 -1.442695, %v7636_v4  ;;  %v7645_v38 = vadd.f32 %v3835_v33, %v7489_v42  ;;  %v3837_v60 = vpop.f32.mrb[71].mxu0 }
 0x952   :  { %v4095_v29 = vrot.slane %v4094_v54, 1  ;;  %v4741_v2 = vmul.f32 -1.442695, %v7639_v47  ;;  %v7651_v28 = vadd.f32 %v3837_v60, %v7491_v10 }
 0x953   :  { %v4108_v3 = vrot.slane %v4107_v6, 1  ;;  %5843 = vpow2.f32 %v4740_v23  ;;  %v4742_v63 = vmul.f32 -1.442695, %v7645_v38 }
 0x954   :  { %v4096_v25 = vadd.f32 %v4095_v29, %v4094_v54  ;;  %5845 = vpow2.f32 %v4741_v2  ;;  %v4743_v45 = vmul.f32 -1.442695, %v7651_v28 }
 0x955   :  { %v4109_v37 = vadd.f32 %v4108_v3, %v4107_v6  ;;  %v5836_v5 = vpop.eup %5835  ;;  %5847 = vpow2.f32 %v4742_v63 }
 0x956   :  { %v7641_v19 = vmul.f32 0.015625, %v4096_v25  ;;  %v5838_v58 = vpop.eup %5837  ;;  %v3972_v7 = vadd.f32 1.0, %v5836_v5  ;;  %5849 = vpow2.f32 %v4743_v45  ;;  %v3841_v59 = vpop.f32.mrb[72].mxu0 }
 0x957   :  { %v7647_v13 = vmul.f32 0.015625, %v4109_v37  ;;  %v5840_v36 = vpop.eup %5839  ;;  %v3973_v14 = vadd.f32 1.0, %v5838_v58  ;;  %v7658_v40 = vadd.f32 %v3841_v59, %v7489_v42  ;;  %v3843_v50 = vpop.f32.mrb[73].mxu0 }
 0x958   :  { %v5842_v61 = vpop.eup %5841  ;;  %5851 = vrcp.f32 %v3972_v7  ;;  %v3974_v9 = vadd.f32 1.0, %v5840_v36  ;;  %v7661_v44 = vadd.f32 %v3843_v50, %v7491_v10  ;;  %v3845_v16 = vpop.f32.mrb[74].mxu0 }
 0x959   :  { %v4145_v30 = vcombine.low %v7641_v19, %v7647_v13  ;;  %5853 = vrcp.f32 %v3973_v14  ;;  %v3975_v39 = vadd.f32 1.0, %v5842_v61  ;;  %v4744_v43 = vmul.f32 -1.442695, %v7658_v40  ;;  %v3847_v12 = vpop.f32.mrb[75].mxu0 }
 0x95a   :  { %v7665_v57 = vadd.f32 %v3845_v16, %v7489_v42  ;;  %5855 = vrcp.f32 %v3974_v9  ;;  %v4745_v34 = vmul.f32 -1.442695, %v7661_v44  ;;  %v7669_v24 = vadd.f32 %v3847_v12, %v7491_v10 }
 0x95b   :  { %5857 = vrcp.f32 %v3975_v39 }
 0x95c   :  { %v4746_v0 = vmul.f32 -1.442695, %v7665_v57  ;;  %5859 = vpow2.f32 %v4744_v43  ;;  %v4747_v41 = vmul.f32 -1.442695, %v7669_v24 }
 0x95d   :  { %v5844_v26 = vpop.eup %5843  ;;  %5861 = vpow2.f32 %v4745_v34 }
 0x95e   :  { %v5846_v56 = vpop.eup %5845  ;;  %v3976_v35 = vadd.f32 1.0, %v5844_v26  ;;  %5863 = vpow2.f32 %v4746_v0  ;;  %v3851_v8 = vpop.f32.mrb[76].mxu0 }
 0x95f   :  { %v5848_v18 = vpop.eup %5847  ;;  %v3977_v22 = vadd.f32 1.0, %v5846_v56  ;;  %5865 = vpow2.f32 %v4747_v41  ;;  %v7674_v1 = vadd.f32 %v3851_v8, %v7489_v42  ;;  %v3853_v17 = vpop.f32.mrb[77].mxu0 }
 0x960   :  { %v5850_v31 = vpop.eup %5849  ;;  %5867 = vrcp.f32 %v3976_v35  ;;  %v3978_v32 = vadd.f32 1.0, %v5848_v18  ;;  %v7677_v21 = vadd.f32 %v3853_v17, %v7491_v10  ;;  %v3855_v48 = vpop.f32.mrb[78].mxu0 }
 0x961   :  { %5869 = vrcp.f32 %v3977_v22  ;;  %v3979_v20 = vadd.f32 1.0, %v5850_v31  ;;  %v4748_v51 = vmul.f32 -1.442695, %v7674_v1  ;;  %v7681_v54 = vadd.f32 %v3855_v48, %v7489_v42  ;;  %v3857_v27 = vpop.f32.mrb[79].mxu0 }
 0x962   :  { %v5852_v6 = vpop.eup %5851  ;;  %5871 = vrcp.f32 %v3978_v32  ;;  %v4749_v53 = vmul.f32 -1.442695, %v7677_v21  ;;  %v7685_v29 = vadd.f32 %v3857_v27, %v7491_v10 }
 0x963   :  { %v5854_v3 = vpop.eup %5853  ;;  %5873 = vrcp.f32 %v3979_v20  ;;  %v4750_v52 = vmul.f32 -1.442695, %v7681_v54  ;;  %v4068_v42 = vmul.f32 %v5852_v6, %v7620_v11 }
 0x964   :  { %v5856_v25 = vpop.eup %5855  ;;  %5875 = vpow2.f32 %v4748_v51  ;;  %v4751_v49 = vmul.f32 -1.442695, %v7685_v29  ;;  %v4069_v60 = vmul.f32 %v5854_v3, %v7623_v46 }
 0x965   :  { %v5858_v37 = vpop.eup %5857  ;;  %v4070_v33 = vmul.f32 %v5856_v25, %v7627_v62  ;;  %5877 = vpow2.f32 %v4749_v53 }
 0x966   :  { %v5860_v23 = vpop.eup %5859  ;;  %v4071_v10 = vmul.f32 %v5858_v37, %v7631_v55  ;;  %5879 = vpow2.f32 %v4750_v52 }
 0x967   :  { %v5862_v2 = vpop.eup %5861  ;;  %v4110_v63 = vadd.f32 %v4070_v33, %v4068_v42  ;;  %v3980_v45 = vadd.f32 1.0, %v5860_v23  ;;  %5881 = vpow2.f32 %v4751_v49 }
 0x968   :  { %v5864_v5 = vpop.eup %5863  ;;  %v4123_v58 = vadd.f32 %v4071_v10, %v4069_v60  ;;  %v3981_v7 = vadd.f32 1.0, %v5862_v2 }
 0x969   :  { %v5866_v59 = vpop.eup %5865  ;;  %5883 = vrcp.f32 %v3980_v45  ;;  %v3982_v36 = vadd.f32 1.0, %v5864_v5 }
 0x96a   :  { %v5868_v11 = vpop.eup %5867  ;;  %5885 = vrcp.f32 %v3981_v7  ;;  %v3983_v62 = vadd.f32 1.0, %v5866_v59 }
 0x96b   :  { %v5870_v14 = vpop.eup %5869  ;;  %v4072_v50 = vmul.f32 %v5868_v11, %v7636_v4  ;;  %5887 = vrcp.f32 %v3982_v36 }
 0x96c   :  { %v5872_v46 = vpop.eup %5871  ;;  %v4073_v55 = vmul.f32 %v5870_v14, %v7639_v47  ;;  %5889 = vrcp.f32 %v3983_v62 }
 0x96d   :  { %v5874_v61 = vpop.eup %5873  ;;  %v4111_v9 = vadd.f32 %v4110_v63, %v4072_v50  ;;  %v4074_v16 = vmul.f32 %v5872_v46, %v7645_v38  ;;  %v4175_v50 = vpack.c.bf16 %v7647_v13, %v7647_v13 }
 0x96e   :  { %v5876_v39 = vpop.eup %5875  ;;  %v4124_v43 = vadd.f32 %v4123_v58, %v4073_v55  ;;  %v4075_v12 = vmul.f32 %v5874_v61, %v7651_v28  ;;  %v5948_v58 = vmov 1983009808  }
 0x96f   :  { %v5878_v34 = vpop.eup %5877  ;;  %v4112_v0 = vadd.f32 %v4111_v9, %v4074_v16  ;;  %v3984_v41 = vadd.f32 1.0, %v5876_v39  ;;  %v4147_v7 = vunpack.c.l.s4 %v5948_v58 }
 0x970   :  { %v5880_v26 = vpop.eup %5879  ;;  %v4125_v56 = vadd.f32 %v4124_v43, %v4075_v12  ;;  %v3985_v35 = vadd.f32 1.0, %v5878_v34  ;;  %v4222_v43 = vunpack.c.l.b16 %v4175_v50 }
 0x971   :  { %v5882_v4 = vpop.eup %5881  ;;  %5891 = vrcp.f32 %v3984_v41  ;;  %v3986_v8 = vadd.f32 1.0, %v5880_v26 }
 0x972   :  { %5893 = vrcp.f32 %v3985_v35  ;;  %v3987_v47 = vadd.f32 1.0, %v5882_v4 }
 0x973   :  { %v5884_v18 = vpop.eup %5883  ;;  %5895 = vrcp.f32 %v3986_v8 }
 0x974   :  { %v5886_v22 = vpop.eup %5885  ;;  %v4076_v38 = vmul.f32 %v5884_v18, %v7658_v40  ;;  %5897 = vrcp.f32 %v3987_v47 }
 0x975   :  { %v5888_v17 = vpop.eup %5887  ;;  %v4077_v28 = vmul.f32 %v5886_v22, %v7661_v44 }
 0x976   :  { %v5890_v31 = vpop.eup %5889  ;;  %v4113_v32 = vadd.f32 %v4112_v0, %v4076_v38  ;;  %v4078_v48 = vmul.f32 %v5888_v17, %v7665_v57 }
 0x977   :  { %v4126_v20 = vadd.f32 %v4125_v56, %v4077_v28  ;;  %v4079_v51 = vmul.f32 %v5890_v31, %v7669_v24 }
 0x978   :  { %v4114_v27 = vadd.f32 %v4113_v32, %v4078_v48 }
 0x979   :  { %v4127_v6 = vadd.f32 %v4126_v20, %v4079_v51 }
 0x97b   :  { %v5892_v53 = vpop.eup %5891 }
 0x97c   :  { %v5894_v3 = vpop.eup %5893  ;;  %v4080_v52 = vmul.f32 %v5892_v53, %v7674_v1 }
 0x97d   :  { %v5896_v25 = vpop.eup %5895  ;;  %v4081_v40 = vmul.f32 %v5894_v3, %v7677_v21 }
 0x97e   :  { %v5898_v49 = vpop.eup %5897  ;;  %v4115_v37 = vadd.f32 %v4114_v27, %v4080_v52  ;;  %v4082_v44 = vmul.f32 %v5896_v25, %v7681_v54  ;;  %v4148_v54 = vunpack.c.0.s8 %v4147_v7 }
 0x97f   :  { %v4128_v42 = vadd.f32 %v4127_v6, %v4081_v40  ;;  %v4083_v33 = vmul.f32 %v5898_v49, %v7685_v29  ;;  %v4174_v29 = vpack.c.bf16 %v7641_v19, %v7641_v19 }
 0x980   :  { %v4116_v57 = vadd.f32 %v4115_v37, %v4082_v44  ;;  %v4151_v61 = vsub.s32 %v4148_v54, %v7482_v15 }
 0x981   :  { %v4129_v23 = vadd.f32 %v4128_v42, %v4083_v33  ;;  %v4221_v16 = vunpack.c.l.b16 %v4174_v29 }
 0x982   :  { %v4117_v60 = vrot.slane %v4116_v57, 4  ;;  %v4152_v26 = vrot.slane %v4145_v30, %v4151_v61 }
 0x983   :  { %v4130_v24 = vrot.slane %v4129_v23, 4 }
 0x984   :  { %v4118_v10 = vadd.f32 %v4117_v60, %v4116_v57 }
 0x985   :  { %v4131_v2 = vadd.f32 %v4130_v24, %v4129_v23 }
 0x986   :  { %v4119_v63 = vrot.slane %v4118_v10, 2 }
 0x987   :  { %v4132_v45 = vrot.slane %v4131_v2, 2 }
 0x988   :  { %v4120_v5 = vadd.f32 %v4119_v63, %v4118_v10 }
 0x989   :  { %v4133_v1 = vadd.f32 %v4132_v45, %v4131_v2 }
 0x98a   :  { %v4121_v21 = vrot.slane %v4120_v5, 1 }
 0x98b   :  { %v4134_v59 = vrot.slane %v4133_v1, 1 }
 0x98c   :  { %v4122_v36 = vadd.f32 %v4121_v21, %v4120_v5 }
 0x98d   :  { %v4135_v11 = vadd.f32 %v4134_v59, %v4133_v1 }
 0x98e   :  { %v4139_v62 = vmul.f32 0.015625, %v4122_v36 }
 0x98f   :  { %v4140_v14 = vmul.f32 0.015625, %v4135_v11 }
 0x990   :  { %v4176_v46 = vpack.c.bf16 %v4139_v62, %v4139_v62 }
 0x991   :  { %v4177_v55 = vpack.c.bf16 %v4140_v14, %v4140_v14  ;;  %v4153_v9 = vcombine.low %v4139_v62, %v4140_v14 }
 0x992   :  { %v4223_v39 = vunpack.c.l.b16 %v4176_v46 }
 0x993   :  { %v4224_v12 = vunpack.c.l.b16 %v4177_v55  ;;  %v4160_v34 = vrot.slane %v4153_v9, %v4151_v61 }
 0x994   :  { %v4225_v0 = vsel %vm3565_vm2, %v4223_v39, %v4221_v16 }
 0x995   :  { %v4226_v41 = vsel %vm3565_vm2, %v4224_v12, %v4222_v43  ;;  %v4165_v56 = vrot.slane %v4160_v34, 7  ;;  %v4227_v4 = vpack.c.b16 %v4225_v0, %v4225_v0 }
 0x996   :  { %v4228_v35 = vpack.c.b16 %v4226_v41, %v4226_v41 }
 0x997   :  { %v4166_v15 = vsel %vm3565_vm2, %v4165_v56, %v4152_v26 }
 0x998   :  { %4359 = vmatprep.mubr.bf16.mxu1 %v4228_v35  ;;  %v4167_v8 = vsel %vm3571_vm4, %v4165_v56, %v4166_v15 }
 0x999   :  { %4360 = vmatmul.mubr.bf16.vlgmr.msra.gmra.mrb[80].mxu1 %v4227_v4  ;;  %v4169_v47 = vsel %vm4168_vm5, %v4165_v56, %v4167_v8 }
 0x99a   :  { %v4171_v18 = vsel %vm4170_vm6, %v4165_v56, %v4169_v47 }
 0x99b   :  { %4173 = vst [vmem:[#allocation4] sm:$0xf] %v4171_v18 }
 0x99c   :  { %5910 = shalt.err (!%p5907_p4)
}
 0x99d   :  { %s5911_s0 = scalar_lea.hbm %s7754_s10, 64 }
 0x99e   :  { %p5912_p5 = scmp.ne.s32.totalorder %s7754_s10, %s5911_s0  ;;  %p5915_p6 = scmp.lt.u32.totalorder %s5911_s0, %s7754_s10 }
 0x9a0   :  { %p5917_p7 = pnand %p5915_p6, %p5912_p5 }
 0x9a2   :  { %5920 = shalt.err (!%p5917_p7)
}
 0x9a3   :  { %4387 = dma.vmem_to_hbm [thread:$0]  %s4385_s14, 64, %s7754_s10, [#allocation5]   ;;  %v4752_v30 = vld [vmem:[%s7752_s8] ss:$0 sm:$0xff] }
 0x9a4   :  { %s5950_s25 = smov [#allocation2]  }
 0x9a5   :  { %s4374_s26 = sshll.u32 %s5950_s25, 4  ;;  %s4375_s26 = int_to_ptr.vmem [resolvable:$true] %s4374_s26 }
 0x9a6   :  { %s5921_s27 = scalar_lea.vmem %s4375_s26, 32  ;;  %p5926_p9 = scmp.lt.s32.totalorder %s4375_s26, %s4375_s26 }
 0x9a7   :  { %p5922_p8 = scmp.ne.s32.totalorder %s4375_s26, %s5921_s27  ;;  %p5927_p10 = scmp.lt.s32.totalorder %s5921_s27, %s5921_s27 }
 0x9a9   :  { %p5928_p11 = por %p5927_p10, %p5926_p9 }
 0x9ab   :  { %p5929_p12 = pnand %p5928_p11, %p5922_p8 }
 0xa6c   :  { %v4907_v19 = vpop.f32.mrb[80].mxu1 }
 0xa6d   :  { %v4908_v13 = vpop.f32.mrb[81].mxu1 }
 0xa6e   :  { %v4909_v22 = vadd.f32 %v4908_v13, %v4907_v19  ;;  %v4910_v38 = vpop.f32.mrb[82].mxu1 }
 0xa6f   :  { %v4911_v17 = vpop.f32.mrb[83].mxu1 }
 0xa70   :  { %v4362_v28 = vadd.f32 %v4909_v22, %v4752_v30 }
 0xa72   :  { %4367 = vst [vmem:[#allocation2] sm:$0x3] %v4362_v28 }
 0xa73   :  { %5932 = shalt.err (!%p5929_p12)
}
 0xa74   :  { %s5933_s5 = scalar_lea.hbm %s7753_s9, 32 }
 0xa75   :  { %p5934_p13 = scmp.ne.s32.totalorder %s7753_s9, %s5933_s5  ;;  %p5937_p0 = scmp.lt.u32.totalorder %s5933_s5, %s7753_s9 }
 0xa77   :  { %p5939_p1 = pnand %p5937_p0, %p5934_p13 }
 0xa79   :  { %5942 = shalt.err (!%p5939_p1)
}
 0xa7a   :  { %4377 = dma.vmem_to_hbm [thread:$0]  %s4375_s26, 32, %s7753_s9, [#allocation3]  }
 0xa7b   :  { %5943 = dma.done.wait [#allocation3], 32  }
 0xa7c   :  { %5944 = vsyncadd [#allocation3], 4294967264 }
 0xa7d   :  { %5945 = dma.done.wait [#allocation5], 64  }
 0xa7e   :  { %5946 = vsyncadd [#allocation5], 4294967232 }
 0xa7f   :  { %4398 = vsyncpa [#allocation3], 1 }
 0xa80   :  { %4399 = vsyncpa [#allocation5], 1 }

</bundles_post_ra>
